<compile_context>
chip_gen: v5e
topology: v5e:2x2
jax: 0.10.0
libtpu: 0.0.40
codegen_flags: <defaults>
</compile_context>

<pallas_src>
import numpy as np
import jax
import jax.numpy as jnp
from jax.experimental import pallas as pl
from jax.experimental.pallas import tpu as pltpu

# Static geometry (fc1 expects 64*11*11 features, so the input must be 1x28x28).
IN_HW = 28
P1_HW = 13            # pooled conv1 map is 13x13
C2_HW = 11            # conv2 valid output is 11x11
POOL_BLK = 176        # 13*13 = 169 pooled positions, padded up to a multiple of 8
L2 = C2_HW * P1_HW    # 143 conv2 output rows (row stride 13; cols 11,12 are garbage)
FEAT = L2 * 64        # 9152 flattened features fed to fc1 (garbage rows zero-weighted)


def _build_patch_index():
    """(704, 9) gather table: conv1 im2col with a pool-friendly row ordering.

    Row r = blk*176 + (ho*13 + wo), blk = hbit*2 + wbit, holds the 9 input taps of the
    conv1 output pixel (2*ho + hbit, 2*wo + wbit).  The 2x2 maxpool then becomes an
    elementwise max of the four 176-row blocks (all block offsets are 8-aligned).
    Rows with q >= 169 are padding and point at pixel (0, 0): finite garbage that is
    zero-weighted downstream.
    """
    idx = np.zeros((4 * POOL_BLK, 9), np.int32)
    for blk in range(4):
        hbit, wbit = blk // 2, blk % 2
        for q in range(P1_HW * P1_HW):
            ho, wo = q // P1_HW, q % P1_HW
            i0, j0 = 2 * ho + hbit, 2 * wo + wbit
            for dy in range(3):
                for dx in range(3):
                    idx[blk * POOL_BLK + q, dy * 3 + dx] = (i0 + dy) * IN_HW + (j0 + dx)
    return idx


_PATCH_IDX = _build_patch_index()


def _conv_stack_kernel(p1_ref, w1_ref, b1_ref, w2_ref, b2_ref, o_ref):
    """Per-image conv1 -> ReLU -> maxpool2x2 -> conv2 -> ReLU, fully VMEM-resident.

    p1_ref: (1, 704, 9)  bf16  im2col patches (pool-friendly row order)
    w1_ref: (9, 32)      bf16
    b1_ref: (1, 32)      f32
    w2_ref: (9, 32, 64)  bf16  tap k = dy*3 + dx
    b2_ref: (1, 64)      f32
    o_ref : (1, 143, 64) f32   conv2 output, row p = h*13 + w (w in [11,13) garbage)
    """
    # conv1: single MXU matmul with K = 9 packed taps.
    a1 = jnp.dot(p1_ref[0], w1_ref[...], preferred_element_type=jnp.float32)
    a1 = jnp.maximum(a1 + b1_ref[...], 0.0)                       # (704, 32) f32

    # 2x2/2 maxpool: elementwise max of the four aligned 176-row blocks.
    pool = jnp.maximum(jnp.maximum(a1[0:176], a1[176:352]),
                       jnp.maximum(a1[352:528], a1[528:704]))     # (176, 32) f32

    # conv2: 9 shifted K=32 MXU matmuls on the flattened (row stride 13) layout.
    acc = jnp.zeros((L2, 64), jnp.float32)
    for dy in range(3):
        for dx in range(3):
            s = dy * P1_HW + dx
            lhs = pool[s:s + L2, :].astype(jnp.bfloat16)          # (143, 32) bf16
            acc = acc + jnp.dot(lhs, w2_ref[dy * 3 + dx],
                                preferred_element_type=jnp.float32)
    acc = jnp.maximum(acc + b2_ref[...], 0.0)                     # (143, 64) f32
    o_ref[0] = acc.astype(o_ref.dtype)


def _head_kernel(f_ref, w1_ref, b1_ref, w2_ref, b2_ref, o_ref):
    """fc1 + ReLU + fc2 + log_softmax for the whole batch in one kernel.

    f_ref : (N, 9152)   f32   flattened conv2 features
    w1_ref: (9152, 128) bf16  fc1 weight, re-packed + zero rows for garbage columns
    b1_ref: (1, 128)    f32
    w2_ref: (128, 10)   bf16
    b2_ref: (1, 10)     f32
    o_ref : (N, 10)     f32
    """
    x = f_ref[...].astype(jnp.bfloat16)
    h = jnp.dot(x, w1_ref[...], preferred_element_type=jnp.float32) + b1_ref[...]
    h = jnp.maximum(h, 0.0)                                        # fc1 + ReLU (dropout = id)
    logits = jnp.dot(h.astype(jnp.bfloat16), w2_ref[...],
                     preferred_element_type=jnp.float32) + b2_ref[...]
    m = jnp.max(logits, axis=-1, keepdims=True)
    s = logits - m
    lse = jnp.log(jnp.sum(jnp.exp(s), axis=-1, keepdims=True))
    o_ref[...] = (s - lse).astype(o_ref.dtype)                     # log_softmax


def init_params(key):
    """Deterministic synthetic params in PyTorch convention (OIHW conv, (out,in) fc)."""
    def uni(k, shape, fan_in):
        b = 1.0 / float(np.sqrt(fan_in))
        return jax.random.uniform(k, shape, jnp.float32, minval=-b, maxval=b)
    ks = jax.random.split(key, 8)
    return {
        "conv1_w": uni(ks[0], (32, 1, 3, 3), 1 * 9),
        "conv1_b": uni(ks[1], (32,), 1 * 9),
        "conv2_w": uni(ks[2], (64, 32, 3, 3), 32 * 9),
        "conv2_b": uni(ks[3], (64,), 32 * 9),
        "fc1_w": uni(ks[4], (128, 64 * 11 * 11), 64 * 11 * 11),
        "fc1_b": uni(ks[5], (128,), 64 * 11 * 11),
        "fc2_w": uni(ks[6], (10, 128), 128),
        "fc2_b": uni(ks[7], (10,), 128),
    }


def prepare_params(p):
    """One-time repack of PyTorch-convention params into kernel layouts (bf16 weights)."""
    w1 = jnp.transpose(p["conv1_w"], (2, 3, 1, 0)).reshape(9, 32)          # (k, cout)
    w2 = jnp.transpose(p["conv2_w"], (2, 3, 1, 0)).reshape(9, 32, 64)      # (k, cin, cout)
    # fc1: torch flatten index c*121 + h*11 + w  ->  kernel index (h*13 + w)*64 + c,
    # with zero rows for the two garbage columns w in {11, 12}.
    wf1 = p["fc1_w"].reshape(128, 64, C2_HW, C2_HW)
    wf1 = jnp.transpose(wf1, (2, 3, 1, 0))                                 # (11, 11, 64, 128)
    wf1 = jnp.pad(wf1, ((0, 0), (0, P1_HW - C2_HW), (0, 0), (0, 0)))       # (11, 13, 64, 128)
    wf1 = wf1.reshape(FEAT, 128)
    return {
        "w1": w1.astype(jnp.bfloat16), "b1": p["conv1_b"].reshape(1, 32),
        "w2": w2.astype(jnp.bfloat16), "b2": p["conv2_b"].reshape(1, 64),
        "wf1": wf1.astype(jnp.bfloat16), "bf1": p["fc1_b"].reshape(1, 128),
        "wf2": jnp.transpose(p["fc2_w"]).astype(jnp.bfloat16),
        "bf2": p["fc2_b"].reshape(1, 10),
    }


@jax.jit
def net_forward(x_nchw, kp):
    N = x_nchw.shape[0]
    x_flat = x_nchw.reshape(N, IN_HW * IN_HW).astype(jnp.float32)
    # conv1 im2col (K-packing) done once at the input boundary; bf16 halves the DMA.
    patches = x_flat[:, jnp.asarray(_PATCH_IDX)].astype(jnp.bfloat16)      # (N, 704, 9)

    feats = pl.pallas_call(
        _conv_stack_kernel,
        out_shape=jax.ShapeDtypeStruct((N, L2, 64), jnp.float32),
        grid=(N,),
        in_specs=[
            pl.BlockSpec((1, 4 * POOL_BLK, 9), lambda n: (n, 0, 0)),
            pl.BlockSpec((9, 32), lambda n: (0, 0)),
            pl.BlockSpec((1, 32), lambda n: (0, 0)),
            pl.BlockSpec((9, 32, 64), lambda n: (0, 0, 0)),
            pl.BlockSpec((1, 64), lambda n: (0, 0)),
        ],
        out_specs=pl.BlockSpec((1, L2, 64), lambda n: (n, 0, 0)),
        compiler_params=pltpu.CompilerParams(dimension_semantics=("parallel",)),
    )(patches, kp["w1"], kp["b1"], kp["w2"], kp["b2"])

    feats_flat = feats.reshape(N, FEAT)      # free row-major metadata reshape
    return pl.pallas_call(
        _head_kernel,
        out_shape=jax.ShapeDtypeStruct((N, 10), jnp.float32),
    )(feats_flat, kp["wf1"], kp["bf1"], kp["wf2"], kp["bf2"])


if __name__ == "__main__":
    key = jax.random.PRNGKey(0)
    kx, kw = jax.random.split(key)
    params = init_params(kw)
    kparams = prepare_params(params)
    # Input shape implied by fc1 (64*11*11): batch=2, 1 channel, 28x28 (NCHW).
    x = jax.random.normal(kx, (2, 1, IN_HW, IN_HW), jnp.float32)
    out = net_forward(x, kparams)
    jax.block_until_ready(out)
    assert out.shape == (2, 10), out.shape
    assert bool(jnp.all(jnp.isfinite(out))), "non-finite output"
    # log_softmax rows must normalise to 1 in probability space
    assert bool(jnp.allclose(jnp.sum(jnp.exp(out), axis=-1), 1.0, atol=1e-2))
    print("KERNEL_OK")
</pallas_src>

<mosaic_0001>
module attributes {stable_mosaic.version = 11 : i64} {
  func.func @_conv_stack_kernel(%arg0: i32, %arg1: memref<1x704x9xbf16, #tpu.memory_space<vmem>>, %arg2: memref<9x32xbf16, #tpu.memory_space<vmem>>, %arg3: memref<1x32xf32, #tpu.memory_space<vmem>>, %arg4: memref<9x32x64xbf16, #tpu.memory_space<vmem>>, %arg5: memref<1x64xf32, #tpu.memory_space<vmem>>, %arg6: memref<1x143x64xf32, #tpu.memory_space<vmem>>) attributes {dimension_semantics = [#tpu.dimension_semantics<parallel>], iteration_bounds = array<i64: 2>, scalar_prefetch = 0 : i64, scratch_operands = 0 : i64, tpu.core_type = #tpu.core_type<tc>, window_params = [{transform_indices = @transform_0, window_bounds = array<i64: 1, 704, 9>}, {pipeline_mode = #tpu.pipeline_mode<synchronous>, transform_indices = @transform_1, window_bounds = array<i64: 9, 32>}, {pipeline_mode = #tpu.pipeline_mode<synchronous>, transform_indices = @transform_2, window_bounds = array<i64: 1, 32>}, {pipeline_mode = #tpu.pipeline_mode<synchronous>, transform_indices = @transform_3, window_bounds = array<i64: 9, 32, 64>}, {pipeline_mode = #tpu.pipeline_mode<synchronous>, transform_indices = @transform_4, window_bounds = array<i64: 1, 64>}, {transform_indices = @transform_5, window_bounds = array<i64: 1, 143, 64>}]} {
    %c0 = arith.constant 0 : index
    %c0_0 = arith.constant 0 : index
    %c0_1 = arith.constant 0 : index
    %0 = vector.load %arg1[%c0, %c0_0, %c0_1] : memref<1x704x9xbf16, #tpu.memory_space<vmem>>, vector<1x704x9xbf16>
    %1 = vector.shape_cast %0 : vector<1x704x9xbf16> to vector<704x9xbf16>
    %c0_2 = arith.constant 0 : index
    %c0_3 = arith.constant 0 : index
    %2 = vector.load %arg2[%c0_2, %c0_3] : memref<9x32xbf16, #tpu.memory_space<vmem>>, vector<9x32xbf16>
    %cst = arith.constant dense<0.000000e+00> : vector<704x32xf32>
    %3 = tpu.matmul %1, %2, %cst {dimension_numbers = #tpu.dot_dimension_numbers<[1], [0], [0], [1], [0, 0, 1, 1], [], []>} : vector<704x9xbf16>, vector<9x32xbf16>, vector<704x32xf32> -> vector<704x32xf32>
    %c0_4 = arith.constant 0 : index
    %c0_5 = arith.constant 0 : index
    %4 = vector.load %arg3[%c0_4, %c0_5] : memref<1x32xf32, #tpu.memory_space<vmem>>, vector<1x32xf32>
    %5 = vector.broadcast %4 : vector<1x32xf32> to vector<704x32xf32>
    %6 = arith.addf %3, %5 : vector<704x32xf32>
    %cst_6 = arith.constant 0.000000e+00 : f32
    %7 = vector.broadcast %cst_6 : f32 to vector<704x32xf32>
    %8 = arith.maximumf %6, %7 : vector<704x32xf32>
    %9 = vector.extract_strided_slice %8 {offsets = [0, 0], sizes = [176, 32], strides = [1, 1]} : vector<704x32xf32> to vector<176x32xf32>
    %10 = vector.extract_strided_slice %8 {offsets = [176, 0], sizes = [176, 32], strides = [1, 1]} : vector<704x32xf32> to vector<176x32xf32>
    %11 = arith.maximumf %9, %10 : vector<176x32xf32>
    %12 = vector.extract_strided_slice %8 {offsets = [352, 0], sizes = [176, 32], strides = [1, 1]} : vector<704x32xf32> to vector<176x32xf32>
    %13 = vector.extract_strided_slice %8 {offsets = [528, 0], sizes = [176, 32], strides = [1, 1]} : vector<704x32xf32> to vector<176x32xf32>
    %14 = arith.maximumf %12, %13 : vector<176x32xf32>
    %15 = arith.maximumf %11, %14 : vector<176x32xf32>
    %cst_7 = arith.constant 0.000000e+00 : f32
    %16 = vector.broadcast %cst_7 : f32 to vector<143x64xf32>
    %17 = vector.extract_strided_slice %15 {offsets = [0, 0], sizes = [143, 32], strides = [1, 1]} : vector<176x32xf32> to vector<143x32xf32>
    %18 = arith.truncf %17 : vector<143x32xf32> to vector<143x32xbf16>
    %c0_8 = arith.constant 0 : index
    %c0_9 = arith.constant 0 : index
    %c0_10 = arith.constant 0 : index
    %19 = vector.load %arg4[%c0_8, %c0_9, %c0_10] : memref<9x32x64xbf16, #tpu.memory_space<vmem>>, vector<1x32x64xbf16>
    %20 = vector.shape_cast %19 : vector<1x32x64xbf16> to vector<32x64xbf16>
    %cst_11 = arith.constant dense<0.000000e+00> : vector<143x64xf32>
    %21 = tpu.matmul %18, %20, %cst_11 {dimension_numbers = #tpu.dot_dimension_numbers<[1], [0], [0], [1], [0, 0, 1, 1], [], []>} : vector<143x32xbf16>, vector<32x64xbf16>, vector<143x64xf32> -> vector<143x64xf32>
    %22 = arith.addf %16, %21 : vector<143x64xf32>
    %23 = vector.extract_strided_slice %15 {offsets = [1, 0], sizes = [143, 32], strides = [1, 1]} : vector<176x32xf32> to vector<143x32xf32>
    %24 = arith.truncf %23 : vector<143x32xf32> to vector<143x32xbf16>
    %c1 = arith.constant 1 : index
    %c0_12 = arith.constant 0 : index
    %c0_13 = arith.constant 0 : index
    %25 = vector.load %arg4[%c1, %c0_12, %c0_13] : memref<9x32x64xbf16, #tpu.memory_space<vmem>>, vector<1x32x64xbf16>
    %26 = vector.shape_cast %25 : vector<1x32x64xbf16> to vector<32x64xbf16>
    %cst_14 = arith.constant dense<0.000000e+00> : vector<143x64xf32>
    %27 = tpu.matmul %24, %26, %cst_14 {dimension_numbers = #tpu.dot_dimension_numbers<[1], [0], [0], [1], [0, 0, 1, 1], [], []>} : vector<143x32xbf16>, vector<32x64xbf16>, vector<143x64xf32> -> vector<143x64xf32>
    %28 = arith.addf %22, %27 : vector<143x64xf32>
    %29 = vector.extract_strided_slice %15 {offsets = [2, 0], sizes = [143, 32], strides = [1, 1]} : vector<176x32xf32> to vector<143x32xf32>
    %30 = arith.truncf %29 : vector<143x32xf32> to vector<143x32xbf16>
    %c2 = arith.constant 2 : index
    %c0_15 = arith.constant 0 : index
    %c0_16 = arith.constant 0 : index
    %31 = vector.load %arg4[%c2, %c0_15, %c0_16] : memref<9x32x64xbf16, #tpu.memory_space<vmem>>, vector<1x32x64xbf16>
    %32 = vector.shape_cast %31 : vector<1x32x64xbf16> to vector<32x64xbf16>
    %cst_17 = arith.constant dense<0.000000e+00> : vector<143x64xf32>
    %33 = tpu.matmul %30, %32, %cst_17 {dimension_numbers = #tpu.dot_dimension_numbers<[1], [0], [0], [1], [0, 0, 1, 1], [], []>} : vector<143x32xbf16>, vector<32x64xbf16>, vector<143x64xf32> -> vector<143x64xf32>
    %34 = arith.addf %28, %33 : vector<143x64xf32>
    %35 = vector.extract_strided_slice %15 {offsets = [13, 0], sizes = [143, 32], strides = [1, 1]} : vector<176x32xf32> to vector<143x32xf32>
    %36 = arith.truncf %35 : vector<143x32xf32> to vector<143x32xbf16>
    %c3 = arith.constant 3 : index
    %c0_18 = arith.constant 0 : index
    %c0_19 = arith.constant 0 : index
    %37 = vector.load %arg4[%c3, %c0_18, %c0_19] : memref<9x32x64xbf16, #tpu.memory_space<vmem>>, vector<1x32x64xbf16>
    %38 = vector.shape_cast %37 : vector<1x32x64xbf16> to vector<32x64xbf16>
    %cst_20 = arith.constant dense<0.000000e+00> : vector<143x64xf32>
    %39 = tpu.matmul %36, %38, %cst_20 {dimension_numbers = #tpu.dot_dimension_numbers<[1], [0], [0], [1], [0, 0, 1, 1], [], []>} : vector<143x32xbf16>, vector<32x64xbf16>, vector<143x64xf32> -> vector<143x64xf32>
    %40 = arith.addf %34, %39 : vector<143x64xf32>
    %41 = vector.extract_strided_slice %15 {offsets = [14, 0], sizes = [143, 32], strides = [1, 1]} : vector<176x32xf32> to vector<143x32xf32>
    %42 = arith.truncf %41 : vector<143x32xf32> to vector<143x32xbf16>
    %c4 = arith.constant 4 : index
    %c0_21 = arith.constant 0 : index
    %c0_22 = arith.constant 0 : index
    %43 = vector.load %arg4[%c4, %c0_21, %c0_22] : memref<9x32x64xbf16, #tpu.memory_space<vmem>>, vector<1x32x64xbf16>
    %44 = vector.shape_cast %43 : vector<1x32x64xbf16> to vector<32x64xbf16>
    %cst_23 = arith.constant dense<0.000000e+00> : vector<143x64xf32>
    %45 = tpu.matmul %42, %44, %cst_23 {dimension_numbers = #tpu.dot_dimension_numbers<[1], [0], [0], [1], [0, 0, 1, 1], [], []>} : vector<143x32xbf16>, vector<32x64xbf16>, vector<143x64xf32> -> vector<143x64xf32>
    %46 = arith.addf %40, %45 : vector<143x64xf32>
    %47 = vector.extract_strided_slice %15 {offsets = [15, 0], sizes = [143, 32], strides = [1, 1]} : vector<176x32xf32> to vector<143x32xf32>
    %48 = arith.truncf %47 : vector<143x32xf32> to vector<143x32xbf16>
    %c5 = arith.constant 5 : index
    %c0_24 = arith.constant 0 : index
    %c0_25 = arith.constant 0 : index
    %49 = vector.load %arg4[%c5, %c0_24, %c0_25] : memref<9x32x64xbf16, #tpu.memory_space<vmem>>, vector<1x32x64xbf16>
    %50 = vector.shape_cast %49 : vector<1x32x64xbf16> to vector<32x64xbf16>
    %cst_26 = arith.constant dense<0.000000e+00> : vector<143x64xf32>
    %51 = tpu.matmul %48, %50, %cst_26 {dimension_numbers = #tpu.dot_dimension_numbers<[1], [0], [0], [1], [0, 0, 1, 1], [], []>} : vector<143x32xbf16>, vector<32x64xbf16>, vector<143x64xf32> -> vector<143x64xf32>
    %52 = arith.addf %46, %51 : vector<143x64xf32>
    %53 = vector.extract_strided_slice %15 {offsets = [26, 0], sizes = [143, 32], strides = [1, 1]} : vector<176x32xf32> to vector<143x32xf32>
    %54 = arith.truncf %53 : vector<143x32xf32> to vector<143x32xbf16>
    %c6 = arith.constant 6 : index
    %c0_27 = arith.constant 0 : index
    %c0_28 = arith.constant 0 : index
    %55 = vector.load %arg4[%c6, %c0_27, %c0_28] : memref<9x32x64xbf16, #tpu.memory_space<vmem>>, vector<1x32x64xbf16>
    %56 = vector.shape_cast %55 : vector<1x32x64xbf16> to vector<32x64xbf16>
    %cst_29 = arith.constant dense<0.000000e+00> : vector<143x64xf32>
    %57 = tpu.matmul %54, %56, %cst_29 {dimension_numbers = #tpu.dot_dimension_numbers<[1], [0], [0], [1], [0, 0, 1, 1], [], []>} : vector<143x32xbf16>, vector<32x64xbf16>, vector<143x64xf32> -> vector<143x64xf32>
    %58 = arith.addf %52, %57 : vector<143x64xf32>
    %59 = vector.extract_strided_slice %15 {offsets = [27, 0], sizes = [143, 32], strides = [1, 1]} : vector<176x32xf32> to vector<143x32xf32>
    %60 = arith.truncf %59 : vector<143x32xf32> to vector<143x32xbf16>
    %c7 = arith.constant 7 : index
    %c0_30 = arith.constant 0 : index
    %c0_31 = arith.constant 0 : index
    %61 = vector.load %arg4[%c7, %c0_30, %c0_31] : memref<9x32x64xbf16, #tpu.memory_space<vmem>>, vector<1x32x64xbf16>
    %62 = vector.shape_cast %61 : vector<1x32x64xbf16> to vector<32x64xbf16>
    %cst_32 = arith.constant dense<0.000000e+00> : vector<143x64xf32>
    %63 = tpu.matmul %60, %62, %cst_32 {dimension_numbers = #tpu.dot_dimension_numbers<[1], [0], [0], [1], [0, 0, 1, 1], [], []>} : vector<143x32xbf16>, vector<32x64xbf16>, vector<143x64xf32> -> vector<143x64xf32>
    %64 = arith.addf %58, %63 : vector<143x64xf32>
    %65 = vector.extract_strided_slice %15 {offsets = [28, 0], sizes = [143, 32], strides = [1, 1]} : vector<176x32xf32> to vector<143x32xf32>
    %66 = arith.truncf %65 : vector<143x32xf32> to vector<143x32xbf16>
    %c8 = arith.constant 8 : index
    %c0_33 = arith.constant 0 : index
    %c0_34 = arith.constant 0 : index
    %67 = vector.load %arg4[%c8, %c0_33, %c0_34] : memref<9x32x64xbf16, #tpu.memory_space<vmem>>, vector<1x32x64xbf16>
    %68 = vector.shape_cast %67 : vector<1x32x64xbf16> to vector<32x64xbf16>
    %cst_35 = arith.constant dense<0.000000e+00> : vector<143x64xf32>
    %69 = tpu.matmul %66, %68, %cst_35 {dimension_numbers = #tpu.dot_dimension_numbers<[1], [0], [0], [1], [0, 0, 1, 1], [], []>} : vector<143x32xbf16>, vector<32x64xbf16>, vector<143x64xf32> -> vector<143x64xf32>
    %70 = arith.addf %64, %69 : vector<143x64xf32>
    %c0_36 = arith.constant 0 : index
    %c0_37 = arith.constant 0 : index
    %71 = vector.load %arg5[%c0_36, %c0_37] : memref<1x64xf32, #tpu.memory_space<vmem>>, vector<1x64xf32>
    %72 = vector.broadcast %71 : vector<1x64xf32> to vector<143x64xf32>
    %73 = arith.addf %70, %72 : vector<143x64xf32>
    %cst_38 = arith.constant 0.000000e+00 : f32
    %74 = vector.broadcast %cst_38 : f32 to vector<143x64xf32>
    %75 = arith.maximumf %73, %74 : vector<143x64xf32>
    %c0_39 = arith.constant 0 : index
    %c0_40 = arith.constant 0 : index
    %c0_41 = arith.constant 0 : index
    %76 = vector.load %arg6[%c0_39, %c0_40, %c0_41] : memref<1x143x64xf32, #tpu.memory_space<vmem>>, vector<1x143x64xf32>
    %77 = vector.shape_cast %76 : vector<1x143x64xf32> to vector<143x64xf32>
    %78 = vector.shape_cast %75 : vector<143x64xf32> to vector<1x143x64xf32>
    tpu.vector_store %arg6[%c0_39, %c0_40, %c0_41], %78 {strides = array<i32>} : memref<1x143x64xf32, #tpu.memory_space<vmem>>, vector<1x143x64xf32>,
    return
  }
  func.func @transform_0(%arg0: i32) -> (i32, i32, i32) {
    %c0_i32 = arith.constant 0 : i32
    %c0_i32_0 = arith.constant 0 : i32
    %c0_i32_1 = arith.constant 0 : i32
    return %arg0, %c0_i32, %c0_i32_0 : i32, i32, i32
  }
  func.func @transform_1(%arg0: i32) -> (i32, i32) {
    %c0_i32 = arith.constant 0 : i32
    %c0_i32_0 = arith.constant 0 : i32
    %c0_i32_1 = arith.constant 0 : i32
    return %c0_i32, %c0_i32_0 : i32, i32
  }
  func.func @transform_2(%arg0: i32) -> (i32, i32) {
    %c0_i32 = arith.constant 0 : i32
    %c0_i32_0 = arith.constant 0 : i32
    %c0_i32_1 = arith.constant 0 : i32
    return %c0_i32, %c0_i32_0 : i32, i32
  }
  func.func @transform_3(%arg0: i32) -> (i32, i32, i32) {
    %c0_i32 = arith.constant 0 : i32
    %c0_i32_0 = arith.constant 0 : i32
    %c0_i32_1 = arith.constant 0 : i32
    %c0_i32_2 = arith.constant 0 : i32
    return %c0_i32, %c0_i32_0, %c0_i32_1 : i32, i32, i32
  }
  func.func @transform_4(%arg0: i32) -> (i32, i32) {
    %c0_i32 = arith.constant 0 : i32
    %c0_i32_0 = arith.constant 0 : i32
    %c0_i32_1 = arith.constant 0 : i32
    return %c0_i32, %c0_i32_0 : i32, i32
  }
  func.func @transform_5(%arg0: i32) -> (i32, i32, i32) {
    %c0_i32 = arith.constant 0 : i32
    %c0_i32_0 = arith.constant 0 : i32
    %c0_i32_1 = arith.constant 0 : i32
    return %arg0, %c0_i32, %c0_i32_0 : i32, i32, i32
  }
}

module attributes {stable_mosaic.version = 11 : i64} {
  func.func @_head_kernel(%arg0: memref<2x9152xf32, #tpu.memory_space<vmem>>, %arg1: memref<9152x128xbf16, #tpu.memory_space<vmem>>, %arg2: memref<1x128xf32, #tpu.memory_space<vmem>>, %arg3: memref<128x10xbf16, #tpu.memory_space<vmem>>, %arg4: memref<1x10xf32, #tpu.memory_space<vmem>>, %arg5: memref<2x10xf32, #tpu.memory_space<vmem>>) attributes {dimension_semantics = [], scalar_prefetch = 0 : i64, scratch_operands = 0 : i64, tpu.core_type = #tpu.core_type<tc>} {
    %c0 = arith.constant 0 : index
    %c0_0 = arith.constant 0 : index
    %0 = vector.load %arg0[%c0, %c0_0] : memref<2x9152xf32, #tpu.memory_space<vmem>>, vector<2x9152xf32>
    %1 = arith.truncf %0 : vector<2x9152xf32> to vector<2x9152xbf16>
    %c0_1 = arith.constant 0 : index
    %c0_2 = arith.constant 0 : index
    %2 = vector.load %arg1[%c0_1, %c0_2] : memref<9152x128xbf16, #tpu.memory_space<vmem>>, vector<9152x128xbf16>
    %cst = arith.constant dense<0.000000e+00> : vector<2x128xf32>
    %3 = tpu.matmul %1, %2, %cst {dimension_numbers = #tpu.dot_dimension_numbers<[1], [0], [0], [1], [0, 0, 1, 1], [], []>} : vector<2x9152xbf16>, vector<9152x128xbf16>, vector<2x128xf32> -> vector<2x128xf32>
    %c0_3 = arith.constant 0 : index
    %c0_4 = arith.constant 0 : index
    %4 = vector.load %arg2[%c0_3, %c0_4] : memref<1x128xf32, #tpu.memory_space<vmem>>, vector<1x128xf32>
    %5 = vector.broadcast %4 : vector<1x128xf32> to vector<2x128xf32>
    %6 = arith.addf %3, %5 : vector<2x128xf32>
    %cst_5 = arith.constant 0.000000e+00 : f32
    %7 = vector.broadcast %cst_5 : f32 to vector<2x128xf32>
    %8 = arith.maximumf %6, %7 : vector<2x128xf32>
    %9 = arith.truncf %8 : vector<2x128xf32> to vector<2x128xbf16>
    %c0_6 = arith.constant 0 : index
    %c0_7 = arith.constant 0 : index
    %10 = vector.load %arg3[%c0_6, %c0_7] : memref<128x10xbf16, #tpu.memory_space<vmem>>, vector<128x10xbf16>
    %cst_8 = arith.constant dense<0.000000e+00> : vector<2x10xf32>
    %11 = tpu.matmul %9, %10, %cst_8 {dimension_numbers = #tpu.dot_dimension_numbers<[1], [0], [0], [1], [0, 0, 1, 1], [], []>} : vector<2x128xbf16>, vector<128x10xbf16>, vector<2x10xf32> -> vector<2x10xf32>
    %c0_9 = arith.constant 0 : index
    %c0_10 = arith.constant 0 : index
    %12 = vector.load %arg4[%c0_9, %c0_10] : memref<1x10xf32, #tpu.memory_space<vmem>>, vector<1x10xf32>
    %13 = vector.broadcast %12 : vector<1x10xf32> to vector<2x10xf32>
    %14 = arith.addf %11, %13 : vector<2x10xf32>
    %cst_11 = arith.constant dense<0xFF800000> : vector<2xf32>
    %15 = vector.multi_reduction <maximumf>, %14, %cst_11 [1] : vector<2x10xf32> to vector<2xf32>
    %16 = vector.shape_cast %15 : vector<2xf32> to vector<2x1xf32>
    %17 = vector.broadcast %16 : vector<2x1xf32> to vector<2x10xf32>
    %18 = arith.subf %14, %17 : vector<2x10xf32>
    %19 = math.exp %18 : vector<2x10xf32>
    %cst_12 = arith.constant dense<0.000000e+00> : vector<2xf32>
    %20 = vector.multi_reduction <add>, %19, %cst_12 [1] : vector<2x10xf32> to vector<2xf32>
    %21 = vector.shape_cast %20 : vector<2xf32> to vector<2x1xf32>
    %22 = math.log %21 : vector<2x1xf32>
    %23 = vector.broadcast %22 : vector<2x1xf32> to vector<2x10xf32>
    %24 = arith.subf %18, %23 : vector<2x10xf32>
    %c0_13 = arith.constant 0 : index
    %c0_14 = arith.constant 0 : index
    %25 = vector.load %arg5[%c0_13, %c0_14] : memref<2x10xf32, #tpu.memory_space<vmem>>, vector<2x10xf32>
    tpu.vector_store %arg5[%c0_13, %c0_14], %24 {strides = array<i32>} : memref<2x10xf32, #tpu.memory_space<vmem>>, vector<2x10xf32>,
    return
  }
}

</mosaic_0001>

<bundles_post_ra>
// kernel: net_forward.2
= control target key start
LH: loop header
LB: loop body
LE: loop exit
PB: predicated region body
PF: predicated region fallthrough
CT: control target
= control target key end

     0   :  { %s3094_s18 = smov 0   ;;  %s4135_s0 = inlined_call_operand.vmem [shape: bf16[2,704,9], index: 0, kind: input, shape index: {}]   ;;  %s4136_s1 = inlined_call_operand.vmem [shape: bf16[9,32], index: 1, kind: input, shape index: {}]   ;;  %s4137_s2 = inlined_call_operand.vmem [shape: f32[1,32], index: 2, kind: input, shape index: {}]   ;;  %s4138_s3 = inlined_call_operand.vmem [shape: bf16[9,32,64], index: 3, kind: input, shape index: {}]   ;;  %s4139_s4 = inlined_call_operand.vmem [shape: f32[1,64], index: 4, kind: input, shape index: {}]   ;;  %s4140_s5 = inlined_call_operand.vmem [shape: f32[2,143,64], index: 5, kind: output, shape index: {}]  }
   0x1 LB: > { %s2557_s19 = sadd.s32 4294967295, %s3061_s18   ;;  %p2561_p0 = scmp.ge.s32.totalorder %s3061_s18, 1  ;;  %s3061_s18 = sphi %s3094_s18, %s15_s18  }
   0x2   : > { %p187_p1 = scmp.lt.s32.totalorder %s3061_s18, 3 }
   0x4   : > { %p188_p2 = pnand %p2561_p0, %p187_p1 }
   0x6   : > { %191 = sbr.rel (%p188_p2) target bundleno = 1098 (0x44a), region = 40 }
   0xb   : > { %v2742_v0 = vld [vmem:[%s4136_s1] sm:$0xf]  ;;  %v3019_v1 = vld [vmem:[%s4136_s1] sm:$0x10]  ;;  %vm678_vm0 = vcmask 1043456   ;;  %vm679_vm1 = vcmask 1044480  }
   0xc   : > { %v2743_v2 = vor.u32 %v3019_v1, %v2742_v0  ;;  %p215_p3 = scmp.lt.s32.totalorder %s2557_s19, 1  ;;  %v3063_v3 = vmov 65535   ;;  %vm545_vm2 = vcmask 72704   ;;  %v3201_v51 = vld [vmem:[%s4137_s2] ss:$0 sm:$0xff]  ;;  %vm1170_vm3 = vcmask 261120  }
   0xd   : > { %v680_v4 = vsel %vm678_vm0, 4294967295, %v3063_v3  ;;  %vm1352_vm4 = vcmask 1046528   ;;  %vm1086_vm5 = vsmask.f32 7424  ;;  %vm1850_vm6 = vsmask.f32 4352 }
   0xe   : > { %v681_v5 = vsel %vm679_vm1, %v680_v4, 0  ;;  %s4181_s19 = smov (!%p215_p3, %s2557_s19), 1  ;;  %vm1498_vm7 = vsmask.f32 5376  ;;  %vm2145_vm8 = vsmask.f32 6400 }
   0xf   : > { %v683_v6 = vand.u32 %v2743_v2, %v681_v5  ;;  %s3041_s24 = smul.u32 352, %s4181_s19  ;;  %vm2311_vm9 = vcmask 1045504   ;;  %vm2482_vm10 = vcmask 523264   ;;  %vm2500_vm11 = vcmask 522240  }
  0x11   : > { %692 = vmatpush.bf16.msra.mxu0 %v683_v6  ;;  %3040 = vmatpush.bf16.msra.mxu3 %v683_v6  ;;  %s3115_s27 = scalar_lea.vmem %s4135_s0, %s3041_s24  ;;  %s3042_s24 = smul.u32 144, %s4181_s19 }
  0x12   : > { %3038 = vmatpush.bf16.msra.mxu1 %v683_v6  ;;  %3039 = vmatpush.bf16.msra.mxu2 %v683_v6  ;;  %v2975_v7 = vld [vmem:[%s3115_s27] sm:$0xff]  ;;  %v2976_v8 = vld [vmem:[%s3115_s27 + $0x8] sm:$0xff]  ;;  %v2977_v9 = vld [vmem:[%s3115_s27 + $0x10] sm:$0xff] }
  0x13   : > { %v2978_v10 = vld [vmem:[%s3115_s27 + $0x18] sm:$0xff]  ;;  %v2979_v11 = vld [vmem:[%s3115_s27 + $0x20] sm:$0xff]  ;;  %v2980_v12 = vld [vmem:[%s3115_s27 + $0x28] sm:$0xff] }
  0x14   : > { %2744 = vmatmul.msk.bf16.vlgmr.msra.gmra.mxu0 %vm545_vm2, %v2975_v7  ;;  %v2981_v13 = vld [vmem:[%s3115_s27 + $0x30] sm:$0xff]  ;;  %v2982_v14 = vld [vmem:[%s3115_s27 + $0x38] sm:$0xff]  ;;  %v2983_v15 = vld [vmem:[%s3115_s27 + $0x40] sm:$0xff] }
  0x15   : > { %v2984_v18 = vld [vmem:[%s3115_s27 + $0x48] sm:$0xff]  ;;  %v2985_v21 = vld [vmem:[%s3115_s27 + $0x50] sm:$0xff]  ;;  %v2986_v24 = vld [vmem:[%s3115_s27 + $0x58] sm:$0xff] }
  0x16   : > { %v2987_v27 = vld [vmem:[%s3115_s27 + $0x60] sm:$0xff]  ;;  %v2988_v30 = vld [vmem:[%s3115_s27 + $0x68] sm:$0xff]  ;;  %v2989_v33 = vld [vmem:[%s3115_s27 + $0x70] sm:$0xff] }
  0x17   : > { %v2990_v36 = vld [vmem:[%s3115_s27 + $0x78] sm:$0xff]  ;;  %v2991_v39 = vld [vmem:[%s3115_s27 + $0x80] sm:$0xff]  ;;  %v2992_v42 = vld [vmem:[%s3115_s27 + $0x88] sm:$0xff] }
  0x18   : > { %v3017_v44 = vld [vmem:[%s3115_s27 + $0x150] sm:$0xff]  ;;  %v3018_v48 = vld [vmem:[%s3115_s27 + $0x158] sm:$0xff]  ;;  %v3007_v50 = vld [vmem:[%s3115_s27 + $0x100] sm:$0xff] }
  0x19   : > { %2786 = vmatmul.msk.bf16.vlgmr.msra.gmra.mxu3 %vm545_vm2, %v3017_v44  ;;  %v2993_v46 = vld [vmem:[%s3115_s27 + $0x90] sm:$0xff]  ;;  %2776 = vmatmul.msk.bf16.vlgmr.msra.gmra.mxu1 %vm545_vm2, %v3007_v50  ;;  %v2994_v53 = vld [vmem:[%s3115_s27 + $0x98] sm:$0xff]  ;;  %v3008_v62 = vld [vmem:[%s3115_s27 + $0x108] sm:$0xff] }
  0x1a   : > { %v2995_v3 = vld [vmem:[%s3115_s27 + $0xa0] sm:$0xff] }
  0x24   : > { %2745 = vmatmul.msk.bf16.gmra.mxu0 %vm545_vm2, %v2976_v8 }
  0x29   : > { %2787 = vmatmul.msk.bf16.gmra.mxu3 %vm545_vm2, %v3018_v48  ;;  %2777 = vmatmul.msk.bf16.gmra.mxu1 %vm545_vm2, %v3008_v62  ;;  %v2998_v62 = vld [vmem:[%s3115_s27 + $0xb8] sm:$0xff] }
  0x34   : > { %2746 = vmatmul.msk.bf16.gmra.mxu0 %vm545_vm2, %v2977_v9 }
  0x44   : > { %2747 = vmatmul.msk.bf16.gmra.mxu0 %vm545_vm2, %v2978_v10 }
  0x54   : > { %2748 = vmatmul.msk.bf16.gmra.mxu0 %vm545_vm2, %v2979_v11 }
  0x64   : > { %2749 = vmatmul.msk.bf16.gmra.mxu0 %vm545_vm2, %v2980_v12  ;;  %v3009_v12 = vld [vmem:[%s3115_s27 + $0x110] sm:$0xff] }
  0x65   : > { %2778 = vmatmul.msk.bf16.gmra.mxu1 %vm545_vm2, %v3009_v12  ;;  %v2999_v12 = vld [vmem:[%s3115_s27 + $0xc0] sm:$0xff] }
  0x74   : > { %2750 = vmatmul.msk.bf16.gmra.mxu0 %vm545_vm2, %v2981_v13 }
  0x84   : > { %2751 = vmatmul.msk.bf16.gmra.mxu0 %vm545_vm2, %v2982_v14 }
  0x91   : > { %v694_v16 = vpop.f32.mrf.mxu0 }
  0x92   : > { %v695_v52 = vadd.f32 %v3201_v51, %v694_v16 }
  0x94   : > { %2752 = vmatmul.msk.bf16.gmra.mxu0 %vm545_vm2, %v2983_v15  ;;  %v914_v56 = vmax.f32 %v695_v52, 0.0 }
  0x99   : > { %v696_v17 = vpop.f32.mrf.mxu0 }
  0x9a   : > { %v697_v59 = vadd.f32 %v3201_v51, %v696_v17  ;;  %v2996_v17 = vld [vmem:[%s3115_s27 + $0xa8] sm:$0xff] }
  0x9c   : > { %v915_v63 = vmax.f32 %v697_v59, 0.0 }
  0xa1   : > { %v699_v19 = vpop.f32.mrf.mxu0 }
  0xa2   : > { %v700_v2 = vadd.f32 %v3201_v51, %v699_v19 }
  0xa4   : > { %2753 = vmatmul.msk.bf16.gmra.mxu0 %vm545_vm2, %v2984_v18  ;;  %v916_v6 = vmax.f32 %v700_v2, 0.0 }
  0xa9   : > { %v3137_v20 = vpop.f32.mrf.mxu0 }
  0xaa   : > { %v702_v9 = vadd.f32 %v3201_v51, %v3137_v20 }
  0xac   : > { %v917_v13 = vmax.f32 %v702_v9, 0.0 }
  0xb1   : > { %v3140_v22 = vpop.f32.mrf.mxu0 }
  0xb2   : > { %v705_v16 = vadd.f32 %v3201_v51, %v3140_v22 }
  0xb4   : > { %2754 = vmatmul.msk.bf16.gmra.mxu0 %vm545_vm2, %v2985_v21  ;;  %v918_v20 = vmax.f32 %v705_v16, 0.0 }
  0xb9   : > { %v3143_v23 = vpop.f32.mrf.mxu0 }
  0xc1   : > { %v3146_v25 = vpop.f32.mrf.mxu0 }
  0xc2   : > { %v710_v44 = vadd.f32 %v3201_v51, %v3146_v25 }
  0xc4   : > { %2755 = vmatmul.msk.bf16.gmra.mxu0 %vm545_vm2, %v2986_v24 }
  0xc9   : > { %v3149_v26 = vpop.f32.mrf.mxu0 }
  0xd1   : > { %v3152_v28 = vpop.f32.mrf.mxu0 }
  0xd4   : > { %2756 = vmatmul.msk.bf16.gmra.mxu0 %vm545_vm2, %v2987_v27  ;;  %v707_v27 = vadd.f32 %v3201_v51, %v3143_v23  ;;  %v920_v23 = vmax.f32 %v710_v44, 0.0 }
  0xd6   : > { %v919_v22 = vmax.f32 %v707_v27, 0.0 }
  0xd9   : > { %v3155_v29 = vpop.f32.mrf.mxu0 }
  0xe1   : > { %v3158_v31 = vpop.f32.mrf.mxu0 }
  0xe4   : > { %2757 = vmatmul.msk.bf16.gmra.mxu0 %vm545_vm2, %v2988_v30 }
  0xe9   : > { %v3161_v32 = vpop.f32.mrf.mxu0 }
  0xf1   : > { %v3164_v34 = vpop.f32.mrf.mxu0 }
  0xf4   : > { %2758 = vmatmul.msk.bf16.gmra.mxu0 %vm545_vm2, %v2989_v33 }
  0xf9   : > { %v3167_v35 = vpop.f32.mrf.mxu0 }
 0x101   : > { %v3170_v37 = vpop.f32.mrf.mxu0 }
 0x104   : > { %2759 = vmatmul.msk.bf16.gmra.mxu0 %vm545_vm2, %v2990_v36  ;;  %v3010_v36 = vld [vmem:[%s3115_s27 + $0x118] sm:$0xff] }
 0x105   : > { %2779 = vmatmul.msk.bf16.gmra.mxu1 %vm545_vm2, %v3010_v36  ;;  %v3000_v36 = vld [vmem:[%s3115_s27 + $0xc8] sm:$0xff] }
 0x109   : > { %v3173_v38 = vpop.f32.mrf.mxu0 }
 0x111   : > { %v3176_v40 = vpop.f32.mrf.mxu0 }
 0x114   : > { %2760 = vmatmul.msk.bf16.gmra.mxu0 %vm545_vm2, %v2991_v39 }
 0x119   : > { %v3179_v41 = vpop.f32.mrf.mxu0 }
 0x121   : > { %v3182_v43 = vpop.f32.mrf.mxu0 }
 0x124   : > { %2761 = vmatmul.msk.bf16.gmra.mxu0 %vm545_vm2, %v2992_v42 }
 0x129   : > { %v3187_v45 = vpop.f32.mrf.mxu0 }
 0x131   : > { %v3190_v47 = vpop.f32.mrf.mxu0 }
 0x134   : > { %2762 = vmatmul.msk.bf16.gmra.mxu0 %vm545_vm2, %v2993_v46  ;;  %v2997_v46 = vld [vmem:[%s3115_s27 + $0xb0] sm:$0xff] }
 0x139   : > { %v3195_v49 = vpop.f32.mrf.mxu0 }
 0x141   : > { %v749_v54 = vpop.f32.mrf.mxu0 }
 0x142   : > { %v750_v55 = vadd.f32 %v3201_v51, %v749_v54  ;;  %v712_v54 = vadd.f32 %v3201_v51, %v3149_v26 }
 0x144   : > { %v936_v57 = vmax.f32 %v750_v55, 0.0  ;;  %2763 = vmatmul.msk.bf16.gmra.mxu0 %vm545_vm2, %v2994_v53  ;;  %v921_v25 = vmax.f32 %v712_v54, 0.0 }
 0x146   : > { %v3208_v58 = vmax.f32 %v914_v56, %v936_v57  ;;  %v3011_v57 = vld [vmem:[%s3115_s27 + $0x120] sm:$0xff] }
 0x147   : > { %2780 = vmatmul.msk.bf16.gmra.mxu1 %vm545_vm2, %v3011_v57 }
 0x149   : > { %v751_v60 = vpop.f32.mrf.mxu0 }
 0x14a   : > { %v752_v61 = vadd.f32 %v3201_v51, %v751_v60 }
 0x14c   : > { %v937_v0 = vmax.f32 %v752_v61, 0.0  ;;  %v715_v61 = vadd.f32 %v3201_v51, %v3152_v28 }
 0x14e   : > { %v3214_v1 = vmax.f32 %v915_v63, %v937_v0  ;;  %v922_v2 = vmax.f32 %v715_v61, 0.0  ;;  %v3001_v61 = vld [vmem:[%s3115_s27 + $0xd0] sm:$0xff] }
 0x151   : > { %v754_v4 = vpop.f32.mrf.mxu0 }
 0x152   : > { %v755_v5 = vadd.f32 %v3201_v51, %v754_v4 }
 0x154   : > { %v938_v7 = vmax.f32 %v755_v5, 0.0  ;;  %2764 = vmatmul.msk.bf16.gmra.mxu0 %vm545_vm2, %v2995_v3  ;;  %v3012_v3 = vld [vmem:[%s3115_s27 + $0x128] sm:$0xff]  ;;  %v717_v5 = vadd.f32 %v3201_v51, %v3155_v29  ;;  %v3013_v29 = vld [vmem:[%s3115_s27 + $0x130] sm:$0xff] }
 0x155   : > { %2781 = vmatmul.msk.bf16.vlgmr.msra.gmra.mxu2 %vm545_vm2, %v3012_v3 }
 0x156   : > { %v3220_v8 = vmax.f32 %v916_v6, %v938_v7  ;;  %v923_v7 = vmax.f32 %v717_v5, 0.0 }
 0x159   : > { %v756_v10 = vpop.f32.mrf.mxu0 }
 0x15a   : > { %v757_v11 = vadd.f32 %v3201_v51, %v756_v10 }
 0x15c   : > { %v939_v14 = vmax.f32 %v757_v11, 0.0  ;;  %v720_v11 = vadd.f32 %v3201_v51, %v3158_v31 }
 0x15e   : > { %v3227_v15 = vmax.f32 %v917_v13, %v939_v14  ;;  %v924_v16 = vmax.f32 %v720_v11, 0.0 }
 0x161   : > { %v759_v18 = vpop.f32.mrf.mxu0 }
 0x162   : > { %v760_v19 = vadd.f32 %v3201_v51, %v759_v18 }
 0x164   : > { %v940_v21 = vmax.f32 %v760_v19, 0.0  ;;  %2765 = vmatmul.msk.bf16.gmra.mxu0 %vm545_vm2, %v2996_v17  ;;  %v722_v19 = vadd.f32 %v3201_v51, %v3161_v32  ;;  %v3014_v32 = vld [vmem:[%s3115_s27 + $0x138] sm:$0xff] }
 0x165   : > { %2782 = vmatmul.msk.bf16.gmra.mxu2 %vm545_vm2, %v3013_v29 }
 0x166   : > { %v3234_v24 = vmax.f32 %v918_v20, %v940_v21  ;;  %v925_v21 = vmax.f32 %v722_v19, 0.0 }
 0x169   : > { %v761_v30 = vpop.f32.mrf.mxu0 }
 0x16a   : > { %v762_v33 = vadd.f32 %v3201_v51, %v761_v30 }
 0x16c   : > { %v941_v39 = vmax.f32 %v762_v33, 0.0  ;;  %v725_v33 = vadd.f32 %v3201_v51, %v3164_v34  ;;  %v727_v34 = vadd.f32 %v3201_v51, %v3167_v35 }
 0x16e   : > { %v3241_v42 = vmax.f32 %v919_v22, %v941_v39  ;;  %v926_v44 = vmax.f32 %v725_v33, 0.0  ;;  %v3016_v33 = vld [vmem:[%s3115_s27 + $0x148] sm:$0xff] }
 0x171   : > { %v764_v48 = vpop.f32.mrf.mxu0 }
 0x172   : > { %v765_v50 = vadd.f32 %v3201_v51, %v764_v48 }
 0x174   : > { %v942_v52 = vmax.f32 %v765_v50, 0.0  ;;  %2766 = vmatmul.msk.bf16.gmra.mxu0 %vm545_vm2, %v2997_v46  ;;  %v3021_v50 = vld [vmem:[%s4138_s3 + $0x8] sm:$0xff] }
 0x175   : > { %2783 = vmatmul.msk.bf16.gmra.mxu2 %vm545_vm2, %v3014_v32 }
 0x176   : > { %v3248_v53 = vmax.f32 %v920_v23, %v942_v52  ;;  %1288 = vmatpush.bf16.msrb.mxu2 %v3021_v50  ;;  %v3299_v52 = vpop.f32.mrf.mxu3  ;;  %v740_v50 = vadd.f32 %v3201_v51, %v3182_v43  ;;  %v742_v43 = vadd.f32 %v3201_v51, %v3187_v45  ;;  %v745_v45 = vadd.f32 %v3201_v51, %v3190_v47 }
 0x179   : > { %v766_v55 = vpop.f32.mrf.mxu0 }
 0x17a   : > { %v767_v56 = vadd.f32 %v3201_v51, %v766_v55  ;;  %v927_v55 = vmax.f32 %v727_v34, 0.0  ;;  %v3003_v34 = vld [vmem:[%s3115_s27 + $0xe0] sm:$0xff] }
 0x17c   : > { %v943_v59 = vmax.f32 %v767_v56, 0.0 }
 0x17e   : > { %v3255_v60 = vmax.f32 %v921_v25, %v943_v59  ;;  %v3023_v25 = vld [vmem:[%s4138_s3 + $0x18] sm:$0xff]  ;;  %v730_v59 = vadd.f32 %v3201_v51, %v3170_v37  ;;  %v732_v37 = vadd.f32 %v3201_v51, %v3173_v38 }
 0x17f   : > { %1204 = vmatpush.bf16.msrb.mxu1 %v3023_v25 }
 0x181   : > { %v769_v63 = vpop.f32.mrf.mxu0 }
 0x182   : > { %v770_v0 = vadd.f32 %v3201_v51, %v769_v63  ;;  %v3311_v63 = vpop.f32.mrf.mxu3 }
 0x184   : > { %v944_v26 = vmax.f32 %v770_v0, 0.0  ;;  %2767 = vmatmul.msk.bf16.gmra.mxu0 %vm545_vm2, %v2998_v62  ;;  %v928_v0 = vmax.f32 %v730_v59, 0.0 }
 0x186   : > { %v3263_v4 = vmax.f32 %v922_v2, %v944_v26  ;;  %v3015_v26 = vld [vmem:[%s3115_s27 + $0x140] sm:$0xff] }
 0x187   : > { %2784 = vmatmul.msk.bf16.gmra.mxu2 %vm545_vm2, %v3015_v26 }
 0x189   : > { %v771_v6 = vpop.f32.mrf.mxu0 }
 0x18a   : > { %v772_v28 = vadd.f32 %v3201_v51, %v771_v6  ;;  %v909_v11 = vpop.f32.mrf.mxu3 }
 0x18c   : > { %v945_v9 = vmax.f32 %v772_v28, 0.0  ;;  %v929_v28 = vmax.f32 %v732_v37, 0.0 }
 0x18e   : > { %v3269_v10 = vmax.f32 %v923_v7, %v945_v9  ;;  %v854_v9 = vpop.f32.mrf.mxu1 }
 0x191   : > { %v774_v13 = vpop.f32.mrf.mxu0 }
 0x192   : > { %v775_v14 = vadd.f32 %v3201_v51, %v774_v13  ;;  %v855_v13 = vadd.f32 %v3201_v51, %v854_v9  ;;  %v934_v9 = vmax.f32 %v745_v45, 0.0 }
 0x194   : > { %v946_v17 = vmax.f32 %v775_v14, 0.0  ;;  %2768 = vmatmul.msk.bf16.gmra.mxu0 %vm545_vm2, %v2999_v12  ;;  %v910_v14 = vadd.f32 %v3201_v51, %v909_v11  ;;  %v978_v29 = vmax.f32 %v855_v13, 0.0 }
 0x196   : > { %v3277_v18 = vmax.f32 %v924_v16, %v946_v17  ;;  %v735_v16 = vadd.f32 %v3201_v51, %v3176_v40  ;;  %v3002_v17 = vld [vmem:[%s3115_s27 + $0xd8] sm:$0xff]  ;;  %v1000_v38 = vmax.f32 %v910_v14, 0.0  ;;  %v737_v40 = vadd.f32 %v3201_v51, %v3179_v41  ;;  %v3349_v25 = vpop.f32.mrf.mxu1 }
 0x197   : > { %2785 = vmatmul.msk.bf16.gmra.mxu2 %vm545_vm2, %v3016_v33  ;;  %v747_v14 = vadd.f32 %v3201_v51, %v3195_v49 }
 0x199   : > { %v776_v20 = vpop.f32.mrf.mxu0 }
 0x19a   : > { %v777_v31 = vadd.f32 %v3201_v51, %v776_v20 }
 0x19c   : > { %v947_v27 = vmax.f32 %v777_v31, 0.0  ;;  %v3329_v31 = vmax.f32 %v978_v29, %v1000_v38  ;;  %v935_v38 = vmax.f32 %v747_v14, 0.0 }
 0x19e   : > { %v3283_v30 = vmax.f32 %v925_v21, %v947_v27  ;;  %v930_v21 = vmax.f32 %v735_v16, 0.0 }
 0x1a1   : > { %v779_v22 = vpop.f32.mrf.mxu0 }
 0x1a2   : > { %v780_v39 = vadd.f32 %v3201_v51, %v779_v22 }
 0x1a4   : > { %v948_v46 = vmax.f32 %v780_v39, 0.0  ;;  %2769 = vmatmul.msk.bf16.gmra.mxu0 %vm545_vm2, %v3000_v36 }
 0x1a6   : > { %v3291_v48 = vmax.f32 %v926_v44, %v948_v46  ;;  %v931_v44 = vmax.f32 %v737_v40, 0.0 }
 0x1a9   : > { %v781_v23 = vpop.f32.mrf.mxu0 }
 0x1aa   : > { %v782_v54 = vadd.f32 %v3201_v51, %v781_v23 }
 0x1ac   : > { %v949_v56 = vmax.f32 %v782_v54, 0.0 }
 0x1ae   : > { %v3302_v57 = vmax.f32 %v927_v55, %v949_v56  ;;  %v3020_v55 = vld [vmem:[%s4138_s3] sm:$0xff]  ;;  %v932_v56 = vmax.f32 %v740_v50, 0.0 }
 0x1af   : > { %1289 = vmatpush.bf16.msrb.mxu2 %v3020_v55 }
 0x1b1   : > { %v784_v35 = vpop.f32.mrf.mxu0 }
 0x1b2   : > { %v785_v62 = vadd.f32 %v3201_v51, %v784_v35  ;;  %v3025_v35 = vld [vmem:[%s4138_s3 + $0x28] sm:$0xff] }
 0x1b3   : > { %1417 = vmatpush.bf16.msrb.mxu3 %v3025_v35 }
 0x1b4   : > { %v950_v2 = vmax.f32 %v785_v62, 0.0  ;;  %2770 = vmatmul.msk.bf16.gmra.mxu0 %vm545_vm2, %v3001_v61  ;;  %v3022_v61 = vld [vmem:[%s4138_s3 + $0x10] sm:$0xff] }
 0x1b5   : > { %1205 = vmatpush.bf16.msrb.mxu1 %v3022_v61 }
 0x1b6   : > { %v3315_v3 = vmax.f32 %v928_v0, %v950_v2  ;;  %v933_v2 = vmax.f32 %v742_v43, 0.0 }
 0x1b9   : > { %v786_v5 = vpop.f32.mrf.mxu0 }
 0x1ba   : > { %v787_v6 = vadd.f32 %v3201_v51, %v786_v5  ;;  %v859_v5 = vpop.f32.mrf.mxu1 }
 0x1bb   : > { %v860_v49 = vadd.f32 %v3201_v51, %v859_v5 }
 0x1bc   : > { %v951_v7 = vmax.f32 %v787_v6, 0.0  ;;  %v3004_v6 = vld [vmem:[%s3115_s27 + $0xe8] sm:$0xff] }
 0x1be   : > { %v3321_v12 = vmax.f32 %v929_v28, %v951_v7 }
 0x1c1   : > { %v789_v19 = vpop.f32.mrf.mxu0 }
 0x1c2   : > { %v790_v20 = vadd.f32 %v3201_v51, %v789_v19 }
 0x1c4   : > { %v952_v27 = vmax.f32 %v790_v20, 0.0  ;;  %2771 = vmatmul.msk.bf16.gmra.mxu0 %vm545_vm2, %v3002_v17  ;;  %v861_v17 = vpop.f32.mrf.mxu1 }
 0x1c6   : > { %v3333_v36 = vmax.f32 %v930_v21, %v952_v27  ;;  %v3024_v21 = vld [vmem:[%s4138_s3 + $0x20] sm:$0xff]  ;;  %v3005_v27 = vld [vmem:[%s3115_s27 + $0xf0] sm:$0xff] }
 0x1c7   : > { %1418 = vmatpush.bf16.msrb.mxu3 %v3024_v21 }
 0x1c9   : > { %v791_v22 = vpop.f32.mrf.mxu0 }
 0x1ca   : > { %v792_v39 = vadd.f32 %v3201_v51, %v791_v22 }
 0x1cc   : > { %v953_v46 = vmax.f32 %v792_v39, 0.0  ;;  %v864_v40 = vpop.f32.mrf.mxu1  ;;  %v980_v39 = vmax.f32 %v860_v49, 0.0 }
 0x1cd   : > { %v865_v35 = vadd.f32 %v3201_v51, %v864_v40 }
 0x1ce   : > { %v3339_v32 = vmax.f32 %v931_v44, %v953_v46  ;;  %v862_v46 = vadd.f32 %v3201_v51, %v861_v17 }
 0x1cf   : > { %v982_v45 = vmax.f32 %v865_v35, 0.0 }
 0x1d1   : > { %v794_v23 = vpop.f32.mrf.mxu0 }
 0x1d2   : > { %v795_v54 = vadd.f32 %v3201_v51, %v794_v23  ;;  %v3029_v23 = vld [vmem:[%s4138_s3 + $0x48] sm:$0xff] }
 0x1d3   : > { %1779 = vmatpush.bf16.msra.mxu2 %v3029_v23 }
 0x1d4   : > { %v954_v41 = vmax.f32 %v795_v54, 0.0  ;;  %2772 = vmatmul.msk.bf16.gmra.mxu0 %vm545_vm2, %v3003_v34  ;;  %v3031_v54 = vld [vmem:[%s4138_s3 + $0x58] sm:$0xff]  ;;  %v866_v43 = vpop.f32.mrf.mxu1 }
 0x1d5   : > { %1935 = vmatpush.bf16.msra.mxu3 %v3031_v54 }
 0x1d6   : > { %v3351_v59 = vmax.f32 %v932_v56, %v954_v41  ;;  %v981_v56 = vmax.f32 %v862_v46, 0.0 }
 0x1d9   : > { %v796_v62 = vpop.f32.mrf.mxu0 }
 0x1da   : > { %v797_v0 = vadd.f32 %v3201_v51, %v796_v62 }
 0x1dc   : > { %v955_v26 = vmax.f32 %v797_v0, 0.0 }
 0x1de   : > { %v3362_v37 = vmax.f32 %v933_v2, %v955_v26  ;;  %v3006_v2 = vld [vmem:[%s3115_s27 + $0xf8] sm:$0xff]  ;;  %s4061_s27 = scalar_lea.vmem %s4140_s5, %s3042_s24 }
 0x1e1   : > { %v799_v28 = vpop.f32.mrf.mxu0 }
 0x1e2   : > { %v800_v7 = vadd.f32 %v3201_v51, %v799_v28  ;;  %v3027_v28 = vld [vmem:[%s4138_s3 + $0x38] sm:$0xff] }
 0x1e3   : > { %1633 = vmatpush.bf16.msra.mxu1 %v3027_v28 }
 0x1e4   : > { %v956_v11 = vmax.f32 %v800_v7, 0.0  ;;  %2773 = vmatmul.msk.bf16.gmra.mxu0 %vm545_vm2, %v3004_v6 }
 0x1e6   : > { %v3369_v13 = vmax.f32 %v934_v9, %v956_v11  ;;  %v869_v9 = vpop.f32.mrf.mxu1  ;;  %v867_v11 = vadd.f32 %v3201_v51, %v866_v43 }
 0x1e7   : > { %v870_v21 = vadd.f32 %v3201_v51, %v869_v9 }
 0x1e9   : > { %v801_v29 = vpop.f32.mrf.mxu0 }
 0x1ea   : > { %v802_v47 = vadd.f32 %v3201_v51, %v801_v29 }
 0x1ec   : > { %v957_v19 = vmax.f32 %v802_v47, 0.0  ;;  %v983_v47 = vmax.f32 %v867_v11, 0.0 }
 0x1ee   : > { %v3376_v20 = vmax.f32 %v935_v38, %v957_v19  ;;  %v871_v40 = vpop.f32.mrf.mxu1 }
 0x1ef   : > { %v872_v35 = vadd.f32 %v3201_v51, %v871_v40 }
 0x1f1   : > { %v804_v33 = vpop.f32.mrf.mxu0 }
 0x1f2   : > { %v805_v22 = vadd.f32 %v3201_v51, %v804_v33 }
 0x1f4   : > { %2774 = vmatmul.msk.bf16.gmra.mxu0 %vm545_vm2, %v3005_v27  ;;  %v958_v44 = vmax.f32 %v805_v22, 0.0 }
 0x1f6   : > { %v1024_v55 = vmax.f32 %v958_v44, %v980_v39  ;;  %v984_v39 = vmax.f32 %v870_v21, 0.0 }
 0x1f8   : > { %v1046_v62 = vmax.f32 %v3208_v58, %v1024_v55 }
 0x1f9   : > { %v806_v50 = vpop.f32.mrf.mxu0 }
 0x1fa   : > { %v807_v34 = vadd.f32 %v3201_v51, %v806_v50 }
 0x1fc   : > { %v959_v41 = vmax.f32 %v807_v34, 0.0 }
 0x1fe   : > { %v1025_v61 = vmax.f32 %v959_v41, %v981_v56 }
 0x200   : > { %v1047_v0 = vmax.f32 %v3214_v1, %v1025_v61 }
 0x201   : > { %v809_v26 = vpop.f32.mrf.mxu0 }
 0x202   : > { %v1068_v5 = vpack.c.bf16 %v1047_v0, %v1046_v62  ;;  %v810_v6 = vadd.f32 %v3201_v51, %v809_v26 }
 0x204   : > { %v960_v7 = vmax.f32 %v810_v6, 0.0  ;;  %2775 = vmatmul.msk.bf16.gmra.mxu0 %vm545_vm2, %v3006_v2  ;;  %2817 = vmatmul.msk.bf16.vlgmr.msrb.gmra.mxu2 %vm1170_vm3, %v1068_v5  ;;  %v1090_v27 = vshll.u32 %v1068_v5, 16  ;;  %v1353_v46 = vrot.slane %v1068_v5, 1  ;;  %v1088_v23 = vshrl.u32 %v1068_v5, 16  ;;  %v879_v6 = vpop.f32.mrf.mxu2 }
 0x206   : > { %v1026_v58 = vmax.f32 %v960_v7, %v982_v45  ;;  %v1092_v44 = vrot.slane %v1090_v27, 1  ;;  %v874_v45 = vpop.f32.mrf.mxu1  ;;  %v985_v7 = vmax.f32 %v872_v35, 0.0 }
 0x208   : > { %v1048_v1 = vmax.f32 %v3220_v8, %v1026_v58  ;;  %v1093_v56 = vor.u32 %v1092_v44, %v1088_v23 }
 0x209   : > { %v811_v14 = vpop.f32.mrf.mxu0 }
 0x20a   : > { %v1483_v17 = vpack.c.bf16 %v1048_v1, %v1047_v0  ;;  %v812_v29 = vadd.f32 %v3201_v51, %v811_v14 }
 0x20c   : > { %v961_v38 = vmax.f32 %v812_v29, 0.0  ;;  %v1500_v43 = vshrl.u32 %v1483_v17, 16  ;;  %v1503_v61 = vshll.u32 %v1483_v17, 16  ;;  %v1715_v28 = vrot.slane %v1483_v17, 3 }
 0x20e   : > { %v1027_v19 = vmax.f32 %v961_v38, %v983_v47  ;;  %v1851_v58 = vrot.slane %v1500_v43, 3  ;;  %v1852_v9 = vrot.slane %v1503_v61, 4  ;;  %v1502_v29 = vrot.slane %v1500_v43, 2 }
 0x20f   : > { %v1505_v47 = vrot.slane %v1503_v61, 3  ;;  %v875_v38 = vadd.f32 %v3201_v51, %v874_v45  ;;  %v881_v45 = vpop.f32.mrf.mxu2 }
 0x210   : > { %v1049_v33 = vmax.f32 %v3227_v15, %v1027_v19  ;;  %v1853_v44 = vor.u32 %v1852_v9, %v1851_v58 }
 0x211   : > { %v814_v49 = vpop.f32.mrf.mxu0  ;;  %v1506_v23 = vor.u32 %v1505_v47, %v1502_v29 }
 0x212   : > { %v3408_v22 = vpack.c.bf16 %v1049_v33, %v1048_v1  ;;  %v815_v8 = vadd.f32 %v3201_v51, %v814_v49 }
 0x214   : > { %v962_v50 = vmax.f32 %v815_v8, 0.0  ;;  %2818 = vmatmul.msk.bf16.gmra.mxu2 %vm1170_vm3, %v3408_v22  ;;  %v1354_v34 = vrot.slane %v3408_v22, 1  ;;  %v1095_v54 = vshll.u32 %v3408_v22, 16 }
 0x216   : > { %v1028_v15 = vmax.f32 %v962_v50, %v984_v39  ;;  %v1355_v55 = vsel %vm1352_vm4, %v1353_v46, %v1354_v34  ;;  %v1097_v41 = vrot.slane %v1095_v54, 1 }
 0x217   : > { %2838 = vmatmul.msk.bf16.vlgmr.msrb.gmra.mxu3 %vm1170_vm3, %v1355_v55 }
 0x218   : > { %v1050_v62 = vmax.f32 %v3234_v24, %v1028_v15  ;;  %v1098_v0 = vsel %vm1086_vm5, %v1093_v56, %v1097_v41  ;;  %v986_v56 = vmax.f32 %v875_v38, 0.0 }
 0x219   : > { %v816_v2 = vpop.f32.mrf.mxu0  ;;  %2800 = vmatmul.msk.bf16.vlgmr.msrb.gmra.mxu1 %vm1170_vm3, %v1098_v0 }
 0x21a   : > { %v3421_v26 = vpack.c.bf16 %v1050_v62, %v1049_v33  ;;  %v817_v5 = vadd.f32 %v3201_v51, %v816_v2 }
 0x21c   : > { %v963_v1 = vmax.f32 %v817_v5, 0.0  ;;  %v1716_v11 = vrot.slane %v3421_v26, 3  ;;  %v1508_v24 = vshrl.u32 %v3421_v26, 16  ;;  %v1511_v14 = vshll.u32 %v3421_v26, 16 }
 0x21d   : > { %v1099_v5 = vshrl.u32 %v3408_v22, 16 }
 0x21e   : > { %v1029_v19 = vmax.f32 %v963_v1, %v985_v7  ;;  %v3429_v21 = vsel %vm679_vm1, %v1715_v28, %v1716_v11  ;;  %v1854_v17 = vrot.slane %v1508_v24, 3  ;;  %v1855_v27 = vrot.slane %v1511_v14, 4 }
 0x21f   : > { %v1510_v33 = vrot.slane %v1508_v24, 2  ;;  %v1513_v40 = vrot.slane %v1511_v14, 3  ;;  %v2146_v49 = vrot.slane %v1508_v24, 1  ;;  %v2147_v39 = vrot.slane %v1511_v14, 2 }
 0x220   : > { %v1051_v8 = vmax.f32 %v3241_v42, %v1029_v19  ;;  %v1856_v46 = vor.u32 %v1855_v27, %v1854_v17  ;;  %v876_v42 = vpop.f32.mrf.mxu1  ;;  %v1101_v58 = vor.u32 %v1099_v5, %v1097_v41  ;;  %v2312_v27 = vrot.slane %v3421_v26, 2 }
 0x221   : > { %v819_v50 = vpop.f32.mrf.mxu0  ;;  %v1514_v54 = vor.u32 %v1513_v40, %v1510_v33  ;;  %v2148_v15 = vor.u32 %v2147_v39, %v2146_v49  ;;  %v877_v1 = vadd.f32 %v3201_v51, %v876_v42  ;;  %v2010_v40 = vrot.slane %v3421_v26, 1 }
 0x222   : > { %v3432_v55 = vpack.c.bf16 %v1051_v8, %v1050_v62  ;;  %v820_v43 = vadd.f32 %v3201_v51, %v819_v50  ;;  %v3436_v61 = vsel %vm1850_vm6, %v1853_v44, %v1856_v46 }
 0x223   : > { %v3439_v35 = vsel %vm1498_vm7, %v1506_v23, %v1514_v54  ;;  %v987_v38 = vmax.f32 %v877_v1, 0.0 }
 0x224   : > { %v964_v0 = vmax.f32 %v820_v43, 0.0  ;;  %2819 = vmatmul.msk.bf16.gmra.mxu2 %vm1170_vm3, %v3432_v55  ;;  %v1356_v2 = vrot.slane %v3432_v55, 1  ;;  %v1103_v62 = vshll.u32 %v3432_v55, 16 }
 0x226   : > { %v1030_v28 = vmax.f32 %v964_v0, %v986_v56  ;;  %v1357_v7 = vsel %vm1352_vm4, %v1354_v34, %v1356_v2  ;;  %v1105_v9 = vrot.slane %v1103_v62, 1  ;;  %v880_v34 = vadd.f32 %v3201_v51, %v879_v6 }
 0x227   : > { %2839 = vmatmul.msk.bf16.gmra.mxu3 %vm1170_vm3, %v1357_v7 }
 0x228   : > { %v1052_v24 = vmax.f32 %v3248_v53, %v1030_v28  ;;  %v1106_v14 = vsel %vm1086_vm5, %v1101_v58, %v1105_v9  ;;  %v988_v1 = vmax.f32 %v880_v34, 0.0 }
 0x229   : > { %v821_v29 = vpop.f32.mrf.mxu0  ;;  %2801 = vmatmul.msk.bf16.gmra.mxu1 %vm1170_vm3, %v1106_v14 }
 0x22a   : > { %v3452_v22 = vpack.c.bf16 %v1052_v24, %v1051_v8  ;;  %v822_v47 = vadd.f32 %v3201_v51, %v821_v29  ;;  %v884_v8 = vpop.f32.mrf.mxu2 }
 0x22c   : > { %v965_v41 = vmax.f32 %v822_v47, 0.0  ;;  %v1718_v19 = vrot.slane %v3452_v22, 3  ;;  %v1517_v17 = vshrl.u32 %v3452_v22, 16  ;;  %v1520_v53 = vshll.u32 %v3452_v22, 16 }
 0x22d   : > { %v2313_v33 = vrot.slane %v3452_v22, 2  ;;  %v2011_v49 = vrot.slane %v3452_v22, 1 }
 0x22e   : > { %v1031_v39 = vmax.f32 %v965_v41, %v987_v38  ;;  %v3464_v6 = vsel %vm679_vm1, %v1716_v11, %v1718_v19  ;;  %v1858_v44 = vrot.slane %v1517_v17, 3  ;;  %v1859_v50 = vrot.slane %v1520_v53, 4 }
 0x22f   : > { %v1519_v23 = vrot.slane %v1517_v17, 2  ;;  %v1522_v56 = vrot.slane %v1520_v53, 3  ;;  %v2149_v43 = vrot.slane %v1517_v17, 1  ;;  %v2150_v0 = vrot.slane %v1520_v53, 2 }
 0x230   : > { %v1053_v42 = vmax.f32 %v3255_v60, %v1031_v39  ;;  %v1860_v5 = vor.u32 %v1859_v50, %v1858_v44  ;;  %v3468_v62 = vsel %vm2311_vm9, %v2312_v27, %v2313_v33  ;;  %v3471_v26 = vsel %vm1352_vm4, %v2010_v40, %v2011_v49 }
 0x231   : > { %v824_v28 = vpop.f32.mrf.mxu0  ;;  %v1523_v7 = vor.u32 %v1522_v56, %v1519_v23  ;;  %v2151_v58 = vor.u32 %v2150_v0, %v2149_v43 }
 0x232   : > { %v3473_v11 = vpack.c.bf16 %v1053_v42, %v1052_v24  ;;  %v825_v14 = vadd.f32 %v3201_v51, %v824_v28  ;;  %v3477_v29 = vsel %vm1850_vm6, %v1856_v46, %v1860_v5  ;;  %v1107_v24 = vshrl.u32 %v3432_v55, 16  ;;  %v886_v40 = vpop.f32.mrf.mxu2 }
 0x233   : > { %v3480_v60 = vsel %vm1498_vm7, %v1514_v54, %v1523_v7  ;;  %v3483_v22 = vsel %vm2145_vm8, %v2148_v15, %v2151_v58  ;;  %v882_v54 = vadd.f32 %v3201_v51, %v881_v45 }
 0x234   : > { %v966_v47 = vmax.f32 %v825_v14, 0.0  ;;  %2820 = vmatmul.msk.bf16.gmra.mxu2 %vm1170_vm3, %v3473_v11  ;;  %v1358_v38 = vrot.slane %v3473_v11, 1  ;;  %v1111_v34 = vshll.u32 %v3473_v11, 16  ;;  %v1109_v17 = vor.u32 %v1107_v24, %v1105_v9 }
 0x235   : > { %v989_v50 = vmax.f32 %v882_v54, 0.0 }
 0x236   : > { %v1032_v41 = vmax.f32 %v966_v47, %v988_v1  ;;  %v1359_v46 = vsel %vm1352_vm4, %v1356_v2, %v1358_v38  ;;  %v1113_v53 = vrot.slane %v1111_v34, 1 }
 0x237   : > { %2840 = vmatmul.msk.bf16.gmra.mxu3 %vm1170_vm3, %v1359_v46 }
 0x238   : > { %v1054_v15 = vmax.f32 %v3263_v4, %v1032_v41  ;;  %v1114_v27 = vsel %vm1086_vm5, %v1109_v17, %v1113_v53  ;;  %v885_v4 = vadd.f32 %v3201_v51, %v884_v8 }
 0x239   : > { %v826_v39 = vpop.f32.mrf.mxu0  ;;  %2802 = vmatmul.msk.bf16.gmra.mxu1 %vm1170_vm3, %v1114_v27 }
 0x23a   : > { %v3496_v55 = vpack.c.bf16 %v1054_v15, %v1053_v42  ;;  %v827_v44 = vadd.f32 %v3201_v51, %v826_v39 }
 0x23c   : > { %v967_v2 = vmax.f32 %v827_v44, 0.0  ;;  %v1720_v9 = vrot.slane %v3496_v55, 3  ;;  %v1526_v45 = vshrl.u32 %v3496_v55, 16  ;;  %v1529_v23 = vshll.u32 %v3496_v55, 16 }
 0x23d   : > { %v2315_v56 = vrot.slane %v3496_v55, 2  ;;  %v2013_v43 = vrot.slane %v3496_v55, 1  ;;  %v990_v44 = vmax.f32 %v885_v4, 0.0 }
 0x23e   : > { %v1033_v0 = vmax.f32 %v967_v2, %v989_v50  ;;  %v3506_v42 = vsel %vm679_vm1, %v1718_v19, %v1720_v9  ;;  %v1862_v28 = vrot.slane %v1526_v45, 3  ;;  %v1863_v1 = vrot.slane %v1529_v23, 4  ;;  %v889_v50 = vpop.f32.mrf.mxu2  ;;  %v3028_v2 = vld [vmem:[%s4138_s3 + $0x40] sm:$0xff] }
 0x23f   : > { %v1528_v14 = vrot.slane %v1526_v45, 2  ;;  %v1531_v47 = vrot.slane %v1529_v23, 3  ;;  %v2153_v24 = vrot.slane %v1526_v45, 1  ;;  %v2154_v34 = vrot.slane %v1529_v23, 2  ;;  %1780 = vmatpush.bf16.msra.mxu2 %v3028_v2 }
 0x240   : > { %v1055_v41 = vmax.f32 %v3269_v10, %v1033_v0  ;;  %v3509_v46 = vor.u32 %v1863_v1, %v1862_v28  ;;  %v3514_v8 = vsel %vm2311_vm9, %v2313_v33, %v2315_v56  ;;  %v3519_v19 = vsel %vm1352_vm4, %v2011_v49, %v2013_v43  ;;  %v3030_v33 = vld [vmem:[%s4138_s3 + $0x50] sm:$0xff] }
 0x241   : > { %4146 = vst [vmem:[#allocation2_spill] sm:$0xff] %v3514_v8  ;;  %v829_v17 = vpop.f32.mrf.mxu0  ;;  %v1532_v54 = vor.u32 %v1531_v47, %v1528_v14  ;;  %v2155_v27 = vor.u32 %v2154_v34, %v2153_v24  ;;  %v1115_v0 = vshrl.u32 %v3473_v11, 16  ;;  %1936 = vmatpush.bf16.msra.mxu3 %v3030_v33  ;;  %v890_v33 = vadd.f32 %v3201_v51, %v889_v50 }
 0x242   : > { %4147 = vst [vmem:[#allocation3_spill] sm:$0xff] %v3519_v19  ;;  %v3521_v39 = vpack.c.bf16 %v1055_v41, %v1054_v15  ;;  %v830_v10 = vadd.f32 %v3201_v51, %v829_v17  ;;  %v3532_v49 = vsel %vm1850_vm6, %v1860_v5, %v3509_v46 }
 0x243   : > { %v3535_v45 = vsel %vm1498_vm7, %v1523_v7, %v1532_v54  ;;  %v3538_v15 = vsel %vm2145_vm8, %v2151_v58, %v2155_v27  ;;  %v1117_v7 = vor.u32 %v1115_v0, %v1113_v53  ;;  %v887_v58 = vadd.f32 %v3201_v51, %v886_v40 }
 0x244   : > { %v968_v23 = vmax.f32 %v830_v10, 0.0  ;;  %2821 = vmatmul.msk.bf16.gmra.mxu2 %vm1170_vm3, %v3521_v39  ;;  %v1360_v4 = vrot.slane %v3521_v39, 1  ;;  %v1119_v28 = vshll.u32 %v3521_v39, 16  ;;  %v992_v19 = vmax.f32 %v890_v33, 0.0 }
 0x245   : > { %v991_v53 = vmax.f32 %v887_v58, 0.0 }
 0x246   : > { %v1034_v5 = vmax.f32 %v968_v23, %v990_v44  ;;  %v1361_v1 = vsel %vm1352_vm4, %v1358_v38, %v1360_v4  ;;  %v1121_v14 = vrot.slane %v1119_v28, 1  ;;  %v3026_v38 = vld [vmem:[%s4138_s3 + $0x30] sm:$0xff]  ;;  %v891_v40 = vpop.f32.mrf.mxu2 }
 0x247   : > { %2841 = vmatmul.msk.bf16.gmra.mxu3 %vm1170_vm3, %v1361_v1  ;;  %1634 = vmatpush.bf16.msra.mxu1 %v3026_v38 }
 0x248   : > { %v1056_v47 = vmax.f32 %v3277_v18, %v1034_v5  ;;  %v1122_v24 = vsel %vm1086_vm5, %v1117_v7, %v1121_v14 }
 0x249   : > { %v831_v34 = vpop.f32.mrf.mxu0  ;;  %2803 = vmatmul.msk.bf16.gmra.mxu1 %vm1170_vm3, %v1122_v24 }
 0x24a   : > { %v3551_v11 = vpack.c.bf16 %v1056_v47, %v1055_v41  ;;  %v832_v17 = vadd.f32 %v3201_v51, %v831_v34 }
 0x24c   : > { %v969_v44 = vmax.f32 %v832_v17, 0.0  ;;  %v1722_v10 = vrot.slane %v3551_v11, 3  ;;  %v1535_v18 = vshrl.u32 %v3551_v11, 16  ;;  %v1538_v2 = vshll.u32 %v3551_v11, 16 }
 0x24d   : > { %v2317_v41 = vrot.slane %v3551_v11, 2  ;;  %v2015_v23 = vrot.slane %v3551_v11, 1 }
 0x24e   : > { %v1035_v0 = vmax.f32 %v969_v44, %v991_v53  ;;  %v3564_v28 = vsel %vm679_vm1, %v1720_v9, %v1722_v10  ;;  %v1866_v5 = vrot.slane %v1535_v18, 3  ;;  %v1867_v1 = vrot.slane %v1538_v2, 4 }
 0x24f   : > { %v1537_v7 = vrot.slane %v1535_v18, 2  ;;  %v1540_v58 = vrot.slane %v1538_v2, 3  ;;  %v2157_v24 = vrot.slane %v1535_v18, 1  ;;  %v2158_v34 = vrot.slane %v1538_v2, 2 }
 0x250   : > { %v1057_v17 = vmax.f32 %v3283_v30, %v1035_v0  ;;  %v1868_v38 = vor.u32 %v1867_v1, %v1866_v5  ;;  %v3570_v50 = vsel %vm2311_vm9, %v2315_v56, %v2317_v41  ;;  %v3575_v11 = vsel %vm1352_vm4, %v2013_v43, %v2015_v23  ;;  %v894_v1 = vpop.f32.mrf.mxu2 }
 0x251   : > { %4148 = vst [vmem:[#allocation4_spill] sm:$0xff] %v3570_v50  ;;  %v834_v9 = vpop.f32.mrf.mxu0  ;;  %v1541_v53 = vor.u32 %v1540_v58, %v1537_v7  ;;  %v2159_v44 = vor.u32 %v2158_v34, %v2157_v24  ;;  %v1123_v0 = vshrl.u32 %v3521_v39, 16  ;;  %v892_v58 = vadd.f32 %v3201_v51, %v891_v40 }
 0x252   : > { %4149 = vst [vmem:[#allocation5_spill] sm:$0xff] %v3575_v11  ;;  %v1073_v16 = vpack.c.bf16 %v1057_v17, %v1056_v47  ;;  %v835_v18 = vadd.f32 %v3201_v51, %v834_v9  ;;  %v3580_v30 = vsel %vm1850_vm6, %v3509_v46, %v1868_v38 }
 0x253   : > { %v3583_v2 = vsel %vm1498_vm7, %v1532_v54, %v1541_v53  ;;  %v3586_v56 = vsel %vm2145_vm8, %v2155_v27, %v2159_v44  ;;  %v1125_v7 = vor.u32 %v1123_v0, %v1121_v14  ;;  %v993_v39 = vmax.f32 %v892_v58, 0.0 }
 0x254   : > { %4150 = vst [vmem:[#allocation6_spill] sm:$0xff] %v3586_v56  ;;  %v970_v55 = vmax.f32 %v835_v18, 0.0  ;;  %2822 = vmatmul.msk.bf16.gmra.mxu2 %vm1170_vm3, %v1073_v16  ;;  %v1362_v43 = vrot.slane %v1073_v16, 1  ;;  %v1127_v47 = vshll.u32 %v1073_v16, 16  ;;  %v895_v18 = vadd.f32 %v3201_v51, %v894_v1 }
 0x256   : > { %v1036_v33 = vmax.f32 %v970_v55, %v992_v19  ;;  %v1363_v5 = vsel %vm1352_vm4, %v1360_v4, %v1362_v43  ;;  %v1129_v46 = vrot.slane %v1127_v47, 1  ;;  %v994_v8 = vmax.f32 %v895_v18, 0.0 }
 0x257   : > { %2842 = vmatmul.msk.bf16.gmra.mxu3 %vm1170_vm3, %v1363_v5 }
 0x258   : > { %v1058_v54 = vmax.f32 %v3291_v48, %v1036_v33  ;;  %v1130_v27 = vsel %vm1086_vm5, %v1125_v7, %v1129_v46 }
 0x259   : > { %v836_v24 = vpop.f32.mrf.mxu0  ;;  %2804 = vmatmul.msk.bf16.gmra.mxu1 %vm1170_vm3, %v1130_v27 }
 0x25a   : > { %v3596_v34 = vpack.c.bf16 %v1058_v54, %v1057_v17  ;;  %v837_v19 = vadd.f32 %v3201_v51, %v836_v24 }
 0x25c   : > { %v971_v4 = vmax.f32 %v837_v19, 0.0  ;;  %v1724_v14 = vrot.slane %v3596_v34, 3  ;;  %v1544_v9 = vshrl.u32 %v3596_v34, 16  ;;  %v1547_v40 = vshll.u32 %v3596_v34, 16  ;;  %v896_v19 = vpop.f32.mrf.mxu2 }
 0x25d   : > { %v2319_v48 = vrot.slane %v3596_v34, 2  ;;  %v2017_v55 = vrot.slane %v3596_v34, 1 }
 0x25e   : > { %v1037_v0 = vmax.f32 %v971_v4, %v993_v39  ;;  %v3606_v17 = vsel %vm679_vm1, %v1722_v10, %v1724_v14  ;;  %v1870_v47 = vrot.slane %v1544_v9, 3  ;;  %v1871_v33 = vrot.slane %v1547_v40, 4 }
 0x25f   : > { %v1546_v5 = vrot.slane %v1544_v9, 2  ;;  %v1549_v7 = vrot.slane %v1547_v40, 3  ;;  %v2161_v58 = vrot.slane %v1544_v9, 1  ;;  %v2162_v27 = vrot.slane %v1547_v40, 2 }
 0x260   : > { %v1059_v24 = vmax.f32 %v3302_v57, %v1037_v0  ;;  %v1872_v11 = vor.u32 %v1871_v33, %v1870_v47  ;;  %v3610_v1 = vsel %vm2311_vm9, %v2317_v41, %v2319_v48  ;;  %v3613_v50 = vsel %vm1352_vm4, %v2015_v23, %v2017_v55 }
 0x261   : > { %4151 = vst [vmem:[#allocation7_spill] sm:$0xff] %v3610_v1  ;;  %v839_v34 = vpop.f32.mrf.mxu0  ;;  %v1550_v39 = vor.u32 %v1549_v7, %v1546_v5  ;;  %v2163_v10 = vor.u32 %v2162_v27, %v2161_v58 }
 0x262   : > { %4152 = vst [vmem:[#allocation8_spill] sm:$0xff] %v3613_v50  ;;  %v3615_v4 = vpack.c.bf16 %v1059_v24, %v1058_v54  ;;  %v840_v56 = vadd.f32 %v3201_v51, %v839_v34  ;;  %v3619_v9 = vsel %vm1850_vm6, %v1868_v38, %v1872_v11  ;;  %v1131_v54 = vshrl.u32 %v1073_v16, 16 }
 0x263   : > { %v3622_v57 = vsel %vm1498_vm7, %v1541_v53, %v1550_v39  ;;  %v3625_v41 = vsel %vm2145_vm8, %v2159_v44, %v2163_v10  ;;  %v3635_v53 = vld [vmem:[%s4137_s2] ss:$0 sm:$0xff] }
 0x264   : > { %4153 = vst [vmem:[#allocation9_spill] sm:$0xff] %v3625_v41  ;;  %v972_v40 = vmax.f32 %v840_v56, 0.0  ;;  %2823 = vmatmul.msk.bf16.gmra.mxu2 %vm1170_vm3, %v3615_v4  ;;  %v1364_v23 = vrot.slane %v3615_v4, 1  ;;  %v1135_v18 = vshll.u32 %v3615_v4, 16  ;;  %v1133_v38 = vor.u32 %v1131_v54, %v1129_v46  ;;  %v899_v46 = vpop.f32.mrf.mxu2 }
 0x265   : > { %v897_v44 = vadd.f32 %v3635_v53, %v896_v19 }
 0x266   : > { %v1038_v0 = vmax.f32 %v972_v40, %v994_v8  ;;  %v1365_v51 = vsel %vm1352_vm4, %v1362_v43, %v1364_v23  ;;  %v1137_v47 = vrot.slane %v1135_v18, 1 }
 0x267   : > { %2843 = vmatmul.msk.bf16.gmra.mxu3 %vm1170_vm3, %v1365_v51  ;;  %v995_v5 = vmax.f32 %v897_v44, 0.0 }
 0x268   : > { %v1060_v56 = vmax.f32 %v3315_v3, %v1038_v0  ;;  %v1138_v16 = vsel %vm1086_vm5, %v1133_v38, %v1137_v47  ;;  %v900_v3 = vadd.f32 %v3635_v53, %v899_v46 }
 0x269   : > { %v841_v33 = vpop.f32.mrf.mxu0  ;;  %2805 = vmatmul.msk.bf16.gmra.mxu1 %vm1170_vm3, %v1138_v16 }
 0x26a   : > { %v3642_v8 = vpack.c.bf16 %v1060_v56, %v1059_v24  ;;  %v842_v43 = vadd.f32 %v3635_v53, %v841_v33 }
 0x26c   : > { %v973_v7 = vmax.f32 %v842_v43, 0.0  ;;  %v1726_v58 = vrot.slane %v3642_v8, 3  ;;  %v1553_v27 = vshrl.u32 %v3642_v8, 16  ;;  %v1556_v19 = vshll.u32 %v3642_v8, 16 }
 0x26d   : > { %v4142_v34 = vrot.slane %v3642_v8, 2  ;;  %v4141_v40 = vrot.slane %v3642_v8, 1 }
 0x26e   : > { %v1039_v54 = vmax.f32 %v973_v7, %v995_v5  ;;  %v3652_v24 = vsel %vm679_vm1, %v1724_v14, %v1726_v58  ;;  %v1874_v18 = vrot.slane %v1553_v27, 3  ;;  %v1875_v0 = vrot.slane %v1556_v19, 4 }
 0x26f   : > { %v1555_v51 = vrot.slane %v1553_v27, 2  ;;  %v1558_v38 = vrot.slane %v1556_v19, 3  ;;  %v2165_v44 = vrot.slane %v1553_v27, 1  ;;  %v2166_v16 = vrot.slane %v1556_v19, 2 }
 0x270   : > { %v1061_v33 = vmax.f32 %v3321_v12, %v1039_v54  ;;  %v1876_v43 = vor.u32 %v1875_v0, %v1874_v18  ;;  %v3658_v46 = vsel %vm2311_vm9, %v2319_v48, %v4142_v34  ;;  %v3663_v5 = vsel %vm1352_vm4, %v2017_v55, %v4141_v40  ;;  %v901_v55 = vpop.f32.mrf.mxu2 }
 0x271   : > { %4154 = vst [vmem:[#allocation10_spill] sm:$0xff] %v3658_v46  ;;  %v844_v14 = vpop.f32.mrf.mxu0  ;;  %v1559_v7 = vor.u32 %v1558_v38, %v1555_v51  ;;  %v2167_v50 = vor.u32 %v2166_v16, %v2165_v44  ;;  %v996_v27 = vmax.f32 %v900_v3, 0.0  ;;  %v1139_v3 = vshrl.u32 %v3615_v4, 16  ;;  %v911_v51 = vpop.f32.mrf.mxu3 }
 0x272   : > { %4155 = vst [vmem:[#allocation11_spill] sm:$0xff] %v3663_v5  ;;  %v3665_v1 = vpack.c.bf16 %v1061_v33, %v1060_v56  ;;  %v845_v19 = vadd.f32 %v3635_v53, %v844_v14  ;;  %v3669_v12 = vsel %vm1850_vm6, %v1872_v11, %v1876_v43  ;;  %v912_v4 = vadd.f32 %v3635_v53, %v911_v51 }
 0x273   : > { %v3672_v54 = vsel %vm1498_vm7, %v1550_v39, %v1559_v7  ;;  %v3675_v48 = vsel %vm2145_vm8, %v2163_v10, %v2167_v50  ;;  %v1141_v39 = vor.u32 %v1139_v3, %v1137_v47  ;;  %v902_v10 = vadd.f32 %v3635_v53, %v901_v55 }
 0x274   : > { %4156 = vst [vmem:[#allocation12_spill] sm:$0xff] %v3675_v48  ;;  %v974_v18 = vmax.f32 %v845_v19, 0.0  ;;  %2824 = vmatmul.msk.bf16.gmra.mxu2 %vm1170_vm3, %v3665_v1  ;;  %v1366_v56 = vrot.slane %v3665_v1, 1  ;;  %v1143_v0 = vshll.u32 %v3665_v1, 16  ;;  %v857_v19 = vadd.f32 %v3635_v53, %v3349_v25 }
 0x275   : > { %v905_v47 = vadd.f32 %v3635_v53, %v3299_v52  ;;  %v1001_v51 = vmax.f32 %v912_v4, 0.0  ;;  %v4157_v4 = vrot.slane %v3642_v8, 2 }
 0x276   : > { %v1040_v11 = vmax.f32 %v974_v18, %v996_v27  ;;  %v1367_v38 = vsel %vm1352_vm4, %v1364_v23, %v1366_v56  ;;  %v1145_v44 = vrot.slane %v1143_v0, 1  ;;  %v997_v18 = vmax.f32 %v902_v10, 0.0 }
 0x277   : > { %2844 = vmatmul.msk.bf16.gmra.mxu3 %vm1170_vm3, %v1367_v38  ;;  %v979_v0 = vmax.f32 %v857_v19, 0.0 }
 0x278   : > { %v1062_v16 = vmax.f32 %v3333_v36, %v1040_v11  ;;  %v1146_v14 = vsel %vm1086_vm5, %v1141_v39, %v1145_v44 }
 0x279   : > { %v846_v40 = vpop.f32.mrf.mxu0  ;;  %2806 = vmatmul.msk.bf16.gmra.mxu1 %vm1170_vm3, %v1146_v14 }
 0x27a   : > { %v3691_v27 = vpack.c.bf16 %v1062_v16, %v1061_v33  ;;  %v847_v23 = vadd.f32 %v3635_v53, %v846_v40 }
 0x27c   : > { %v975_v55 = vmax.f32 %v847_v23, 0.0  ;;  %v4143_v36 = vrot.slane %v3691_v27, 3  ;;  %v1562_v3 = vshrl.u32 %v3691_v27, 16  ;;  %v1565_v25 = vshll.u32 %v3691_v27, 16 }
 0x27d   : > { %v4145_v11 = vrot.slane %v3691_v27, 2  ;;  %v4144_v33 = vrot.slane %v3691_v27, 1 }
 0x27e   : > { %v1041_v38 = vmax.f32 %v975_v55, %v997_v18  ;;  %v3704_v40 = vsel %vm679_vm1, %v1726_v58, %v4143_v36  ;;  %v1878_v52 = vrot.slane %v1562_v3, 3  ;;  %v1879_v39 = vrot.slane %v1565_v25, 4 }
 0x27f   : > { %v1564_v10 = vrot.slane %v1562_v3, 2  ;;  %v1567_v14 = vrot.slane %v1565_v25, 3  ;;  %v2169_v23 = vrot.slane %v1562_v3, 1  ;;  %v2170_v34 = vrot.slane %v1565_v25, 2 }
 0x280   : > { %v1063_v5 = vmax.f32 %v3339_v32, %v1041_v38  ;;  %v3707_v19 = vor.u32 %v1879_v39, %v1878_v52  ;;  %v3714_v18 = vsel %vm2311_vm9, %v4157_v4, %v4145_v11  ;;  %v4159_v58 = vrot.slane %v3642_v8, 1 }
 0x281   : > { %4158 = vst [vmem:[#allocation13_spill] sm:$0xff] %v3714_v18  ;;  %v1045_v3 = vmax.f32 %v979_v0, %v1001_v51  ;;  %v849_v25 = vpop.f32.mrf.mxu0  ;;  %v3723_v36 = vor.u32 %v1567_v14, %v1564_v10  ;;  %v3725_v32 = vor.u32 %v2170_v34, %v2169_v23  ;;  %v998_v4 = vmax.f32 %v905_v47, 0.0 }
 0x282   : > { %v3721_v55 = vsel %vm1352_vm4, %v4159_v58, %v4144_v33  ;;  %v3727_v38 = vpack.c.bf16 %v1063_v5, %v1062_v16  ;;  %v850_v52 = vadd.f32 %v3635_v53, %v849_v25  ;;  %v3732_v39 = vsel %vm1850_vm6, %v1876_v43, %v3707_v19 }
 0x283   : > { %4160 = vst [vmem:[#allocation14_spill] sm:$0xff] %v3721_v55  ;;  %v1067_v8 = vmax.f32 %v3376_v20, %v1045_v3  ;;  %v3737_v58 = vsel %vm1498_vm7, %v1559_v7, %v3723_v36  ;;  %v3741_v0 = vsel %vm2145_vm8, %v2167_v50, %v3725_v32  ;;  %v1147_v43 = vshrl.u32 %v3665_v1, 16  ;;  %v3035_v20 = vld [vmem:[%s4138_s3 + $0x78] sm:$0xff]  ;;  %v3037_v1 = vld [vmem:[%s4138_s3 + $0x88] sm:$0xff] }
 0x284   : > { %4161 = vst [vmem:[#allocation15_spill] sm:$0xff] %v3741_v0  ;;  %v976_v34 = vmax.f32 %v850_v52, 0.0  ;;  %2825 = vmatmul.msk.bf16.gmra.mxu2 %vm1170_vm3, %v3727_v38  ;;  %v1368_v16 = vrot.slane %v3727_v38, 1  ;;  %v1151_v47 = vshll.u32 %v3727_v38, 16  ;;  %v907_v14 = vadd.f32 %v3635_v53, %v3311_v63  ;;  %2376 = vmatpush.bf16.msrb.mxu3 %v3037_v1  ;;  %v3033_v63 = vld [vmem:[%s4138_s3 + $0x68] sm:$0xff] }
 0x285   : > { %v1149_v10 = vor.u32 %v1147_v43, %v1145_v44  ;;  %2240 = vmatpush.bf16.msrb.mxu2 %v3035_v20  ;;  %v3754_v23 = vpack.c.bf16 %v1067_v8, %v1067_v8  ;;  %2074 = vmatpush.bf16.msrb.mxu1 %v3033_v63 }
 0x286   : > { %v1042_v7 = vmax.f32 %v976_v34, %v998_v4  ;;  %v1369_v51 = vsel %vm1352_vm4, %v1366_v56, %v1368_v16  ;;  %v1153_v50 = vrot.slane %v1151_v47, 1  ;;  %v999_v34 = vmax.f32 %v907_v14, 0.0 }
 0x287   : > { %v3756_v3 = vpop.f32.mrf.mxu2  ;;  %2845 = vmatmul.msk.bf16.gmra.mxu3 %vm1170_vm3, %v1369_v51  ;;  %v2187_v43 = vshrl.u32 %v3754_v23, 16  ;;  %v2027_v48 = vrot.slane %v3754_v23, 1 }
 0x288   : > { %v1064_v25 = vmax.f32 %v3351_v59, %v1042_v7  ;;  %v1154_v56 = vsel %vm1086_vm5, %v1149_v10, %v1153_v50  ;;  %v2190_v59 = vshll.u32 %v3754_v23, 16 }
 0x289   : > { %v851_v44 = vpop.f32.mrf.mxu0  ;;  %2807 = vmatmul.msk.bf16.gmra.mxu1 %vm1170_vm3, %v1154_v56  ;;  %v4162_v56 = vrot.slane %v3691_v27, 3  ;;  %v2189_v41 = vrot.slane %v2187_v43, 1 }
 0x28a   : > { %v3768_v52 = vpack.c.bf16 %v1064_v25, %v1063_v5  ;;  %v852_v4 = vadd.f32 %v3635_v53, %v851_v44  ;;  %v1336_v8 = vpack.c.bf16 %v1064_v25, %v1064_v25  ;;  %v2329_v53 = vrot.slane %v3754_v23, 2 }
 0x28c   : > { %v977_v47 = vmax.f32 %v852_v4, 0.0  ;;  %v1370_v20 = vrot.slane %v1336_v8, 1  ;;  %v1730_v7 = vrot.slane %v3768_v52, 3  ;;  %v1571_v51 = vshrl.u32 %v3768_v52, 16 }
 0x28d   : > { %v1574_v10 = vshll.u32 %v3768_v52, 16  ;;  %v2325_v5 = vrot.slane %v3768_v52, 2  ;;  %v2023_v1 = vrot.slane %v3768_v52, 1  ;;  %v4163_v52 = vrot.slane %v3691_v27, 2 }
 0x28e   : > { %v1043_v14 = vmax.f32 %v977_v47, %v999_v34  ;;  %v1371_v25 = vsel %vm1352_vm4, %v1368_v16, %v1370_v20  ;;  %v3783_v44 = vsel %vm679_vm1, %v4162_v56, %v1730_v7  ;;  %v1882_v63 = vrot.slane %v1571_v51, 3 }
 0x28f   : > { %v1293_v4 = vpop.f32.mrf.mxu2  ;;  %v1883_v8 = vrot.slane %v1574_v10, 4  ;;  %v1573_v33 = vrot.slane %v1571_v51, 2  ;;  %v1576_v11 = vrot.slane %v1574_v10, 3  ;;  %v2173_v55 = vrot.slane %v1571_v51, 1 }
 0x290   : > { %v1065_v18 = vmax.f32 %v3362_v37, %v1043_v14  ;;  %v2174_v46 = vrot.slane %v1574_v10, 2  ;;  %v3789_v34 = vsel %vm2311_vm9, %v4163_v52, %v2325_v5  ;;  %v4164_v16 = vrot.slane %v3691_v27, 1 }
 0x291   : > { %v1155_v20 = vshrl.u32 %v3727_v38, 16  ;;  %v1884_v56 = vor.u32 %v1883_v8, %v1882_v63  ;;  %v1577_v0 = vor.u32 %v1576_v11, %v1573_v33  ;;  %v4165_v37 = vmax.f32 %v3369_v13, %v3329_v31 }
 0x292   : > { %v3794_v47 = vsel %vm1352_vm4, %v4164_v16, %v2023_v1  ;;  %v1492_v51 = vpack.c.bf16 %v1065_v18, %v1065_v18  ;;  %v2175_v14 = vor.u32 %v2174_v46, %v2173_v55  ;;  %v2192_v38 = vrot.slane %v2190_v59, 2 }
 0x293   : > { %v2001_v10 = vpack.c.bf16 %v4165_v37, %v1065_v18  ;;  %v1157_v52 = vor.u32 %v1155_v20, %v1153_v50  ;;  %v3803_v27 = vsel %vm1850_vm6, %v3707_v19, %v1884_v56  ;;  %v3807_v16 = vsel %vm1498_vm7, %v3723_v36, %v1577_v0 }
 0x294   : > { %v1580_v11 = vshrl.u32 %v1492_v51, 16  ;;  %v1583_v33 = vshll.u32 %v1492_v51, 16  ;;  %2880 = vmatmul.msk.bf16.vlgmr.msra.gmra.mxu2 %vm1170_vm3, %v3429_v21  ;;  %v1732_v23 = vrot.slane %v1492_v51, 3  ;;  %v3813_v31 = vsel %vm2145_vm8, %v3725_v32, %v2175_v14 }
 0x295   : > { %v2178_v13 = vshrl.u32 %v2001_v10, 16  ;;  %v2181_v46 = vshll.u32 %v2001_v10, 16  ;;  %v2327_v18 = vrot.slane %v2001_v10, 2  ;;  %v2025_v19 = vrot.slane %v2001_v10, 1 }
 0x296   : > { %v1207_v55 = vpop.f32.mrf.mxu1  ;;  %v3816_v50 = vsel %vm679_vm1, %v1730_v7, %v1732_v23  ;;  %v1886_v36 = vrot.slane %v1580_v11, 3  ;;  %v1887_v43 = vrot.slane %v1583_v33, 4  ;;  %v1582_v59 = vrot.slane %v1580_v11, 2 }
 0x297   : > { %v1292_v63 = vadd.f32 %v3756_v3, %v1207_v55  ;;  %v1296_v8 = vpop.f32.mrf.mxu2  ;;  %2846 = vmatmul.msk.bf16.gmra.mxu3 %vm1170_vm3, %v1371_v25  ;;  %v1585_v21 = vrot.slane %v1583_v33, 3  ;;  %v2180_v20 = vrot.slane %v2178_v13, 1  ;;  %v2183_v32 = vrot.slane %v2181_v46, 2 }
 0x298   : > { %v1888_v51 = vor.u32 %v1887_v43, %v1886_v36  ;;  %v3821_v37 = vsel %vm2311_vm9, %v2325_v5, %v2327_v18  ;;  %v3824_v10 = vsel %vm1352_vm4, %v2023_v1, %v2025_v19  ;;  %v3827_v7 = vsel %vm2311_vm9, %v2327_v18, %v2329_v53 }
 0x299   : > { %2808 = vmatmul.msk.bf16.gmra.mxu1 %vm1170_vm3, %v1157_v52  ;;  %v1586_v11 = vor.u32 %v1585_v21, %v1582_v59  ;;  %v2184_v3 = vor.u32 %v2183_v32, %v2180_v20  ;;  %v2193_v23 = vor.u32 %v2192_v38, %v2189_v41  ;;  %v3831_v25 = vsel %vm1352_vm4, %v2025_v19, %v2027_v48 }
 0x29a   : > { %v1420_v33 = vpop.f32.mrf.mxu3  ;;  %v3834_v13 = vsel %vm1850_vm6, %v1884_v56, %v1888_v51 }
 0x29b   : > { %v3836_v5 = vadd.f32 %v1420_v33, %v1292_v63  ;;  %v3839_v1 = vsel %vm1498_vm7, %v1577_v0, %v1586_v11  ;;  %v3842_v53 = vsel %vm2145_vm8, %v2175_v14, %v2184_v3  ;;  %v3845_v52 = vsel %vm2145_vm8, %v2184_v3, %v2193_v23 }
 0x29e   : > { %v1209_v46 = vpop.f32.mrf.mxu1 }
 0x29f   : > { %v1294_v41 = vadd.f32 %v1293_v4, %v1209_v46  ;;  %v1298_v38 = vpop.f32.mrf.mxu2  ;;  %v3034_v46 = vld [vmem:[%s4138_s3 + $0x70] sm:$0xff] }
 0x2a0   : > { %2241 = vmatpush.bf16.msrb.mxu2 %v3034_v46 }
 0x2a2   : > { %v1422_v48 = vpop.f32.mrf.mxu3 }
 0x2a3   : > { %v3847_v18 = vadd.f32 %v1422_v48, %v1294_v41  ;;  %v3036_v48 = vld [vmem:[%s4138_s3 + $0x80] sm:$0xff] }
 0x2a4   : > { %2881 = vmatmul.msk.bf16.gmra.mxu2 %vm1170_vm3, %v3464_v6  ;;  %2377 = vmatpush.bf16.msrb.mxu3 %v3036_v48 }
 0x2a6   : > { %v1212_v56 = vpop.f32.mrf.mxu1 }
 0x2a7   : > { %v1297_v19 = vadd.f32 %v1296_v8, %v1212_v56  ;;  %v1301_v55 = vpop.f32.mrf.mxu2  ;;  %2901 = vmatmul.msk.bf16.vlgmr.msra.gmra.mxu3 %vm1170_vm3, %v3436_v61 }
 0x2a9   : > { %2859 = vmatmul.msk.bf16.vlgmr.msra.gmra.mxu1 %vm1170_vm3, %v3439_v35 }
 0x2aa   : > { %v1425_v0 = vpop.f32.mrf.mxu3 }
 0x2ab   : > { %v3855_v14 = vadd.f32 %v1425_v0, %v1297_v19 }
 0x2ae   : > { %v1214_v4 = vpop.f32.mrf.mxu1 }
 0x2af   : > { %v1299_v36 = vadd.f32 %v1298_v38, %v1214_v4  ;;  %v1303_v43 = vpop.f32.mrf.mxu2 }
 0x2b2   : > { %v1427_v59 = vpop.f32.mrf.mxu3 }
 0x2b3   : > { %v3857_v63 = vadd.f32 %v1427_v59, %v1299_v36 }
 0x2b4   : > { %2882 = vmatmul.msk.bf16.gmra.mxu2 %vm1170_vm3, %v3506_v42 }
 0x2b6   : > { %v1217_v6 = vpop.f32.mrf.mxu1 }
 0x2b7   : > { %v1302_v8 = vadd.f32 %v1301_v55, %v1217_v6  ;;  %v1306_v21 = vpop.f32.mrf.mxu2  ;;  %2902 = vmatmul.msk.bf16.gmra.mxu3 %vm1170_vm3, %v3477_v29 }
 0x2b9   : > { %2860 = vmatmul.msk.bf16.gmra.mxu1 %vm1170_vm3, %v3480_v60 }
 0x2ba   : > { %v1430_v61 = vpop.f32.mrf.mxu3 }
 0x2bb   : > { %v3865_v35 = vadd.f32 %v1430_v61, %v1302_v8 }
 0x2be   : > { %v1219_v20 = vpop.f32.mrf.mxu1 }
 0x2bf   : > { %v1304_v32 = vadd.f32 %v1303_v43, %v1219_v20  ;;  %v1308_v51 = vpop.f32.mrf.mxu2 }
 0x2c2   : > { %v1432_v11 = vpop.f32.mrf.mxu3 }
 0x2c3   : > { %v3867_v3 = vadd.f32 %v1432_v11, %v1304_v32 }
 0x2c4   : > { %2883 = vmatmul.msk.bf16.gmra.mxu2 %vm1170_vm3, %v3564_v28 }
 0x2c6   : > { %v1222_v42 = vpop.f32.mrf.mxu1 }
 0x2c7   : > { %v1307_v23 = vadd.f32 %v1306_v21, %v1222_v42  ;;  %v1311_v33 = vpop.f32.mrf.mxu2  ;;  %2903 = vmatmul.msk.bf16.gmra.mxu3 %vm1170_vm3, %v3532_v49  ;;  %v3032_v49 = vld [vmem:[%s4138_s3 + $0x60] sm:$0xff] }
 0x2c8   : > { %2075 = vmatpush.bf16.msrb.mxu1 %v3032_v49 }
 0x2c9   : > { %2861 = vmatmul.msk.bf16.gmra.mxu1 %vm1170_vm3, %v3535_v45 }
 0x2ca   : > { %v1435_v29 = vpop.f32.mrf.mxu3 }
 0x2cb   : > { %v3875_v60 = vadd.f32 %v1435_v29, %v1307_v23 }
 0x2ce   : > { %v1224_v41 = vpop.f32.mrf.mxu1 }
 0x2cf   : > { %v1309_v38 = vadd.f32 %v1308_v51, %v1224_v41  ;;  %v1313_v28 = vpop.f32.mrf.mxu2 }
 0x2d2   : > { %v1437_v45 = vpop.f32.mrf.mxu3 }
 0x2d3   : > { %v3886_v56 = vadd.f32 %v1437_v45, %v1309_v38 }
 0x2d4   : > { %2884 = vmatmul.msk.bf16.gmra.mxu2 %vm1170_vm3, %v3606_v17 }
 0x2d6   : > { %v1227_v19 = vpop.f32.mrf.mxu1 }
 0x2d7   : > { %v1312_v55 = vadd.f32 %v1311_v33, %v1227_v19  ;;  %v1316_v0 = vpop.f32.mrf.mxu2  ;;  %2904 = vmatmul.msk.bf16.gmra.mxu3 %vm1170_vm3, %v3580_v30 }
 0x2d9   : > { %2862 = vmatmul.msk.bf16.gmra.mxu1 %vm1170_vm3, %v3583_v2 }
 0x2da   : > { %v1440_v4 = vpop.f32.mrf.mxu3 }
 0x2db   : > { %v3894_v36 = vadd.f32 %v1440_v4, %v1312_v55 }
 0x2de   : > { %v1229_v43 = vpop.f32.mrf.mxu1 }
 0x2df   : > { %v1314_v59 = vadd.f32 %v1313_v28, %v1229_v43  ;;  %v1318_v6 = vpop.f32.mrf.mxu2 }
 0x2e2   : > { %v1442_v8 = vpop.f32.mrf.mxu3 }
 0x2e3   : > { %v3896_v21 = vadd.f32 %v1442_v8, %v1314_v59 }
 0x2e4   : > { %2885 = vmatmul.msk.bf16.gmra.mxu2 %vm1170_vm3, %v3652_v24 }
 0x2e6   : > { %v1232_v17 = vpop.f32.mrf.mxu1 }
 0x2e7   : > { %v1317_v61 = vadd.f32 %v1316_v0, %v1232_v17  ;;  %v1321_v20 = vpop.f32.mrf.mxu2  ;;  %2905 = vmatmul.msk.bf16.gmra.mxu3 %vm1170_vm3, %v3619_v9 }
 0x2e9   : > { %2863 = vmatmul.msk.bf16.gmra.mxu1 %vm1170_vm3, %v3622_v57 }
 0x2ea   : > { %v1445_v30 = vpop.f32.mrf.mxu3 }
 0x2eb   : > { %v3904_v2 = vadd.f32 %v1445_v30, %v1317_v61 }
 0x2ee   : > { %v1234_v32 = vpop.f32.mrf.mxu1 }
 0x2ef   : > { %v1319_v51 = vadd.f32 %v1318_v6, %v1234_v32  ;;  %v1323_v11 = vpop.f32.mrf.mxu2 }
 0x2f2   : > { %v1447_v42 = vpop.f32.mrf.mxu3 }
 0x2f3   : > { %v3906_v23 = vadd.f32 %v1447_v42, %v1319_v51 }
 0x2f4   : > { %2886 = vmatmul.msk.bf16.gmra.mxu2 %vm1170_vm3, %v3704_v40 }
 0x2f6   : > { %v1237_v24 = vpop.f32.mrf.mxu1 }
 0x2f7   : > { %v1322_v33 = vadd.f32 %v1321_v20, %v1237_v24  ;;  %v1326_v29 = vpop.f32.mrf.mxu2  ;;  %2906 = vmatmul.msk.bf16.gmra.mxu3 %vm1170_vm3, %v3669_v12 }
 0x2f9   : > { %2864 = vmatmul.msk.bf16.gmra.mxu1 %vm1170_vm3, %v3672_v54 }
 0x2fa   : > { %v1450_v9 = vpop.f32.mrf.mxu3 }
 0x2fb   : > { %v3914_v57 = vadd.f32 %v1450_v9, %v1322_v33 }
 0x2fe   : > { %v1239_v46 = vpop.f32.mrf.mxu1 }
 0x2ff   : > { %v1324_v41 = vadd.f32 %v1323_v11, %v1239_v46  ;;  %v1328_v38 = vpop.f32.mrf.mxu2 }
 0x302   : > { %v1452_v28 = vpop.f32.mrf.mxu3 }
 0x303   : > { %v3916_v48 = vadd.f32 %v1452_v28, %v1324_v41 }
 0x304   : > { %2887 = vmatmul.msk.bf16.gmra.mxu2 %vm1170_vm3, %v3783_v44 }
 0x306   : > { %v1242_v40 = vpop.f32.mrf.mxu1 }
 0x307   : > { %v1327_v49 = vadd.f32 %v1326_v29, %v1242_v40  ;;  %v1331_v45 = vpop.f32.mrf.mxu2  ;;  %2907 = vmatmul.msk.bf16.gmra.mxu3 %vm1170_vm3, %v3732_v39 }
 0x309   : > { %2865 = vmatmul.msk.bf16.gmra.mxu1 %vm1170_vm3, %v3737_v58 }
 0x30a   : > { %v1455_v12 = vpop.f32.mrf.mxu3 }
 0x30b   : > { %v3924_v54 = vadd.f32 %v1455_v12, %v1327_v49 }
 0x30e   : > { %v1244_v19 = vpop.f32.mrf.mxu1 }
 0x30f   : > { %v1329_v55 = vadd.f32 %v1328_v38, %v1244_v19  ;;  %v1333_v0 = vpop.f32.mrf.mxu2 }
 0x312   : > { %v1457_v4 = vpop.f32.mrf.mxu3 }
 0x313   : > { %v3926_v43 = vadd.f32 %v1457_v4, %v1329_v55  ;;  %v4168_v55 = vld [vmem:[#allocation3_spill] sm:$0xff] }
 0x314   : > { %2888 = vmatmul.msk.bf16.gmra.mxu2 %vm1170_vm3, %v3816_v50 }
 0x316   : > { %v1247_v44 = vpop.f32.mrf.mxu1 }
 0x317   : > { %v1332_v59 = vadd.f32 %v1331_v45, %v1247_v44  ;;  %v1782_v6 = vpop.f32.mrf.mxu2  ;;  %2908 = vmatmul.msk.bf16.gmra.mxu3 %vm1170_vm3, %v3803_v27 }
 0x319   : > { %2866 = vmatmul.msk.bf16.gmra.mxu1 %vm1170_vm3, %v3807_v16 }
 0x31a   : > { %v1460_v39 = vpop.f32.mrf.mxu3 }
 0x31b   : > { %v3934_v58 = vadd.f32 %v1460_v39, %v1332_v59 }
 0x31e   : > { %v1249_v8 = vpop.f32.mrf.mxu1 }
 0x31f   : > { %v1334_v17 = vadd.f32 %v1333_v0, %v1249_v8  ;;  %v1784_v61 = vpop.f32.mrf.mxu2 }
 0x322   : > { %v1462_v20 = vpop.f32.mrf.mxu3 }
 0x323   : > { %v3936_v30 = vadd.f32 %v1462_v20, %v1334_v17 }
 0x324   : > { %2943 = vmatmul.msk.bf16.vlgmr.msrb.gmra.mxu2 %vm1170_vm3, %v3483_v22 }
 0x326   : > { %v1636_v50 = vpop.f32.mrf.mxu1 }
 0x327   : > { %v1681_v32 = vadd.f32 %v1636_v50, %v3836_v5  ;;  %v1787_v51 = vpop.f32.mrf.mxu2  ;;  %2909 = vmatmul.msk.bf16.gmra.mxu3 %vm1170_vm3, %v3834_v13 }
 0x329   : > { %2867 = vmatmul.msk.bf16.gmra.mxu1 %vm1170_vm3, %v3839_v1  ;;  %v1827_v27 = vadd.f32 %v1782_v6, %v1681_v32  ;;  %v4170_v32 = vld [vmem:[#allocation4_spill] sm:$0xff] }
 0x32a   : > { %v1938_v16 = vpop.f32.mrf.mxu3 }
 0x32b   : > { %v3945_v11 = vadd.f32 %v1938_v16, %v1827_v27 }
 0x32e   : > { %v1638_v42 = vpop.f32.mrf.mxu1 }
 0x32f   : > { %v1682_v24 = vadd.f32 %v1638_v42, %v3847_v18  ;;  %v1789_v33 = vpop.f32.mrf.mxu2 }
 0x331   : > { %v1828_v29 = vadd.f32 %v1784_v61, %v1682_v24 }
 0x332   : > { %v1940_v22 = vpop.f32.mrf.mxu3 }
 0x333   : > { %v3948_v9 = vadd.f32 %v1940_v22, %v1828_v29 }
 0x334   : > { %2944 = vmatmul.msk.bf16.gmra.mxu2 %vm1170_vm3, %v3538_v15 }
 0x336   : > { %v1641_v5 = vpop.f32.mrf.mxu1 }
 0x337   : > { %v1683_v13 = vadd.f32 %v1641_v5, %v3855_v14  ;;  %v1792_v46 = vpop.f32.mrf.mxu2  ;;  %2964 = vmatmul.msk.bf16.vlgmr.msrb.gmra.mxu3 %vm1170_vm3, %v3468_v62  ;;  %v4166_v14 = vld [vmem:[#allocation6_spill] sm:$0xff] }
 0x339   : > { %2922 = vmatmul.msk.bf16.vlgmr.msrb.gmra.mxu1 %vm1170_vm3, %v3471_v26  ;;  %v1829_v1 = vadd.f32 %v1787_v51, %v1683_v13  ;;  %v4167_v26 = vld [vmem:[#allocation2_spill] sm:$0xff]  ;;  %v4171_v51 = vld [vmem:[#allocation5_spill] sm:$0xff] }
 0x33a   : > { %v1943_v18 = vpop.f32.mrf.mxu3 }
 0x33b   : > { %v3957_v41 = vadd.f32 %v1943_v18, %v1829_v1  ;;  %v4173_v18 = vld [vmem:[#allocation7_spill] sm:$0xff] }
 0x33e   : > { %v1643_v38 = vpop.f32.mrf.mxu1 }
 0x33f   : > { %v1684_v28 = vadd.f32 %v1643_v38, %v3857_v63  ;;  %v1794_v40 = vpop.f32.mrf.mxu2  ;;  %v4174_v38 = vld [vmem:[#allocation8_spill] sm:$0xff] }
 0x341   : > { %v1830_v49 = vadd.f32 %v1789_v33, %v1684_v28 }
 0x342   : > { %v1945_v15 = vpop.f32.mrf.mxu3 }
 0x343   : > { %v3960_v45 = vadd.f32 %v1945_v15, %v1830_v49 }
 0x344   : > { %2945 = vmatmul.msk.bf16.gmra.mxu2 %vm1170_vm3, %v4166_v14 }
 0x346   : > { %v1646_v12 = vpop.f32.mrf.mxu1 }
 0x347   : > { %v1685_v62 = vadd.f32 %v1646_v12, %v3865_v35  ;;  %v1797_v19 = vpop.f32.mrf.mxu2  ;;  %2965 = vmatmul.msk.bf16.gmra.mxu3 %vm1170_vm3, %v4167_v26  ;;  %v4169_v35 = vld [vmem:[#allocation9_spill] sm:$0xff] }
 0x349   : > { %2923 = vmatmul.msk.bf16.gmra.mxu1 %vm1170_vm3, %v4168_v55  ;;  %v1831_v0 = vadd.f32 %v1792_v46, %v1685_v62 }
 0x34a   : > { %v1948_v63 = vpop.f32.mrf.mxu3 }
 0x34b   : > { %v3969_v4 = vadd.f32 %v1948_v63, %v1831_v0  ;;  %v4176_v63 = vld [vmem:[#allocation10_spill] sm:$0xff] }
 0x34e   : > { %v1648_v44 = vpop.f32.mrf.mxu1 }
 0x34f   : > { %v1686_v59 = vadd.f32 %v1648_v44, %v3867_v3  ;;  %v1799_v6 = vpop.f32.mrf.mxu2  ;;  %v4177_v44 = vld [vmem:[#allocation11_spill] sm:$0xff] }
 0x351   : > { %v1832_v39 = vadd.f32 %v1794_v40, %v1686_v59 }
 0x352   : > { %v1950_v8 = vpop.f32.mrf.mxu3 }
 0x353   : > { %v3972_v17 = vadd.f32 %v1950_v8, %v1832_v39 }
 0x354   : > { %2946 = vmatmul.msk.bf16.gmra.mxu2 %vm1170_vm3, %v4169_v35 }
 0x356   : > { %v1651_v61 = vpop.f32.mrf.mxu1 }
 0x357   : > { %v1687_v20 = vadd.f32 %v1651_v61, %v3875_v60  ;;  %v1802_v50 = vpop.f32.mrf.mxu2  ;;  %2966 = vmatmul.msk.bf16.gmra.mxu3 %vm1170_vm3, %v4170_v32  ;;  %v4172_v60 = vld [vmem:[#allocation12_spill] sm:$0xff] }
 0x359   : > { %2924 = vmatmul.msk.bf16.gmra.mxu1 %vm1170_vm3, %v4171_v51  ;;  %v1833_v27 = vadd.f32 %v1797_v19, %v1687_v20 }
 0x35a   : > { %v1953_v3 = vpop.f32.mrf.mxu3 }
 0x35b   : > { %v3981_v16 = vadd.f32 %v1953_v3, %v1833_v27  ;;  %v4178_v27 = vld [vmem:[#allocation13_spill] sm:$0xff]  ;;  %v4179_v3 = vld [vmem:[#allocation14_spill] sm:$0xff] }
 0x35e   : > { %v1653_v42 = vpop.f32.mrf.mxu1 }
 0x35f   : > { %v1688_v24 = vadd.f32 %v1653_v42, %v3886_v56  ;;  %v1804_v33 = vpop.f32.mrf.mxu2 }
 0x361   : > { %v1834_v29 = vadd.f32 %v1799_v6, %v1688_v24 }
 0x362   : > { %v1955_v22 = vpop.f32.mrf.mxu3 }
 0x363   : > { %v3984_v5 = vadd.f32 %v1955_v22, %v1834_v29 }
 0x364   : > { %2947 = vmatmul.msk.bf16.gmra.mxu2 %vm1170_vm3, %v4172_v60 }
 0x366   : > { %v1656_v13 = vpop.f32.mrf.mxu1 }
 0x367   : > { %v1689_v46 = vadd.f32 %v1656_v13, %v3894_v36  ;;  %v1807_v1 = vpop.f32.mrf.mxu2  ;;  %2967 = vmatmul.msk.bf16.gmra.mxu3 %vm1170_vm3, %v4173_v18  ;;  %v4175_v36 = vld [vmem:[#allocation15_spill] sm:$0xff] }
 0x369   : > { %2925 = vmatmul.msk.bf16.gmra.mxu1 %vm1170_vm3, %v4174_v38  ;;  %v1835_v28 = vadd.f32 %v1802_v50, %v1689_v46 }
 0x36a   : > { %v1958_v56 = vpop.f32.mrf.mxu3 }
 0x36b   : > { %v3993_v40 = vadd.f32 %v1958_v56, %v1835_v28 }
 0x36e   : > { %v1658_v49 = vpop.f32.mrf.mxu1 }
 0x36f   : > { %v1690_v15 = vadd.f32 %v1658_v49, %v3896_v21  ;;  %v1809_v14 = vpop.f32.mrf.mxu2 }
 0x371   : > { %v1836_v12 = vadd.f32 %v1804_v33, %v1690_v15 }
 0x372   : > { %v1960_v62 = vpop.f32.mrf.mxu3 }
 0x373   : > { %v3996_v19 = vadd.f32 %v1960_v62, %v1836_v12 }
 0x374   : > { %2948 = vmatmul.msk.bf16.gmra.mxu2 %vm1170_vm3, %v4175_v36 }
 0x376   : > { %v1661_v26 = vpop.f32.mrf.mxu1 }
 0x377   : > { %v1691_v55 = vadd.f32 %v1661_v26, %v3904_v2  ;;  %v1812_v0 = vpop.f32.mrf.mxu2  ;;  %2968 = vmatmul.msk.bf16.gmra.mxu3 %vm1170_vm3, %v4176_v63 }
 0x379   : > { %2926 = vmatmul.msk.bf16.gmra.mxu1 %vm1170_vm3, %v4177_v44  ;;  %v1837_v59 = vadd.f32 %v1807_v1, %v1691_v55 }
 0x37a   : > { %v1963_v21 = vpop.f32.mrf.mxu3 }
 0x37b   : > { %v4005_v6 = vadd.f32 %v1963_v21, %v1837_v59 }
 0x37e   : > { %v1663_v39 = vpop.f32.mrf.mxu1 }
 0x37f   : > { %v1692_v8 = vadd.f32 %v1663_v39, %v3906_v23  ;;  %v1814_v35 = vpop.f32.mrf.mxu2 }
 0x381   : > { %v1838_v61 = vadd.f32 %v1809_v14, %v1692_v8 }
 0x382   : > { %v1965_v20 = vpop.f32.mrf.mxu3 }
 0x383   : > { %v4008_v50 = vadd.f32 %v1965_v20, %v1838_v61 }
 0x384   : > { %2949 = vmatmul.msk.bf16.gmra.mxu2 %vm1170_vm3, %v3813_v31 }
 0x386   : > { %v1666_v2 = vpop.f32.mrf.mxu1 }
 0x387   : > { %v1693_v32 = vadd.f32 %v1666_v2, %v3914_v57  ;;  %v1817_v51 = vpop.f32.mrf.mxu2  ;;  %2969 = vmatmul.msk.bf16.gmra.mxu3 %vm1170_vm3, %v4178_v27 }
 0x389   : > { %2927 = vmatmul.msk.bf16.gmra.mxu1 %vm1170_vm3, %v4179_v3  ;;  %v1839_v42 = vadd.f32 %v1812_v0, %v1693_v32 }
 0x38a   : > { %v1968_v23 = vpop.f32.mrf.mxu3 }
 0x38b   : > { %v4017_v24 = vadd.f32 %v1968_v23, %v1839_v42 }
 0x38e   : > { %v1668_v33 = vpop.f32.mrf.mxu1 }
 0x38f   : > { %v1694_v29 = vadd.f32 %v1668_v33, %v3916_v48  ;;  %v1819_v22 = vpop.f32.mrf.mxu2 }
 0x391   : > { %v1840_v60 = vadd.f32 %v1814_v35, %v1694_v29 }
 0x392   : > { %v1970_v31 = vpop.f32.mrf.mxu3 }
 0x393   : > { %v4020_v13 = vadd.f32 %v1970_v31, %v1840_v60 }
 0x394   : > { %2950 = vmatmul.msk.bf16.gmra.mxu2 %vm1170_vm3, %v3842_v53 }
 0x396   : > { %v1671_v57 = vpop.f32.mrf.mxu1 }
 0x397   : > { %v1695_v46 = vadd.f32 %v1671_v57, %v3924_v54  ;;  %v1822_v1 = vpop.f32.mrf.mxu2  ;;  %2970 = vmatmul.msk.bf16.gmra.mxu3 %vm1170_vm3, %v3789_v34 }
 0x399   : > { %2928 = vmatmul.msk.bf16.gmra.mxu1 %vm1170_vm3, %v3794_v47  ;;  %v1841_v18 = vadd.f32 %v1817_v51, %v1695_v46 }
 0x39a   : > { %v1973_v48 = vpop.f32.mrf.mxu3 }
 0x39b   : > { %v4029_v38 = vadd.f32 %v1973_v48, %v1841_v18 }
 0x39e   : > { %v1673_v28 = vpop.f32.mrf.mxu1 }
 0x39f   : > { %v1696_v56 = vadd.f32 %v1673_v28, %v3926_v43  ;;  %v1824_v49 = vpop.f32.mrf.mxu2 }
 0x3a1   : > { %v1842_v15 = vadd.f32 %v1819_v22, %v1696_v56 }
 0x3a2   : > { %v1975_v53 = vpop.f32.mrf.mxu3 }
 0x3a3   : > { %v4032_v14 = vadd.f32 %v1975_v53, %v1842_v15 }
 0x3a4   : > { %2951 = vmatmul.msk.bf16.gmra.mxu2 %vm1170_vm3, %v3845_v52 }
 0x3a6   : > { %v1676_v54 = vpop.f32.mrf.mxu1 }
 0x3a7   : > { %v1697_v34 = vadd.f32 %v1676_v54, %v3934_v58  ;;  %v2243_v12 = vpop.f32.mrf.mxu2  ;;  %2971 = vmatmul.msk.bf16.gmra.mxu3 %vm1170_vm3, %v3821_v37 }
 0x3a9   : > { %2929 = vmatmul.msk.bf16.gmra.mxu1 %vm1170_vm3, %v3824_v10  ;;  %v1843_v47 = vadd.f32 %v1822_v1, %v1697_v34 }
 0x3aa   : > { %v1978_v43 = vpop.f32.mrf.mxu3 }
 0x3ab   : > { %v4041_v62 = vadd.f32 %v1978_v43, %v1843_v47 }
 0x3ae   : > { %v1678_v36 = vpop.f32.mrf.mxu1 }
 0x3af   : > { %v1698_v26 = vadd.f32 %v1678_v36, %v3936_v30  ;;  %v2245_v55 = vpop.f32.mrf.mxu2  ;;  %v4054_v30 = vld [vmem:[%s4139_s4] ss:$0 sm:$0xff] }
 0x3b1   : > { %v1844_v52 = vadd.f32 %v1824_v49, %v1698_v26 }
 0x3b2   : > { %v1980_v0 = vpop.f32.mrf.mxu3 }
 0x3b3   : > { %v4044_v63 = vadd.f32 %v1980_v0, %v1844_v52 }
 0x3b6   : > { %v2077_v58 = vpop.f32.mrf.mxu1 }
 0x3b7   : > { %v2122_v44 = vadd.f32 %v2077_v58, %v3945_v11  ;;  %v2248_v37 = vpop.f32.mrf.mxu2  ;;  %2972 = vmatmul.msk.bf16.gmra.mxu3 %vm1170_vm3, %v3827_v7 }
 0x3b9   : > { %2930 = vmatmul.msk.bf16.gmra.mxu1 %vm1170_vm3, %v3831_v25  ;;  %v2288_v10 = vadd.f32 %v2243_v12, %v2122_v44 }
 0x3ba   : > { %v2379_v59 = vpop.f32.mrf.mxu3 }
 0x3bb   : > { %v2424_v21 = vadd.f32 %v2379_v59, %v2288_v10 }
 0x3bd   : > { %v2446_v39 = vadd.f32 %v4054_v30, %v2424_v21 }
 0x3be   : > { %v2079_v7 = vpop.f32.mrf.mxu1 }
 0x3bf   : > { %v2464_v25 = vmax.f32 %v2446_v39, 0.0  ;;  %v2123_v11 = vadd.f32 %v2079_v7, %v3948_v9  ;;  %v2250_v8 = vpop.f32.mrf.mxu2 }
 0x3c1   : > { %2483 = vst.msk [vmem:[%s4061_s27] sm:$0xff] %vm2482_vm10, %v2464_v25  ;;  %v2289_v35 = vadd.f32 %v2245_v55, %v2123_v11 }
 0x3c2   : > { %v2381_v61 = vpop.f32.mrf.mxu3 }
 0x3c3   : > { %v2425_v20 = vadd.f32 %v2381_v61, %v2289_v35 }
 0x3c5   : > { %v2447_v2 = vadd.f32 %v4054_v30, %v2425_v20 }
 0x3c6   : > { %v2082_v32 = vpop.f32.mrf.mxu1 }
 0x3c7   : > { %v2465_v51 = vmax.f32 %v2447_v2, 0.0  ;;  %v2124_v27 = vadd.f32 %v2082_v32, %v3957_v41  ;;  %v2253_v3 = vpop.f32.mrf.mxu2 }
 0x3c9   : > { %2484 = vst.msk [vmem:[%s4061_s27 + $0x8] sm:$0xff] %vm2482_vm10, %v2465_v51  ;;  %v2290_v42 = vadd.f32 %v2248_v37, %v2124_v27 }
 0x3ca   : > { %v2384_v23 = vpop.f32.mrf.mxu3 }
 0x3cb   : > { %v2426_v9 = vadd.f32 %v2384_v23, %v2290_v42 }
 0x3cd   : > { %v2448_v33 = vadd.f32 %v4054_v30, %v2426_v9 }
 0x3ce   : > { %v2084_v29 = vpop.f32.mrf.mxu1 }
 0x3cf   : > { %v2466_v22 = vmax.f32 %v2448_v33, 0.0  ;;  %v2125_v60 = vadd.f32 %v2084_v29, %v3960_v45  ;;  %v2255_v31 = vpop.f32.mrf.mxu2 }
 0x3d1   : > { %2485 = vst.msk [vmem:[%s4061_s27 + $0x10] sm:$0xff] %vm2482_vm10, %v2466_v22  ;;  %v2291_v57 = vadd.f32 %v2250_v8, %v2125_v60 }
 0x3d2   : > { %v2386_v46 = vpop.f32.mrf.mxu3 }
 0x3d3   : > { %v2427_v41 = vadd.f32 %v2386_v46, %v2291_v57 }
 0x3d5   : > { %v2449_v1 = vadd.f32 %v4054_v30, %v2427_v41 }
 0x3d6   : > { %v2087_v18 = vpop.f32.mrf.mxu1 }
 0x3d7   : > { %v2467_v48 = vmax.f32 %v2449_v1, 0.0  ;;  %v2126_v28 = vadd.f32 %v2087_v18, %v3969_v4  ;;  %v2258_v56 = vpop.f32.mrf.mxu2 }
 0x3d9   : > { %2486 = vst.msk [vmem:[%s4061_s27 + $0x18] sm:$0xff] %vm2482_vm10, %v2467_v48  ;;  %v2292_v49 = vadd.f32 %v2253_v3, %v2126_v28 }
 0x3da   : > { %v2389_v15 = vpop.f32.mrf.mxu3 }
 0x3db   : > { %v2428_v45 = vadd.f32 %v2389_v15, %v2292_v49 }
 0x3dd   : > { %v2450_v53 = vadd.f32 %v4054_v30, %v2428_v45 }
 0x3de   : > { %v2089_v54 = vpop.f32.mrf.mxu1 }
 0x3df   : > { %v2468_v34 = vmax.f32 %v2450_v53, 0.0  ;;  %v2127_v12 = vadd.f32 %v2089_v54, %v3972_v17  ;;  %v2260_v47 = vpop.f32.mrf.mxu2 }
 0x3e1   : > { %2487 = vst.msk [vmem:[%s4061_s27 + $0x20] sm:$0xff] %vm2482_vm10, %v2468_v34  ;;  %v2293_v43 = vadd.f32 %v2255_v31, %v2127_v12 }
 0x3e2   : > { %v2391_v36 = vpop.f32.mrf.mxu3 }
 0x3e3   : > { %v2429_v4 = vadd.f32 %v2391_v36, %v2293_v43 }
 0x3e5   : > { %v2451_v26 = vadd.f32 %v4054_v30, %v2429_v4 }
 0x3e6   : > { %v2092_v55 = vpop.f32.mrf.mxu1 }
 0x3e7   : > { %v2469_v52 = vmax.f32 %v2451_v26, 0.0  ;;  %v2128_v0 = vadd.f32 %v2092_v55, %v3981_v16  ;;  %v2263_v58 = vpop.f32.mrf.mxu2 }
 0x3e9   : > { %2488 = vst.msk [vmem:[%s4061_s27 + $0x28] sm:$0xff] %vm2482_vm10, %v2469_v52  ;;  %v2294_v44 = vadd.f32 %v2258_v56, %v2128_v0 }
 0x3ea   : > { %v2394_v37 = vpop.f32.mrf.mxu3 }
 0x3eb   : > { %v2430_v17 = vadd.f32 %v2394_v37, %v2294_v44 }
 0x3ed   : > { %v2452_v10 = vadd.f32 %v4054_v30, %v2430_v17 }
 0x3ee   : > { %v2094_v59 = vpop.f32.mrf.mxu1 }
 0x3ef   : > { %v2470_v21 = vmax.f32 %v2452_v10, 0.0  ;;  %v2129_v39 = vadd.f32 %v2094_v59, %v3984_v5  ;;  %v2265_v7 = vpop.f32.mrf.mxu2 }
 0x3f1   : > { %2489 = vst.msk [vmem:[%s4061_s27 + $0x30] sm:$0xff] %vm2482_vm10, %v2470_v21  ;;  %v2295_v25 = vadd.f32 %v2260_v47, %v2129_v39 }
 0x3f2   : > { %v2396_v11 = vpop.f32.mrf.mxu3 }
 0x3f3   : > { %v2431_v16 = vadd.f32 %v2396_v11, %v2295_v25 }
 0x3f5   : > { %v2453_v8 = vadd.f32 %v4054_v30, %v2431_v16 }
 0x3f6   : > { %v2097_v35 = vpop.f32.mrf.mxu1 }
 0x3f7   : > { %v2471_v61 = vmax.f32 %v2453_v8, 0.0  ;;  %v2130_v20 = vadd.f32 %v2097_v35, %v3993_v40  ;;  %v2268_v32 = vpop.f32.mrf.mxu2 }
 0x3f9   : > { %2490 = vst.msk [vmem:[%s4061_s27 + $0x38] sm:$0xff] %vm2482_vm10, %v2471_v61  ;;  %v2296_v2 = vadd.f32 %v2263_v58, %v2130_v20 }
 0x3fa   : > { %v2399_v51 = vpop.f32.mrf.mxu3 }
 0x3fb   : > { %v2432_v5 = vadd.f32 %v2399_v51, %v2296_v2 }
 0x3fd   : > { %v2454_v27 = vadd.f32 %v4054_v30, %v2432_v5 }
 0x3fe   : > { %v2099_v3 = vpop.f32.mrf.mxu1 }
 0x3ff   : > { %v2472_v42 = vmax.f32 %v2454_v27, 0.0  ;;  %v2131_v23 = vadd.f32 %v2099_v3, %v3996_v19  ;;  %v2270_v40 = vpop.f32.mrf.mxu2 }
 0x401   : > { %2491 = vst.msk [vmem:[%s4061_s27 + $0x40] sm:$0xff] %vm2482_vm10, %v2472_v42  ;;  %v2297_v9 = vadd.f32 %v2265_v7, %v2131_v23 }
 0x402   : > { %v2401_v33 = vpop.f32.mrf.mxu3 }
 0x403   : > { %v2433_v29 = vadd.f32 %v2401_v33, %v2297_v9 }
 0x405   : > { %v2455_v22 = vadd.f32 %v4054_v30, %v2433_v29 }
 0x406   : > { %v2102_v60 = vpop.f32.mrf.mxu1 }
 0x407   : > { %v2473_v31 = vmax.f32 %v2455_v22, 0.0  ;;  %v2132_v57 = vadd.f32 %v2102_v60, %v4005_v6  ;;  %v2273_v18 = vpop.f32.mrf.mxu2 }
 0x409   : > { %2492 = vst.msk [vmem:[%s4061_s27 + $0x48] sm:$0xff] %vm2482_vm10, %v2473_v31  ;;  %v2298_v46 = vadd.f32 %v2268_v32, %v2132_v57 }
 0x40a   : > { %v2404_v41 = vpop.f32.mrf.mxu3 }
 0x40b   : > { %v2434_v1 = vadd.f32 %v2404_v41, %v2298_v46 }
 0x40d   : > { %v2456_v19 = vadd.f32 %v4054_v30, %v2434_v1 }
 0x40e   : > { %v2104_v48 = vpop.f32.mrf.mxu1 }
 0x40f   : > { %v2474_v28 = vmax.f32 %v2456_v19, 0.0  ;;  %v2133_v56 = vadd.f32 %v2104_v48, %v4008_v50  ;;  %v2275_v12 = vpop.f32.mrf.mxu2 }
 0x411   : > { %2493 = vst.msk [vmem:[%s4061_s27 + $0x50] sm:$0xff] %vm2482_vm10, %v2474_v28  ;;  %v2299_v49 = vadd.f32 %v2270_v40, %v2133_v56 }
 0x412   : > { %v2406_v15 = vpop.f32.mrf.mxu3 }
 0x413   : > { %v2435_v45 = vadd.f32 %v2406_v15, %v2299_v49 }
 0x415   : > { %v2457_v6 = vadd.f32 %v4054_v30, %v2435_v45 }
 0x416   : > { %v2107_v53 = vpop.f32.mrf.mxu1 }
 0x417   : > { %v2475_v54 = vmax.f32 %v2457_v6, 0.0  ;;  %v2134_v34 = vadd.f32 %v2107_v53, %v4017_v24  ;;  %v2278_v0 = vpop.f32.mrf.mxu2 }
 0x419   : > { %2494 = vst.msk [vmem:[%s4061_s27 + $0x58] sm:$0xff] %vm2482_vm10, %v2475_v54  ;;  %v2300_v47 = vadd.f32 %v2273_v18, %v2134_v34 }
 0x41a   : > { %v2409_v43 = vpop.f32.mrf.mxu3 }
 0x41b   : > { %v2436_v36 = vadd.f32 %v2409_v43, %v2300_v47 }
 0x41d   : > { %v2458_v50 = vadd.f32 %v4054_v30, %v2436_v36 }
 0x41e   : > { %v2109_v4 = vpop.f32.mrf.mxu1 }
 0x41f   : > { %v2476_v26 = vmax.f32 %v2458_v50, 0.0  ;;  %v2135_v55 = vadd.f32 %v2109_v4, %v4020_v13  ;;  %v2280_v13 = vpop.f32.mrf.mxu2 }
 0x421   : > { %2495 = vst.msk [vmem:[%s4061_s27 + $0x60] sm:$0xff] %vm2482_vm10, %v2476_v26  ;;  %v2301_v52 = vadd.f32 %v2275_v12, %v2135_v55 }
 0x422   : > { %v2411_v58 = vpop.f32.mrf.mxu3 }
 0x423   : > { %v2437_v24 = vadd.f32 %v2411_v58, %v2301_v52 }
 0x425   : > { %v2459_v44 = vadd.f32 %v4054_v30, %v2437_v24 }
 0x426   : > { %v2112_v37 = vpop.f32.mrf.mxu1 }
 0x427   : > { %v2477_v17 = vmax.f32 %v2459_v44, 0.0  ;;  %v2136_v10 = vadd.f32 %v2112_v37, %v4029_v38  ;;  %v2283_v20 = vpop.f32.mrf.mxu2 }
 0x429   : > { %2496 = vst.msk [vmem:[%s4061_s27 + $0x68] sm:$0xff] %vm2482_vm10, %v2477_v17  ;;  %v2302_v59 = vadd.f32 %v2278_v0, %v2136_v10 }
 0x42a   : > { %v2414_v21 = vpop.f32.mrf.mxu3 }
 0x42b   : > { %v2438_v39 = vadd.f32 %v2414_v21, %v2302_v59 }
 0x42d   : > { %v2460_v7 = vadd.f32 %v4054_v30, %v2438_v39 }
 0x42e   : > { %v2114_v25 = vpop.f32.mrf.mxu1 }
 0x42f   : > { %v2478_v11 = vmax.f32 %v2460_v7, 0.0  ;;  %v2137_v16 = vadd.f32 %v2114_v25, %v4032_v14  ;;  %v2285_v33 = vpop.f32.mrf.mxu2 }
 0x431   : > { %2497 = vst.msk [vmem:[%s4061_s27 + $0x70] sm:$0xff] %vm2482_vm10, %v2478_v11  ;;  %v2303_v8 = vadd.f32 %v2280_v13, %v2137_v16 }
 0x432   : > { %v2416_v35 = vpop.f32.mrf.mxu3 }
 0x433   : > { %v2439_v61 = vadd.f32 %v2416_v35, %v2303_v8 }
 0x435   : > { %v2461_v38 = vadd.f32 %v4054_v30, %v2439_v61 }
 0x436   : > { %v2117_v2 = vpop.f32.mrf.mxu1 }
 0x437   : > { %v2479_v32 = vmax.f32 %v2461_v38, 0.0  ;;  %v2138_v51 = vadd.f32 %v2117_v2, %v4041_v62 }
 0x439   : > { %2498 = vst.msk [vmem:[%s4061_s27 + $0x78] sm:$0xff] %vm2482_vm10, %v2479_v32  ;;  %v2304_v5 = vadd.f32 %v2283_v20, %v2138_v51 }
 0x43a   : > { %v2419_v27 = vpop.f32.mrf.mxu3 }
 0x43b   : > { %v2440_v3 = vadd.f32 %v2419_v27, %v2304_v5 }
 0x43d   : > { %v2462_v14 = vadd.f32 %v4054_v30, %v2440_v3 }
 0x43e   : > { %v2119_v42 = vpop.f32.mrf.mxu1 }
 0x43f   : > { %v2480_v23 = vmax.f32 %v2462_v14, 0.0  ;;  %v2139_v9 = vadd.f32 %v2119_v42, %v4044_v63 }
 0x441   : > { %2499 = vst.msk [vmem:[%s4061_s27 + $0x80] sm:$0xff] %vm2482_vm10, %v2480_v23  ;;  %v2305_v29 = vadd.f32 %v2285_v33, %v2139_v9 }
 0x442   : > { %v2421_v40 = vpop.f32.mrf.mxu3 }
 0x443   : > { %v2441_v22 = vadd.f32 %v2421_v40, %v2305_v29 }
 0x445   : > { %v2463_v62 = vadd.f32 %v4054_v30, %v2441_v22 }
 0x447   : > { %v2481_v60 = vmax.f32 %v2463_v62, 0.0 }
 0x449   : > { %2501 = vst.msk [vmem:[%s4061_s27 + $0x88] sm:$0x7f] %vm2500_vm11, %v2481_v60 }
 0x44a PF: > { %s15_s18 = sadd.s32 1, %s3061_s18  }
 0x44b   : > { %p12_p4 = scmp.ge.s32.totalorder %s15_s18, 4  }
 0x44d   :  { %14 = sbr.rel (!%p12_p4) target bundleno = 1 (0x1), region = 78 }

// kernel: net_forward.3
= control target key start
LH: loop header
LB: loop body
LE: loop exit
PB: predicated region body
PF: predicated region fallthrough
CT: control target
= control target key end

     0   :  { %s10778_s0 = inlined_call_operand.vmem [shape: f32[2,9152], index: 0, kind: input, shape index: {}]   ;;  %s10779_s1 = inlined_call_operand.vmem [shape: bf16[9152,128], index: 1, kind: input, shape index: {}]   ;;  %s10780_s2 = inlined_call_operand.vmem [shape: f32[1,128], index: 2, kind: input, shape index: {}]   ;;  %s10781_s3 = inlined_call_operand.vmem [shape: bf16[128,10], index: 3, kind: input, shape index: {}]   ;;  %s10782_s4 = inlined_call_operand.vmem [shape: f32[1,10], index: 4, kind: input, shape index: {}]   ;;  %s10783_s5 = inlined_call_operand.hbm [shape: f32[2,10], index: 5, kind: output, shape index: {}]  }
   0x1   :  { %v8254_v0 = vld [vmem:[%s10779_s1 + $0x38] sm:$0xff]  ;;  %v8253_v4 = vld [vmem:[%s10779_s1 + $0x30] sm:$0xff]  ;;  %v8252_v8 = vld [vmem:[%s10779_s1 + $0x28] sm:$0xff] }
   0x2   :  { %v8262_v1 = vld [vmem:[%s10779_s1 + $0x78] sm:$0xff]  ;;  %4877 = vmatpush.bf16.msra.mxu0 %v8254_v0  ;;  %v8261_v5 = vld [vmem:[%s10779_s1 + $0x70] sm:$0xff]  ;;  %v8260_v9 = vld [vmem:[%s10779_s1 + $0x68] sm:$0xff] }
   0x3   :  { %v8270_v2 = vld [vmem:[%s10779_s1 + $0xb8] sm:$0xff]  ;;  %4890 = vmatpush.bf16.msra.mxu1 %v8262_v1  ;;  %v8269_v6 = vld [vmem:[%s10779_s1 + $0xb0] sm:$0xff]  ;;  %v8268_v10 = vld [vmem:[%s10779_s1 + $0xa8] sm:$0xff] }
   0x4   :  { %v8278_v3 = vld [vmem:[%s10779_s1 + $0xf8] sm:$0xff]  ;;  %4903 = vmatpush.bf16.msra.mxu2 %v8270_v2  ;;  %v8277_v7 = vld [vmem:[%s10779_s1 + $0xf0] sm:$0xff]  ;;  %v8276_v11 = vld [vmem:[%s10779_s1 + $0xe8] sm:$0xff] }
   0x5   :  { %4916 = vmatpush.bf16.msra.mxu3 %v8278_v3  ;;  %v8251_v12 = vld [vmem:[%s10779_s1 + $0x20] sm:$0xff]  ;;  %v8250_v16 = vld [vmem:[%s10779_s1 + $0x18] sm:$0xff]  ;;  %v8249_v21 = vld [vmem:[%s10779_s1 + $0x10] sm:$0xff] }
   0x6   :  { %4878 = vmatpush.bf16.msra.mxu0 %v8253_v4  ;;  %v8259_v13 = vld [vmem:[%s10779_s1 + $0x60] sm:$0xff]  ;;  %v8258_v17 = vld [vmem:[%s10779_s1 + $0x58] sm:$0xff]  ;;  %v8257_v22 = vld [vmem:[%s10779_s1 + $0x50] sm:$0xff] }
   0x7   :  { %4891 = vmatpush.bf16.msra.mxu1 %v8261_v5  ;;  %v8267_v14 = vld [vmem:[%s10779_s1 + $0xa0] sm:$0xff]  ;;  %v8266_v18 = vld [vmem:[%s10779_s1 + $0x98] sm:$0xff]  ;;  %v8265_v23 = vld [vmem:[%s10779_s1 + $0x90] sm:$0xff] }
   0x8   :  { %4904 = vmatpush.bf16.msra.mxu2 %v8269_v6  ;;  %v8275_v15 = vld [vmem:[%s10779_s1 + $0xe0] sm:$0xff]  ;;  %v8274_v19 = vld [vmem:[%s10779_s1 + $0xd8] sm:$0xff]  ;;  %v8273_v24 = vld [vmem:[%s10779_s1 + $0xd0] sm:$0xff] }
   0x9   :  { %4917 = vmatpush.bf16.msra.mxu3 %v8277_v7  ;;  %v22_v20 = vld [vmem:[%s10778_s0] sm:$0xff] }
   0xa   :  { %4879 = vmatpush.bf16.msra.mxu0 %v8252_v8  ;;  %58 = vst [vmem:[#allocation1] ss:$4 sm:$0xff] %v22_v20 }
   0xb   :  { %4892 = vmatpush.bf16.msra.mxu1 %v8260_v9 }
   0xc   :  { %4905 = vmatpush.bf16.msra.mxu2 %v8268_v10 }
   0xd   :  { %4918 = vmatpush.bf16.msra.mxu3 %v8276_v11 }
   0xe   :  { %4880 = vmatpush.bf16.msra.mxu0 %v8251_v12 }
   0xf   :  { %4893 = vmatpush.bf16.msra.mxu1 %v8259_v13 }
  0x10   :  { %4906 = vmatpush.bf16.msra.mxu2 %v8267_v14 }
  0x11   :  { %4919 = vmatpush.bf16.msra.mxu3 %v8275_v15 }
  0x12   :  { %4881 = vmatpush.bf16.msra.mxu0 %v8250_v16 }
  0x13   :  { %4894 = vmatpush.bf16.msra.mxu1 %v8258_v17 }
  0x14   :  { %4907 = vmatpush.bf16.msra.mxu2 %v8266_v18 }
  0x15   :  { %4920 = vmatpush.bf16.msra.mxu3 %v8274_v19 }
  0x16   :  { %10 = vsyncpa [#allocation3], 0  ;;  %4882 = vmatpush.bf16.msra.mxu0 %v8249_v21  ;;  %v8248_v25 = vld [vmem:[%s10779_s1 + $0x8] sm:$0xff]  ;;  %v8247_v29 = vld [vmem:[%s10779_s1] sm:$0xff]  ;;  %vm4873_vm0 = vcmask 523264   ;;  %vm5896_vm1 = vcmask 74752  }
  0x17   :  { %4895 = vmatpush.bf16.msra.mxu1 %v8257_v22  ;;  %v8256_v26 = vld [vmem:[%s10779_s1 + $0x48] sm:$0xff]  ;;  %v8255_v30 = vld [vmem:[%s10779_s1 + $0x40] sm:$0xff]  ;;  %v24_v31 = vld [vmem:[%s10778_s0 + $0x10] sm:$0xff]  ;;  %s8860_s30 = smov [#allocation2]   ;;  %s5917_s7 = sshll.u32 %s10783_s5, 4  ;;  %s5918_s7 = int_to_ptr.hbm [resolvable:$true] %s5917_s7 }
  0x18   :  { %4908 = vmatpush.bf16.msra.mxu2 %v8265_v23  ;;  %v8264_v27 = vld [vmem:[%s10779_s1 + $0x88] sm:$0xff]  ;;  %v63_v32 = vld.sshfl [vmem:[#allocation1 + $0x10] sm:$0xff pattern:$0x73625140]  ;;  %v8263_v36 = vld [vmem:[%s10779_s1 + $0x80] sm:$0xff] }
  0x19   :  { %4921 = vmatpush.bf16.msra.mxu3 %v8273_v24  ;;  %v8272_v28 = vld [vmem:[%s10779_s1 + $0xc8] sm:$0xff]  ;;  %v61_v33 = vld.sshfl [vmem:[#allocation1] sm:$0xff pattern:$0x73625140]  ;;  %v8286_v37 = vld [vmem:[%s10779_s1 + $0x138] sm:$0xff]  ;;  %v223_v44 = vpack.c.bf16 %v63_v32, %v63_v32 }
  0x1a   :  { %4883 = vmatpush.bf16.msra.mxu0 %v8248_v25  ;;  %v64_v34 = vld.sshfl [vmem:[#allocation1 + $0x18] sm:$0xff pattern:$0x73625140]  ;;  %v62_v35 = vld.sshfl [vmem:[#allocation1 + $0x8] sm:$0xff pattern:$0x73625140]  ;;  %v221_v41 = vpack.c.bf16 %v61_v33, %v61_v33 }
  0x1b   :  { %4896 = vmatpush.bf16.msra.mxu1 %v8256_v26  ;;  %69 = vst [vmem:[#allocation1] ss:$4 sm:$0xff] %v24_v31  ;;  %v8294_v38 = vld [vmem:[%s10779_s1 + $0x178] sm:$0xff]  ;;  %v8271_v40 = vld [vmem:[%s10779_s1 + $0xc0] sm:$0xff]  ;;  %v23_v42 = vld [vmem:[%s10778_s0 + $0x8] sm:$0xff]  ;;  %v222_v46 = vpack.c.bf16 %v62_v35, %v62_v35  ;;  %v224_v49 = vpack.c.bf16 %v64_v34, %v64_v34 }
  0x1c   :  { %4909 = vmatpush.bf16.msra.mxu2 %v8264_v27  ;;  %v8302_v39 = vld [vmem:[%s10779_s1 + $0x1b8] sm:$0xff]  ;;  %60 = vst [vmem:[#allocation1 + $0x20] ss:$4 sm:$0xff] %v23_v42  ;;  %v8285_v45 = vld [vmem:[%s10779_s1 + $0x130] sm:$0xff]  ;;  %v8284_v51 = vld [vmem:[%s10779_s1 + $0x128] sm:$0xff] }
  0x1d   :  { %4922 = vmatpush.bf16.msra.mxu3 %v8272_v28  ;;  %v8310_v43 = vld [vmem:[%s10779_s1 + $0x1f8] sm:$0xff]  ;;  %v8293_v47 = vld [vmem:[%s10779_s1 + $0x170] sm:$0xff]  ;;  %v8292_v52 = vld [vmem:[%s10779_s1 + $0x168] sm:$0xff] }
  0x1e   :  { %4884 = vmatpush.bf16.msra.mxu0 %v8247_v29  ;;  %v8301_v48 = vld [vmem:[%s10779_s1 + $0x1b0] sm:$0xff]  ;;  %v8300_v53 = vld [vmem:[%s10779_s1 + $0x1a8] sm:$0xff]  ;;  %v8283_v58 = vld [vmem:[%s10779_s1 + $0x120] sm:$0xff] }
  0x1f   :  { %4897 = vmatpush.bf16.msra.mxu1 %v8255_v30  ;;  %v8309_v50 = vld [vmem:[%s10779_s1 + $0x1f0] sm:$0xff]  ;;  %v8308_v54 = vld [vmem:[%s10779_s1 + $0x1e8] sm:$0xff]  ;;  %v25_v59 = vld [vmem:[%s10778_s0 + $0x18] sm:$0xff] }
  0x20   :  { %4910 = vmatpush.bf16.msra.mxu2 %v8263_v36  ;;  %v8291_v61 = vld [vmem:[%s10779_s1 + $0x160] sm:$0xff]  ;;  %v8282_v0 = vld [vmem:[%s10779_s1 + $0x118] sm:$0xff]  ;;  %v8281_v4 = vld [vmem:[%s10779_s1 + $0x110] sm:$0xff] }
  0x21   :  { %4923 = vmatpush.bf16.msra.mxu3 %v8271_v40  ;;  %4885 = vmatmul.bf16.vlgmr.msra.gmra.mxu0 %v221_v41  ;;  %v8299_v62 = vld [vmem:[%s10779_s1 + $0x1a0] sm:$0xff]  ;;  %v8290_v1 = vld [vmem:[%s10779_s1 + $0x158] sm:$0xff]  ;;  %v8289_v5 = vld [vmem:[%s10779_s1 + $0x150] sm:$0xff] }
  0x22   :  { %4929 = vmatpush.bf16.msrb.mxu0 %v8286_v37  ;;  %4898 = vmatmul.bf16.vlgmr.msra.gmra.mxu1 %v222_v46  ;;  %v8307_v63 = vld [vmem:[%s10779_s1 + $0x1e0] sm:$0xff]  ;;  %v8298_v2 = vld [vmem:[%s10779_s1 + $0x198] sm:$0xff]  ;;  %v8297_v6 = vld [vmem:[%s10779_s1 + $0x190] sm:$0xff] }
  0x23   :  { %4942 = vmatpush.bf16.msrb.mxu1 %v8294_v38  ;;  %4911 = vmatmul.bf16.vlgmr.msra.gmra.mxu2 %v223_v44  ;;  %v9032_v55 = vld.sshfl [vmem:[#allocation1 + $0x30] sm:$0xff pattern:$0x73625140]  ;;  %v9034_v56 = vld.sshfl [vmem:[#allocation1 + $0x20] sm:$0xff pattern:$0x73625140] }
  0x24   :  { %4955 = vmatpush.bf16.msrb.mxu2 %v8302_v39  ;;  %4924 = vmatmul.bf16.vlgmr.msra.gmra.mxu3 %v224_v49  ;;  %v9036_v57 = vld.sshfl [vmem:[#allocation1 + $0x38] sm:$0xff pattern:$0x73625140]  ;;  %v9044_v60 = vld.sshfl [vmem:[#allocation1 + $0x28] sm:$0xff pattern:$0x73625140]  ;;  %v227_v20 = vpack.c.bf16 %v9032_v55, %v9032_v55  ;;  %v225_v23 = vpack.c.bf16 %v9034_v56, %v9034_v56 }
  0x25   :  { %4968 = vmatpush.bf16.msrb.mxu3 %v8310_v43  ;;  %70 = vst [vmem:[#allocation1 + $0x20] ss:$4 sm:$0xff] %v25_v59  ;;  %v8306_v3 = vld [vmem:[%s10779_s1 + $0x1d8] sm:$0xff]  ;;  %v8305_v7 = vld [vmem:[%s10779_s1 + $0x1d0] sm:$0xff]  ;;  %v8280_v8 = vld [vmem:[%s10779_s1 + $0x108] sm:$0xff]  ;;  %v226_v24 = vpack.c.bf16 %v9044_v60, %v9044_v60  ;;  %v228_v29 = vpack.c.bf16 %v9036_v57, %v9036_v57 }
  0x26   :  { %4930 = vmatpush.bf16.msrb.mxu0 %v8285_v45  ;;  %v8288_v9 = vld [vmem:[%s10779_s1 + $0x148] sm:$0xff]  ;;  %v8279_v12 = vld [vmem:[%s10779_s1 + $0x100] sm:$0xff]  ;;  %v8318_v15 = vld [vmem:[%s10779_s1 + $0x238] sm:$0xff] }
  0x27   :  { %4943 = vmatpush.bf16.msrb.mxu1 %v8293_v47  ;;  %v8296_v10 = vld [vmem:[%s10779_s1 + $0x188] sm:$0xff]  ;;  %v8287_v13 = vld [vmem:[%s10779_s1 + $0x140] sm:$0xff]  ;;  %v8326_v16 = vld [vmem:[%s10779_s1 + $0x278] sm:$0xff] }
  0x28   :  { %4956 = vmatpush.bf16.msrb.mxu2 %v8301_v48  ;;  %v8304_v11 = vld [vmem:[%s10779_s1 + $0x1c8] sm:$0xff]  ;;  %v8295_v14 = vld [vmem:[%s10779_s1 + $0x180] sm:$0xff]  ;;  %v8334_v17 = vld [vmem:[%s10779_s1 + $0x2b8] sm:$0xff] }
  0x29   :  { %4969 = vmatpush.bf16.msrb.mxu3 %v8309_v50  ;;  %v8303_v18 = vld [vmem:[%s10779_s1 + $0x1c0] sm:$0xff]  ;;  %v8342_v19 = vld [vmem:[%s10779_s1 + $0x2f8] sm:$0xff]  ;;  %v8317_v21 = vld [vmem:[%s10779_s1 + $0x230] sm:$0xff] }
  0x2a   :  { %4931 = vmatpush.bf16.msrb.mxu0 %v8284_v51  ;;  %v8325_v22 = vld [vmem:[%s10779_s1 + $0x270] sm:$0xff]  ;;  %v9127_v25 = vld.sshfl [vmem:[#allocation1] sm:$0xff pattern:$0x73625140]  ;;  %v8316_v33 = vld [vmem:[%s10779_s1 + $0x228] sm:$0xff] }
  0x2b   :  { %4944 = vmatpush.bf16.msrb.mxu1 %v8292_v52  ;;  %v9129_v26 = vld.sshfl [vmem:[#allocation1 + $0x10] sm:$0xff pattern:$0x73625140]  ;;  %v9131_v27 = vld.sshfl [vmem:[#allocation1 + $0x8] sm:$0xff pattern:$0x73625140]  ;;  %v229_v60 = vpack.c.bf16 %v9127_v25, %v9127_v25 }
  0x2c   :  { %4957 = vmatpush.bf16.msrb.mxu2 %v8300_v53  ;;  %v8333_v28 = vld [vmem:[%s10779_s1 + $0x2b0] sm:$0xff]  ;;  %v26_v30 = vld [vmem:[%s10778_s0 + $0x20] sm:$0xff]  ;;  %v9141_v31 = vld.sshfl [vmem:[#allocation1 + $0x18] sm:$0xff pattern:$0x73625140] }
  0x2d   :  { %4970 = vmatpush.bf16.msrb.mxu3 %v8308_v54  ;;  %v8341_v32 = vld [vmem:[%s10779_s1 + $0x2f0] sm:$0xff]  ;;  %79 = vst [vmem:[#allocation1] ss:$4 sm:$0xff] %v26_v30  ;;  %v8324_v34 = vld [vmem:[%s10779_s1 + $0x268] sm:$0xff]  ;;  %v8315_v37 = vld [vmem:[%s10779_s1 + $0x220] sm:$0xff] }
  0x2e   :  { %4932 = vmatpush.bf16.msrb.mxu0 %v8283_v58  ;;  %v8332_v35 = vld [vmem:[%s10779_s1 + $0x2a8] sm:$0xff]  ;;  %v8323_v38 = vld [vmem:[%s10779_s1 + $0x260] sm:$0xff]  ;;  %v8314_v41 = vld [vmem:[%s10779_s1 + $0x218] sm:$0xff] }
  0x2f   :  { %4945 = vmatpush.bf16.msrb.mxu1 %v8291_v61  ;;  %v8340_v36 = vld [vmem:[%s10779_s1 + $0x2e8] sm:$0xff]  ;;  %v8331_v39 = vld [vmem:[%s10779_s1 + $0x2a0] sm:$0xff]  ;;  %v8322_v42 = vld [vmem:[%s10779_s1 + $0x258] sm:$0xff]  ;;  %v231_v61 = vpack.c.bf16 %v9129_v26, %v9129_v26 }
  0x30   :  { %4958 = vmatpush.bf16.msrb.mxu2 %v8299_v62  ;;  %v8339_v40 = vld [vmem:[%s10779_s1 + $0x2e0] sm:$0xff]  ;;  %v8330_v43 = vld [vmem:[%s10779_s1 + $0x298] sm:$0xff]  ;;  %v8313_v45 = vld [vmem:[%s10779_s1 + $0x210] sm:$0xff] }
  0x31   :  { %4971 = vmatpush.bf16.msrb.mxu3 %v8307_v63  ;;  %v8338_v44 = vld [vmem:[%s10779_s1 + $0x2d8] sm:$0xff]  ;;  %v8321_v46 = vld [vmem:[%s10779_s1 + $0x250] sm:$0xff]  ;;  %v8312_v49 = vld [vmem:[%s10779_s1 + $0x208] sm:$0xff] }
  0x32   :  { %4933 = vmatpush.bf16.msrb.mxu0 %v8282_v0  ;;  %v8329_v47 = vld [vmem:[%s10779_s1 + $0x290] sm:$0xff]  ;;  %v8320_v50 = vld [vmem:[%s10779_s1 + $0x248] sm:$0xff]  ;;  %v8311_v53 = vld [vmem:[%s10779_s1 + $0x200] sm:$0xff] }
  0x33   :  { %4946 = vmatpush.bf16.msrb.mxu1 %v8290_v1  ;;  %v8337_v48 = vld [vmem:[%s10779_s1 + $0x2d0] sm:$0xff]  ;;  %v8328_v51 = vld [vmem:[%s10779_s1 + $0x288] sm:$0xff]  ;;  %v8319_v54 = vld [vmem:[%s10779_s1 + $0x240] sm:$0xff]  ;;  %v230_v1 = vpack.c.bf16 %v9131_v27, %v9131_v27 }
  0x34   :  { %4959 = vmatpush.bf16.msrb.mxu2 %v8298_v2  ;;  %v8336_v52 = vld [vmem:[%s10779_s1 + $0x2c8] sm:$0xff]  ;;  %v8327_v55 = vld [vmem:[%s10779_s1 + $0x280] sm:$0xff]  ;;  %v8350_v56 = vld [vmem:[%s10779_s1 + $0x338] sm:$0xff] }
  0x35   :  { %4972 = vmatpush.bf16.msrb.mxu3 %v8306_v3  ;;  %v8358_v57 = vld [vmem:[%s10779_s1 + $0x378] sm:$0xff]  ;;  %v8335_v59 = vld [vmem:[%s10779_s1 + $0x2c0] sm:$0xff]  ;;  %v8349_v63 = vld [vmem:[%s10779_s1 + $0x330] sm:$0xff] }
  0x36   :  { %4934 = vmatpush.bf16.msrb.mxu0 %v8281_v4  ;;  %v8366_v58 = vld [vmem:[%s10779_s1 + $0x3b8] sm:$0xff]  ;;  %v9237_v0 = vld.sshfl [vmem:[#allocation1 + $0x20] sm:$0xff pattern:$0x73625140]  ;;  %v232_v4 = vpack.c.bf16 %v9141_v31, %v9141_v31  ;;  %v8369_v25 = vld [vmem:[%s10779_s1 + $0x3d0] sm:$0xff] }
  0x37   :  { %4947 = vmatpush.bf16.msrb.mxu1 %v8289_v5  ;;  %v8374_v62 = vld [vmem:[%s10779_s1 + $0x3f8] sm:$0xff]  ;;  %v9241_v2 = vld.sshfl [vmem:[#allocation1 + $0x30] sm:$0xff pattern:$0x73625140]  ;;  %v8344_v26 = vld [vmem:[%s10779_s1 + $0x308] sm:$0xff] }
  0x38   :  { %4960 = vmatpush.bf16.msrb.mxu2 %v8297_v6  ;;  %v9243_v3 = vld.sshfl [vmem:[#allocation1 + $0x28] sm:$0xff pattern:$0x73625140]  ;;  %v8357_v5 = vld [vmem:[%s10779_s1 + $0x370] sm:$0xff]  ;;  %v8343_v30 = vld [vmem:[%s10779_s1 + $0x300] sm:$0xff] }
  0x39   :  { %4973 = vmatpush.bf16.msrb.mxu3 %v8305_v7  ;;  %v27_v6 = vld [vmem:[%s10778_s0 + $0x28] sm:$0xff]  ;;  %v9253_v7 = vld.sshfl [vmem:[#allocation1 + $0x38] sm:$0xff pattern:$0x73625140]  ;;  %v8351_v31 = vld [vmem:[%s10779_s1 + $0x340] sm:$0xff] }
  0x3a   :  { %4935 = vmatpush.bf16.msrb.mxu0 %v8280_v8  ;;  %v8365_v8 = vld [vmem:[%s10779_s1 + $0x3b0] sm:$0xff]  ;;  %80 = vst [vmem:[#allocation1 + $0x20] ss:$4 sm:$0xff] %v27_v6  ;;  %v8352_v27 = vld [vmem:[%s10779_s1 + $0x348] sm:$0xff] }
  0x3b   :  { %4948 = vmatpush.bf16.msrb.mxu1 %v8288_v9  ;;  %v8373_v9 = vld [vmem:[%s10779_s1 + $0x3f0] sm:$0xff] }
  0x3c   :  { %4961 = vmatpush.bf16.msrb.mxu2 %v8296_v10  ;;  %v8348_v10 = vld [vmem:[%s10779_s1 + $0x328] sm:$0xff]  ;;  %v83_v6 = vld.sshfl [vmem:[#allocation1 + $0x10] sm:$0xff pattern:$0x73625140] }
  0x3d   :  { %4974 = vmatpush.bf16.msrb.mxu3 %v8304_v11  ;;  %v8356_v11 = vld [vmem:[%s10779_s1 + $0x368] sm:$0xff] }
  0x3e   :  { %4936 = vmatpush.bf16.msrb.mxu0 %v8279_v12  ;;  %v8364_v12 = vld [vmem:[%s10779_s1 + $0x3a8] sm:$0xff] }
  0x3f   :  { %4949 = vmatpush.bf16.msrb.mxu1 %v8287_v13  ;;  %v8372_v13 = vld [vmem:[%s10779_s1 + $0x3e8] sm:$0xff] }
  0x40   :  { %4962 = vmatpush.bf16.msrb.mxu2 %v8295_v14  ;;  %v8347_v14 = vld [vmem:[%s10779_s1 + $0x320] sm:$0xff] }
  0x41   :  { %4975 = vmatpush.bf16.msrb.mxu3 %v8303_v18  ;;  %4937 = vmatmul.bf16.vlgmr.msrb.gmra.mxu0 %v225_v23  ;;  %v8346_v18 = vld [vmem:[%s10779_s1 + $0x318] sm:$0xff]  ;;  %v8353_v23 = vld [vmem:[%s10779_s1 + $0x350] sm:$0xff] }
  0x42   :  { %4981 = vmatpush.bf16.msra.mxu0 %v8318_v15  ;;  %4950 = vmatmul.bf16.vlgmr.msrb.gmra.mxu1 %v226_v24  ;;  %v8355_v15 = vld [vmem:[%s10779_s1 + $0x360] sm:$0xff]  ;;  %v8361_v24 = vld [vmem:[%s10779_s1 + $0x390] sm:$0xff] }
  0x43   :  { %4994 = vmatpush.bf16.msra.mxu1 %v8326_v16  ;;  %4963 = vmatmul.bf16.vlgmr.msrb.gmra.mxu2 %v227_v20  ;;  %v8363_v16 = vld [vmem:[%s10779_s1 + $0x3a0] sm:$0xff]  ;;  %v8362_v20 = vld [vmem:[%s10779_s1 + $0x398] sm:$0xff] }
  0x44   :  { %5007 = vmatpush.bf16.msra.mxu2 %v8334_v17  ;;  %4976 = vmatmul.bf16.vlgmr.msrb.gmra.mxu3 %v228_v29  ;;  %v8371_v17 = vld [vmem:[%s10779_s1 + $0x3e0] sm:$0xff]  ;;  %v8368_v29 = vld [vmem:[%s10779_s1 + $0x3c8] sm:$0xff] }
  0x45   :  { %5020 = vmatpush.bf16.msra.mxu3 %v8342_v19  ;;  %v8354_v19 = vld [vmem:[%s10779_s1 + $0x358] sm:$0xff] }
  0x46   :  { %4982 = vmatpush.bf16.msra.mxu0 %v8317_v21  ;;  %v8370_v21 = vld [vmem:[%s10779_s1 + $0x3d8] sm:$0xff] }
  0x47   :  { %4995 = vmatpush.bf16.msra.mxu1 %v8325_v22  ;;  %v8345_v22 = vld [vmem:[%s10779_s1 + $0x310] sm:$0xff] }
  0x48   :  { %5008 = vmatpush.bf16.msra.mxu2 %v8333_v28  ;;  %v8360_v28 = vld [vmem:[%s10779_s1 + $0x388] sm:$0xff] }
  0x49   :  { %5021 = vmatpush.bf16.msra.mxu3 %v8341_v32  ;;  %v8382_v32 = vld [vmem:[%s10779_s1 + $0x438] sm:$0xff] }
  0x4a   :  { %4983 = vmatpush.bf16.msra.mxu0 %v8316_v33  ;;  %v8359_v33 = vld [vmem:[%s10779_s1 + $0x380] sm:$0xff] }
  0x4b   :  { %4996 = vmatpush.bf16.msra.mxu1 %v8324_v34  ;;  %v8390_v34 = vld [vmem:[%s10779_s1 + $0x478] sm:$0xff] }
  0x4c   :  { %5009 = vmatpush.bf16.msra.mxu2 %v8332_v35  ;;  %v8398_v35 = vld [vmem:[%s10779_s1 + $0x4b8] sm:$0xff] }
  0x4d   :  { %5022 = vmatpush.bf16.msra.mxu3 %v8340_v36  ;;  %v8367_v36 = vld [vmem:[%s10779_s1 + $0x3c0] sm:$0xff] }
  0x4e   :  { %4984 = vmatpush.bf16.msra.mxu0 %v8315_v37  ;;  %v233_v37 = vpack.c.bf16 %v9237_v0, %v9237_v0  ;;  %v8392_v0 = vld [vmem:[%s10779_s1 + $0x488] sm:$0xff] }
  0x4f   :  { %4997 = vmatpush.bf16.msra.mxu1 %v8323_v38  ;;  %v8406_v38 = vld [vmem:[%s10779_s1 + $0x4f8] sm:$0xff] }
  0x50   :  { %5010 = vmatpush.bf16.msra.mxu2 %v8331_v39  ;;  %v235_v39 = vpack.c.bf16 %v9241_v2, %v9241_v2  ;;  %v8375_v2 = vld [vmem:[%s10779_s1 + $0x400] sm:$0xff] }
  0x51   :  { %5023 = vmatpush.bf16.msra.mxu3 %v8339_v40  ;;  %v234_v40 = vpack.c.bf16 %v9243_v3, %v9243_v3  ;;  %v8383_v3 = vld [vmem:[%s10779_s1 + $0x440] sm:$0xff] }
  0x52   :  { %4985 = vmatpush.bf16.msra.mxu0 %v8314_v41  ;;  %v236_v41 = vpack.c.bf16 %v9253_v7, %v9253_v7  ;;  %v8414_v7 = vld [vmem:[%s10779_s1 + $0x538] sm:$0xff] }
  0x53   :  { %4998 = vmatpush.bf16.msra.mxu1 %v8322_v42  ;;  %v8381_v42 = vld [vmem:[%s10779_s1 + $0x430] sm:$0xff] }
  0x54   :  { %5011 = vmatpush.bf16.msra.mxu2 %v8330_v43  ;;  %v8389_v43 = vld [vmem:[%s10779_s1 + $0x470] sm:$0xff] }
  0x55   :  { %5024 = vmatpush.bf16.msra.mxu3 %v8338_v44  ;;  %v8397_v44 = vld [vmem:[%s10779_s1 + $0x4b0] sm:$0xff] }
  0x56   :  { %4986 = vmatpush.bf16.msra.mxu0 %v8313_v45  ;;  %v8405_v45 = vld [vmem:[%s10779_s1 + $0x4f0] sm:$0xff] }
  0x57   :  { %4999 = vmatpush.bf16.msra.mxu1 %v8321_v46  ;;  %v8380_v46 = vld [vmem:[%s10779_s1 + $0x428] sm:$0xff] }
  0x58   :  { %5012 = vmatpush.bf16.msra.mxu2 %v8329_v47  ;;  %v8388_v47 = vld [vmem:[%s10779_s1 + $0x468] sm:$0xff] }
  0x59   :  { %5025 = vmatpush.bf16.msra.mxu3 %v8337_v48  ;;  %v8396_v48 = vld [vmem:[%s10779_s1 + $0x4a8] sm:$0xff] }
  0x5a   :  { %4987 = vmatpush.bf16.msra.mxu0 %v8312_v49  ;;  %v8404_v49 = vld [vmem:[%s10779_s1 + $0x4e8] sm:$0xff] }
  0x5b   :  { %5000 = vmatpush.bf16.msra.mxu1 %v8320_v50  ;;  %v8379_v50 = vld [vmem:[%s10779_s1 + $0x420] sm:$0xff] }
  0x5c   :  { %5013 = vmatpush.bf16.msra.mxu2 %v8328_v51  ;;  %v8387_v51 = vld [vmem:[%s10779_s1 + $0x460] sm:$0xff] }
  0x5d   :  { %5026 = vmatpush.bf16.msra.mxu3 %v8336_v52  ;;  %v8395_v52 = vld [vmem:[%s10779_s1 + $0x4a0] sm:$0xff] }
  0x5e   :  { %4988 = vmatpush.bf16.msra.mxu0 %v8311_v53  ;;  %v8403_v53 = vld [vmem:[%s10779_s1 + $0x4e0] sm:$0xff] }
  0x5f   :  { %5001 = vmatpush.bf16.msra.mxu1 %v8319_v54  ;;  %v8378_v54 = vld [vmem:[%s10779_s1 + $0x418] sm:$0xff] }
  0x60   :  { %5014 = vmatpush.bf16.msra.mxu2 %v8327_v55  ;;  %v8386_v55 = vld [vmem:[%s10779_s1 + $0x458] sm:$0xff] }
  0x61   :  { %5027 = vmatpush.bf16.msra.mxu3 %v8335_v59  ;;  %4989 = vmatmul.bf16.vlgmr.msra.gmra.mxu0 %v229_v60  ;;  %v8385_v59 = vld [vmem:[%s10779_s1 + $0x450] sm:$0xff] }
  0x62   :  { %5033 = vmatpush.bf16.msrb.mxu0 %v8350_v56  ;;  %5002 = vmatmul.bf16.vlgmr.msra.gmra.mxu1 %v230_v1  ;;  %v8394_v56 = vld [vmem:[%s10779_s1 + $0x498] sm:$0xff]  ;;  %v8393_v60 = vld [vmem:[%s10779_s1 + $0x490] sm:$0xff]  ;;  %v8400_v1 = vld [vmem:[%s10779_s1 + $0x4c8] sm:$0xff] }
  0x63   :  { %5046 = vmatpush.bf16.msrb.mxu1 %v8358_v57  ;;  %5015 = vmatmul.bf16.vlgmr.msra.gmra.mxu2 %v231_v61  ;;  %v8402_v57 = vld [vmem:[%s10779_s1 + $0x4d8] sm:$0xff]  ;;  %v8401_v61 = vld [vmem:[%s10779_s1 + $0x4d0] sm:$0xff] }
  0x64   :  { %5059 = vmatpush.bf16.msrb.mxu2 %v8366_v58  ;;  %5028 = vmatmul.bf16.vlgmr.msra.gmra.mxu3 %v232_v4  ;;  %v8377_v58 = vld [vmem:[%s10779_s1 + $0x410] sm:$0xff]  ;;  %v8391_v4 = vld [vmem:[%s10779_s1 + $0x480] sm:$0xff] }
  0x65   :  { %5072 = vmatpush.bf16.msrb.mxu3 %v8374_v62  ;;  %v8376_v62 = vld [vmem:[%s10779_s1 + $0x408] sm:$0xff] }
  0x66   :  { %5034 = vmatpush.bf16.msrb.mxu0 %v8349_v63  ;;  %v8384_v63 = vld [vmem:[%s10779_s1 + $0x448] sm:$0xff] }
  0x67   :  { %5047 = vmatpush.bf16.msrb.mxu1 %v8357_v5  ;;  %v81_v5 = vld.sshfl [vmem:[#allocation1] sm:$0xff pattern:$0x73625140] }
  0x68   :  { %5060 = vmatpush.bf16.msrb.mxu2 %v8365_v8  ;;  %v8422_v8 = vld [vmem:[%s10779_s1 + $0x578] sm:$0xff] }
  0x69   :  { %5073 = vmatpush.bf16.msrb.mxu3 %v8373_v9  ;;  %v82_v9 = vld.sshfl [vmem:[#allocation1 + $0x8] sm:$0xff pattern:$0x73625140] }
  0x6a   :  { %5035 = vmatpush.bf16.msrb.mxu0 %v8348_v10  ;;  %v8430_v10 = vld [vmem:[%s10779_s1 + $0x5b8] sm:$0xff] }
  0x6b   :  { %5048 = vmatpush.bf16.msrb.mxu1 %v8356_v11  ;;  %v8399_v11 = vld [vmem:[%s10779_s1 + $0x4c0] sm:$0xff] }
  0x6c   :  { %5061 = vmatpush.bf16.msrb.mxu2 %v8364_v12  ;;  %v84_v12 = vld.sshfl [vmem:[#allocation1 + $0x18] sm:$0xff pattern:$0x73625140] }
  0x6d   :  { %5074 = vmatpush.bf16.msrb.mxu3 %v8372_v13  ;;  %v237_v13 = vpack.c.bf16 %v81_v5, %v81_v5  ;;  %v8470_v5 = vld [vmem:[%s10779_s1 + $0x6f8] sm:$0xff] }
  0x6e   :  { %5036 = vmatpush.bf16.msrb.mxu0 %v8347_v14  ;;  %v239_v14 = vpack.c.bf16 %v83_v6, %v83_v6 }
  0x6f   :  { %5049 = vmatpush.bf16.msrb.mxu1 %v8355_v15  ;;  %v8438_v15 = vld [vmem:[%s10779_s1 + $0x5f8] sm:$0xff] }
  0x70   :  { %5062 = vmatpush.bf16.msrb.mxu2 %v8363_v16  ;;  %v238_v16 = vpack.c.bf16 %v82_v9, %v82_v9  ;;  %v8453_v9 = vld [vmem:[%s10779_s1 + $0x670] sm:$0xff] }
  0x71   :  { %5075 = vmatpush.bf16.msrb.mxu3 %v8371_v17  ;;  %v240_v17 = vpack.c.bf16 %v84_v12, %v84_v12  ;;  %v8444_v12 = vld [vmem:[%s10779_s1 + $0x628] sm:$0xff] }
  0x72   :  { %5037 = vmatpush.bf16.msrb.mxu0 %v8346_v18  ;;  %v8413_v18 = vld [vmem:[%s10779_s1 + $0x530] sm:$0xff] }
  0x73   :  { %5050 = vmatpush.bf16.msrb.mxu1 %v8354_v19  ;;  %v8421_v19 = vld [vmem:[%s10779_s1 + $0x570] sm:$0xff] }
  0x74   :  { %5063 = vmatpush.bf16.msrb.mxu2 %v8362_v20  ;;  %v8429_v20 = vld [vmem:[%s10779_s1 + $0x5b0] sm:$0xff] }
  0x75   :  { %5076 = vmatpush.bf16.msrb.mxu3 %v8370_v21  ;;  %v8437_v21 = vld [vmem:[%s10779_s1 + $0x5f0] sm:$0xff] }
  0x76   :  { %5038 = vmatpush.bf16.msrb.mxu0 %v8345_v22  ;;  %v8412_v22 = vld [vmem:[%s10779_s1 + $0x528] sm:$0xff] }
  0x77   :  { %5051 = vmatpush.bf16.msrb.mxu1 %v8353_v23  ;;  %v8420_v23 = vld [vmem:[%s10779_s1 + $0x568] sm:$0xff] }
  0x78   :  { %5064 = vmatpush.bf16.msrb.mxu2 %v8361_v24  ;;  %v8428_v24 = vld [vmem:[%s10779_s1 + $0x5a8] sm:$0xff] }
  0x79   :  { %5077 = vmatpush.bf16.msrb.mxu3 %v8369_v25  ;;  %v8828_v25 = vld [vmem:[%s10780_s2] ss:$0 sm:$0xff] }
  0x7a   :  { %5039 = vmatpush.bf16.msrb.mxu0 %v8344_v26  ;;  %v8436_v26 = vld [vmem:[%s10779_s1 + $0x5e8] sm:$0xff] }
  0x7b   :  { %5052 = vmatpush.bf16.msrb.mxu1 %v8352_v27  ;;  %v8411_v27 = vld [vmem:[%s10779_s1 + $0x520] sm:$0xff] }
  0x7c   :  { %5065 = vmatpush.bf16.msrb.mxu2 %v8360_v28 }
  0x7d   :  { %5078 = vmatpush.bf16.msrb.mxu3 %v8368_v29  ;;  %v8419_v29 = vld [vmem:[%s10779_s1 + $0x560] sm:$0xff] }
  0x7e   :  { %5040 = vmatpush.bf16.msrb.mxu0 %v8343_v30  ;;  %v8427_v30 = vld [vmem:[%s10779_s1 + $0x5a0] sm:$0xff] }
  0x7f   :  { %5053 = vmatpush.bf16.msrb.mxu1 %v8351_v31 }
  0x80   :  { %5066 = vmatpush.bf16.msrb.mxu2 %v8359_v33  ;;  %v8435_v33 = vld [vmem:[%s10779_s1 + $0x5e0] sm:$0xff] }
  0x81   :  { %5079 = vmatpush.bf16.msrb.mxu3 %v8367_v36  ;;  %5041 = vmatmul.bf16.vlgmr.msrb.gmra.mxu0 %v233_v37  ;;  %v8418_v36 = vld [vmem:[%s10779_s1 + $0x558] sm:$0xff] }
  0x82   :  { %5085 = vmatpush.bf16.msra.mxu0 %v8382_v32  ;;  %5054 = vmatmul.bf16.vlgmr.msrb.gmra.mxu1 %v234_v40  ;;  %v8426_v37 = vld [vmem:[%s10779_s1 + $0x598] sm:$0xff]  ;;  %v8409_v40 = vld [vmem:[%s10779_s1 + $0x510] sm:$0xff] }
  0x83   :  { %5098 = vmatpush.bf16.msra.mxu1 %v8390_v34  ;;  %5067 = vmatmul.bf16.vlgmr.msrb.gmra.mxu2 %v235_v39 }
  0x84   :  { %5111 = vmatpush.bf16.msra.mxu2 %v8398_v35  ;;  %5080 = vmatmul.bf16.vlgmr.msrb.gmra.mxu3 %v236_v41  ;;  %v8410_v35 = vld [vmem:[%s10779_s1 + $0x518] sm:$0xff] }
  0x85   :  { %5124 = vmatpush.bf16.msra.mxu3 %v8406_v38  ;;  %v8434_v38 = vld [vmem:[%s10779_s1 + $0x5d8] sm:$0xff] }
  0x86   :  { %5086 = vmatpush.bf16.msra.mxu0 %v8381_v42 }
  0x87   :  { %5099 = vmatpush.bf16.msra.mxu1 %v8389_v43  ;;  %v8417_v43 = vld [vmem:[%s10779_s1 + $0x550] sm:$0xff] }
  0x88   :  { %5112 = vmatpush.bf16.msra.mxu2 %v8397_v44  ;;  %v8425_v44 = vld [vmem:[%s10779_s1 + $0x590] sm:$0xff] }
  0x89   :  { %5125 = vmatpush.bf16.msra.mxu3 %v8405_v45 }
  0x8a   :  { %5087 = vmatpush.bf16.msra.mxu0 %v8380_v46 }
  0x8b   :  { %5100 = vmatpush.bf16.msra.mxu1 %v8388_v47  ;;  %v8433_v47 = vld [vmem:[%s10779_s1 + $0x5d0] sm:$0xff] }
  0x8c   :  { %5113 = vmatpush.bf16.msra.mxu2 %v8396_v48 }
  0x8d   :  { %5126 = vmatpush.bf16.msra.mxu3 %v8404_v49  ;;  %v8408_v49 = vld [vmem:[%s10779_s1 + $0x508] sm:$0xff] }
  0x8e   :  { %5088 = vmatpush.bf16.msra.mxu0 %v8379_v50  ;;  %v28_v50 = vld [vmem:[%s10778_s0 + $0x30] sm:$0xff] }
  0x8f   :  { %5101 = vmatpush.bf16.msra.mxu1 %v8387_v51  ;;  %v8416_v51 = vld [vmem:[%s10779_s1 + $0x548] sm:$0xff]  ;;  %89 = vst [vmem:[#allocation1] ss:$4 sm:$0xff] %v28_v50  ;;  %v8478_v50 = vld [vmem:[%s10779_s1 + $0x738] sm:$0xff] }
  0x90   :  { %5114 = vmatpush.bf16.msra.mxu2 %v8395_v52  ;;  %v8424_v52 = vld [vmem:[%s10779_s1 + $0x588] sm:$0xff] }
  0x91   :  { %5127 = vmatpush.bf16.msra.mxu3 %v8403_v53  ;;  %v8432_v53 = vld [vmem:[%s10779_s1 + $0x5c8] sm:$0xff] }
  0x92   :  { %5089 = vmatpush.bf16.msra.mxu0 %v8378_v54 }
  0x93   :  { %5102 = vmatpush.bf16.msra.mxu1 %v8386_v55  ;;  %v8407_v55 = vld [vmem:[%s10779_s1 + $0x500] sm:$0xff] }
  0x94   :  { %5115 = vmatpush.bf16.msra.mxu2 %v8394_v56  ;;  %v8415_v56 = vld [vmem:[%s10779_s1 + $0x540] sm:$0xff] }
  0x95   :  { %5128 = vmatpush.bf16.msra.mxu3 %v8402_v57  ;;  %v8423_v57 = vld [vmem:[%s10779_s1 + $0x580] sm:$0xff] }
  0x96   :  { %5090 = vmatpush.bf16.msra.mxu0 %v8377_v58  ;;  %v85_v58 = vld.sshfl [vmem:[#allocation1 + $0x20] sm:$0xff pattern:$0x73625140] }
  0x97   :  { %5103 = vmatpush.bf16.msra.mxu1 %v8385_v59  ;;  %v87_v59 = vld.sshfl [vmem:[#allocation1 + $0x30] sm:$0xff pattern:$0x73625140] }
  0x98   :  { %5116 = vmatpush.bf16.msra.mxu2 %v8393_v60  ;;  %v8446_v60 = vld [vmem:[%s10779_s1 + $0x638] sm:$0xff] }
  0x99   :  { %5129 = vmatpush.bf16.msra.mxu3 %v8401_v61  ;;  %v8454_v61 = vld [vmem:[%s10779_s1 + $0x678] sm:$0xff] }
  0x9a   :  { %5091 = vmatpush.bf16.msra.mxu0 %v8376_v62  ;;  %v86_v62 = vld.sshfl [vmem:[#allocation1 + $0x28] sm:$0xff pattern:$0x73625140] }
  0x9b   :  { %5104 = vmatpush.bf16.msra.mxu1 %v8384_v63  ;;  %v242_v6 = vpack.c.bf16 %v86_v62, %v86_v62  ;;  %v8485_v62 = vld [vmem:[%s10779_s1 + $0x770] sm:$0xff] }
  0x9c   :  { %5117 = vmatpush.bf16.msra.mxu2 %v8392_v0  ;;  %v8462_v0 = vld [vmem:[%s10779_s1 + $0x6b8] sm:$0xff] }
  0x9d   :  { %5130 = vmatpush.bf16.msra.mxu3 %v8400_v1  ;;  %v8431_v1 = vld [vmem:[%s10779_s1 + $0x5c0] sm:$0xff] }
  0x9e   :  { %5092 = vmatpush.bf16.msra.mxu0 %v8375_v2  ;;  %v4886_v28 = vpop.f32.mrf.mxu0  ;;  %v88_v2 = vld.sshfl [vmem:[#allocation1 + $0x38] sm:$0xff pattern:$0x73625140] }
  0x9f   :  { %5105 = vmatpush.bf16.msra.mxu1 %v8383_v3  ;;  %v4887_v31 = vadd.f32 %v8828_v25, %v4886_v28  ;;  %v4899_v32 = vpop.f32.mrf.mxu1  ;;  %v241_v3 = vpack.c.bf16 %v85_v58, %v85_v58  ;;  %v8450_v25 = vld [vmem:[%s10779_s1 + $0x658] sm:$0xff] }
  0xa0   :  { %5118 = vmatpush.bf16.msra.mxu2 %v8391_v4  ;;  %v243_v4 = vpack.c.bf16 %v87_v59, %v87_v59  ;;  %v8466_v28 = vld [vmem:[%s10779_s1 + $0x6d8] sm:$0xff] }
  0xa1   :  { %5131 = vmatpush.bf16.msra.mxu3 %v8399_v11  ;;  %5093 = vmatmul.bf16.vlgmr.msra.gmra.mxu0 %v237_v13  ;;  %v4900_v34 = vadd.f32 %v4899_v32, %v4887_v31  ;;  %v8469_v11 = vld [vmem:[%s10779_s1 + $0x6f0] sm:$0xff]  ;;  %v8452_v13 = vld [vmem:[%s10779_s1 + $0x668] sm:$0xff]  ;;  %v8502_v58 = vld [vmem:[%s10779_s1 + $0x7f8] sm:$0xff] }
  0xa2   :  { %5137 = vmatpush.bf16.msrb.mxu0 %v8414_v7  ;;  %5106 = vmatmul.bf16.vlgmr.msra.gmra.mxu1 %v238_v16  ;;  %v244_v7 = vpack.c.bf16 %v88_v2, %v88_v2  ;;  %v8443_v16 = vld [vmem:[%s10779_s1 + $0x620] sm:$0xff]  ;;  %v8449_v31 = vld [vmem:[%s10779_s1 + $0x650] sm:$0xff]  ;;  %v8484_v2 = vld [vmem:[%s10779_s1 + $0x768] sm:$0xff] }
  0xa3   :  { %5150 = vmatpush.bf16.msrb.mxu1 %v8422_v8  ;;  %5119 = vmatmul.bf16.vlgmr.msra.gmra.mxu2 %v239_v14  ;;  %v8445_v8 = vld [vmem:[%s10779_s1 + $0x630] sm:$0xff]  ;;  %v8460_v14 = vld [vmem:[%s10779_s1 + $0x6a8] sm:$0xff] }
  0xa4   :  { %5163 = vmatpush.bf16.msrb.mxu2 %v8430_v10  ;;  %5132 = vmatmul.bf16.vlgmr.msra.gmra.mxu3 %v240_v17  ;;  %v8461_v10 = vld [vmem:[%s10779_s1 + $0x6b0] sm:$0xff]  ;;  %v8451_v17 = vld [vmem:[%s10779_s1 + $0x660] sm:$0xff] }
  0xa5   :  { %5176 = vmatpush.bf16.msrb.mxu3 %v8438_v15  ;;  %v8468_v15 = vld [vmem:[%s10779_s1 + $0x6e8] sm:$0xff]  ;;  %v8457_v32 = vld [vmem:[%s10779_s1 + $0x690] sm:$0xff] }
  0xa6   :  { %5138 = vmatpush.bf16.msrb.mxu0 %v8413_v18  ;;  %v4912_v39 = vpop.f32.mrf.mxu2  ;;  %v4888_v42 = vpop.f32.mrf.mxu0  ;;  %v8459_v18 = vld [vmem:[%s10779_s1 + $0x6a0] sm:$0xff] }
  0xa7   :  { %5151 = vmatpush.bf16.msrb.mxu1 %v8421_v19  ;;  %v4913_v41 = vadd.f32 %v4912_v39, %v4900_v34  ;;  %v4925_v45 = vpop.f32.mrf.mxu3  ;;  %v4901_v46 = vpop.f32.mrf.mxu1  ;;  %v29_v39 = vld [vmem:[%s10778_s0 + $0x38] sm:$0xff] }
  0xa8   :  { %5164 = vmatpush.bf16.msrb.mxu2 %v8429_v20  ;;  %90 = vst [vmem:[#allocation1 + $0x20] ss:$4 sm:$0xff] %v29_v39  ;;  %v8455_v46 = vld [vmem:[%s10779_s1 + $0x680] sm:$0xff]  ;;  %v8510_v39 = vld [vmem:[%s10779_s1 + $0x838] sm:$0xff] }
  0xa9   :  { %5177 = vmatpush.bf16.msrb.mxu3 %v8437_v21  ;;  %v9512_v48 = vadd.f32 %v4925_v45, %v4913_v41  ;;  %v8456_v41 = vld [vmem:[%s10779_s1 + $0x688] sm:$0xff]  ;;  %v8447_v45 = vld [vmem:[%s10779_s1 + $0x640] sm:$0xff] }
  0xaa   :  { %5139 = vmatpush.bf16.msrb.mxu0 %v8412_v22  ;;  %v8467_v22 = vld [vmem:[%s10779_s1 + $0x6e0] sm:$0xff] }
  0xab   :  { %5152 = vmatpush.bf16.msrb.mxu1 %v8420_v23  ;;  %v8442_v23 = vld [vmem:[%s10779_s1 + $0x618] sm:$0xff] }
  0xac   :  { %5165 = vmatpush.bf16.msrb.mxu2 %v8428_v24 }
  0xad   :  { %5178 = vmatpush.bf16.msrb.mxu3 %v8436_v26  ;;  %v8458_v26 = vld [vmem:[%s10779_s1 + $0x698] sm:$0xff] }
  0xae   :  { %5140 = vmatpush.bf16.msrb.mxu0 %v8411_v27  ;;  %v4914_v54 = vpop.f32.mrf.mxu2 }
  0xaf   :  { %5153 = vmatpush.bf16.msrb.mxu1 %v8419_v29  ;;  %v4927_v63 = vpop.f32.mrf.mxu3  ;;  %v8463_v54 = vld [vmem:[%s10779_s1 + $0x6c0] sm:$0xff] }
  0xb0   :  { %5166 = vmatpush.bf16.msrb.mxu2 %v8427_v30  ;;  %v8441_v30 = vld [vmem:[%s10779_s1 + $0x610] sm:$0xff] }
  0xb1   :  { %5179 = vmatpush.bf16.msrb.mxu3 %v8435_v33  ;;  %v8493_v63 = vld [vmem:[%s10779_s1 + $0x7b0] sm:$0xff] }
  0xb2   :  { %5141 = vmatpush.bf16.msrb.mxu0 %v8410_v35 }
  0xb3   :  { %5154 = vmatpush.bf16.msrb.mxu1 %v8418_v36 }
  0xb4   :  { %5167 = vmatpush.bf16.msrb.mxu2 %v8426_v37  ;;  %v8465_v37 = vld [vmem:[%s10779_s1 + $0x6d0] sm:$0xff] }
  0xb5   :  { %5180 = vmatpush.bf16.msrb.mxu3 %v8434_v38  ;;  %v8440_v38 = vld [vmem:[%s10779_s1 + $0x608] sm:$0xff] }
  0xb6   :  { %5142 = vmatpush.bf16.msrb.mxu0 %v8409_v40  ;;  %v8448_v40 = vld [vmem:[%s10779_s1 + $0x648] sm:$0xff] }
  0xb7   :  { %5155 = vmatpush.bf16.msrb.mxu1 %v8417_v43  ;;  %v8464_v43 = vld [vmem:[%s10779_s1 + $0x6c8] sm:$0xff] }
  0xb8   :  { %5168 = vmatpush.bf16.msrb.mxu2 %v8425_v44  ;;  %v8439_v44 = vld [vmem:[%s10779_s1 + $0x600] sm:$0xff] }
  0xb9   :  { %5181 = vmatpush.bf16.msrb.mxu3 %v8433_v47  ;;  %v91_v47 = vld.sshfl [vmem:[#allocation1] sm:$0xff pattern:$0x73625140] }
  0xba   :  { %5143 = vmatpush.bf16.msrb.mxu0 %v8408_v49 }
  0xbb   :  { %5156 = vmatpush.bf16.msrb.mxu1 %v8416_v51  ;;  %v8486_v51 = vld [vmem:[%s10779_s1 + $0x778] sm:$0xff] }
  0xbc   :  { %5169 = vmatpush.bf16.msrb.mxu2 %v8424_v52  ;;  %v92_v52 = vld.sshfl [vmem:[#allocation1 + $0x8] sm:$0xff pattern:$0x73625140] }
  0xbd   :  { %5182 = vmatpush.bf16.msrb.mxu3 %v8432_v53  ;;  %v8494_v53 = vld [vmem:[%s10779_s1 + $0x7b8] sm:$0xff]  ;;  %v246_v59 = vpack.c.bf16 %v92_v52, %v92_v52  ;;  %v8525_v52 = vld [vmem:[%s10779_s1 + $0x8b0] sm:$0xff] }
  0xbe   :  { %5144 = vmatpush.bf16.msrb.mxu0 %v8407_v55  ;;  %v4938_v19 = vpop.f32.mrf.mxu0  ;;  %v94_v55 = vld.sshfl [vmem:[#allocation1 + $0x18] sm:$0xff pattern:$0x73625140] }
  0xbf   :  { %5157 = vmatpush.bf16.msrb.mxu1 %v8415_v56  ;;  %v4951_v20 = vpop.f32.mrf.mxu1  ;;  %v4939_v21 = vadd.f32 %v4938_v19, %v9512_v48  ;;  %v93_v48 = vld.sshfl [vmem:[#allocation1 + $0x10] sm:$0xff pattern:$0x73625140]  ;;  %v245_v56 = vpack.c.bf16 %v91_v47, %v91_v47  ;;  %v8534_v47 = vld [vmem:[%s10779_s1 + $0x8f8] sm:$0xff] }
  0xc0   :  { %5170 = vmatpush.bf16.msrb.mxu2 %v8423_v57  ;;  %v247_v57 = vpack.c.bf16 %v93_v48, %v93_v48 }
  0xc1   :  { %5183 = vmatpush.bf16.msrb.mxu3 %v8431_v1  ;;  %5145 = vmatmul.bf16.vlgmr.msrb.gmra.mxu0 %v241_v3  ;;  %v4952_v24 = vadd.f32 %v4951_v20, %v4939_v21  ;;  %v8476_v1 = vld [vmem:[%s10779_s1 + $0x728] sm:$0xff]  ;;  %v8473_v21 = vld [vmem:[%s10779_s1 + $0x710] sm:$0xff] }
  0xc2   :  { %5189 = vmatpush.bf16.msra.mxu0 %v8446_v60  ;;  %5158 = vmatmul.bf16.vlgmr.msrb.gmra.mxu1 %v242_v6  ;;  %v248_v60 = vpack.c.bf16 %v94_v55, %v94_v55  ;;  %v8492_v3 = vld [vmem:[%s10779_s1 + $0x7a8] sm:$0xff] }
  0xc3   :  { %5202 = vmatpush.bf16.msra.mxu1 %v8454_v61  ;;  %5171 = vmatmul.bf16.vlgmr.msrb.gmra.mxu2 %v243_v4  ;;  %v8477_v61 = vld [vmem:[%s10779_s1 + $0x730] sm:$0xff]  ;;  %v8500_v4 = vld [vmem:[%s10779_s1 + $0x7e8] sm:$0xff] }
  0xc4   :  { %5215 = vmatpush.bf16.msra.mxu2 %v8462_v0  ;;  %5184 = vmatmul.bf16.vlgmr.msrb.gmra.mxu3 %v244_v7  ;;  %v8501_v0 = vld [vmem:[%s10779_s1 + $0x7f0] sm:$0xff]  ;;  %v8475_v7 = vld [vmem:[%s10779_s1 + $0x720] sm:$0xff]  ;;  %v8516_v55 = vld [vmem:[%s10779_s1 + $0x868] sm:$0xff] }
  0xc5   :  { %5228 = vmatpush.bf16.msra.mxu3 %v8470_v5 }
  0xc6   :  { %5190 = vmatpush.bf16.msra.mxu0 %v8445_v8  ;;  %v4964_v27 = vpop.f32.mrf.mxu2  ;;  %v4940_v34 = vpop.f32.mrf.mxu0  ;;  %v8483_v8 = vld [vmem:[%s10779_s1 + $0x760] sm:$0xff] }
  0xc7   :  { %5203 = vmatpush.bf16.msra.mxu1 %v8453_v9  ;;  %v4965_v29 = vadd.f32 %v4964_v27, %v4952_v24  ;;  %v4977_v33 = vpop.f32.mrf.mxu3  ;;  %v4953_v36 = vpop.f32.mrf.mxu1  ;;  %v8491_v9 = vld [vmem:[%s10779_s1 + $0x7a0] sm:$0xff]  ;;  %v8489_v24 = vld [vmem:[%s10779_s1 + $0x790] sm:$0xff]  ;;  %v8472_v27 = vld [vmem:[%s10779_s1 + $0x708] sm:$0xff] }
  0xc8   :  { %5216 = vmatpush.bf16.msra.mxu2 %v8461_v10  ;;  %v8479_v34 = vld [vmem:[%s10779_s1 + $0x740] sm:$0xff] }
  0xc9   :  { %5229 = vmatpush.bf16.msra.mxu3 %v8469_v11  ;;  %v4978_v35 = vadd.f32 %v4977_v33, %v4965_v29  ;;  %v8480_v29 = vld [vmem:[%s10779_s1 + $0x748] sm:$0xff]  ;;  %v8471_v33 = vld [vmem:[%s10779_s1 + $0x700] sm:$0xff] }
  0xca   :  { %5191 = vmatpush.bf16.msra.mxu0 %v8444_v12  ;;  %v8499_v12 = vld [vmem:[%s10779_s1 + $0x7e0] sm:$0xff] }
  0xcb   :  { %5204 = vmatpush.bf16.msra.mxu1 %v8452_v13  ;;  %v8474_v13 = vld [vmem:[%s10779_s1 + $0x718] sm:$0xff] }
  0xcc   :  { %5217 = vmatpush.bf16.msra.mxu2 %v8460_v14  ;;  %v8482_v14 = vld [vmem:[%s10779_s1 + $0x758] sm:$0xff] }
  0xcd   :  { %5230 = vmatpush.bf16.msra.mxu3 %v8468_v15  ;;  %v8490_v15 = vld [vmem:[%s10779_s1 + $0x798] sm:$0xff] }
  0xce   :  { %5192 = vmatpush.bf16.msra.mxu0 %v8443_v16  ;;  %v4966_v42 = vpop.f32.mrf.mxu2 }
  0xcf   :  { %5205 = vmatpush.bf16.msra.mxu1 %v8451_v17  ;;  %v4979_v49 = vpop.f32.mrf.mxu3  ;;  %v8526_v42 = vld [vmem:[%s10779_s1 + $0x8b8] sm:$0xff] }
  0xd0   :  { %5218 = vmatpush.bf16.msra.mxu2 %v8459_v18  ;;  %v8498_v18 = vld [vmem:[%s10779_s1 + $0x7d8] sm:$0xff] }
  0xd1   :  { %5231 = vmatpush.bf16.msra.mxu3 %v8467_v22 }
  0xd2   :  { %5193 = vmatpush.bf16.msra.mxu0 %v8442_v23  ;;  %v8481_v23 = vld [vmem:[%s10779_s1 + $0x750] sm:$0xff] }
  0xd3   :  { %5206 = vmatpush.bf16.msra.mxu1 %v8450_v25 }
  0xd4   :  { %5219 = vmatpush.bf16.msra.mxu2 %v8458_v26  ;;  %v8497_v26 = vld [vmem:[%s10779_s1 + $0x7d0] sm:$0xff] }
  0xd5   :  { %5232 = vmatpush.bf16.msra.mxu3 %v8466_v28  ;;  %v30_v28 = vld [vmem:[%s10778_s0 + $0x40] sm:$0xff] }
  0xd6   :  { %5194 = vmatpush.bf16.msra.mxu0 %v8441_v30  ;;  %v8488_v30 = vld [vmem:[%s10779_s1 + $0x788] sm:$0xff]  ;;  %99 = vst [vmem:[#allocation1] ss:$4 sm:$0xff] %v30_v28  ;;  %v8542_v28 = vld [vmem:[%s10779_s1 + $0x938] sm:$0xff] }
  0xd7   :  { %5207 = vmatpush.bf16.msra.mxu1 %v8449_v31 }
  0xd8   :  { %5220 = vmatpush.bf16.msra.mxu2 %v8457_v32  ;;  %v8496_v32 = vld [vmem:[%s10779_s1 + $0x7c8] sm:$0xff] }
  0xd9   :  { %5233 = vmatpush.bf16.msra.mxu3 %v8465_v37  ;;  %v95_v37 = vld.sshfl [vmem:[#allocation1 + $0x20] sm:$0xff pattern:$0x73625140] }
  0xda   :  { %5195 = vmatpush.bf16.msra.mxu0 %v8440_v38  ;;  %v97_v38 = vld.sshfl [vmem:[#allocation1 + $0x30] sm:$0xff pattern:$0x73625140] }
  0xdb   :  { %5208 = vmatpush.bf16.msra.mxu1 %v8448_v40  ;;  %v8518_v40 = vld [vmem:[%s10779_s1 + $0x878] sm:$0xff] }
  0xdc   :  { %5221 = vmatpush.bf16.msra.mxu2 %v8456_v41  ;;  %v96_v41 = vld.sshfl [vmem:[#allocation1 + $0x28] sm:$0xff pattern:$0x73625140] }
  0xdd   :  { %5234 = vmatpush.bf16.msra.mxu3 %v8464_v43  ;;  %v8495_v43 = vld [vmem:[%s10779_s1 + $0x7c0] sm:$0xff]  ;;  %v250_v48 = vpack.c.bf16 %v96_v41, %v96_v41  ;;  %v8557_v41 = vld [vmem:[%s10779_s1 + $0x9b0] sm:$0xff] }
  0xde   :  { %5196 = vmatpush.bf16.msra.mxu0 %v8439_v44  ;;  %v4990_v5 = vpop.f32.mrf.mxu0  ;;  %v98_v44 = vld.sshfl [vmem:[#allocation1 + $0x38] sm:$0xff pattern:$0x73625140] }
  0xdf   :  { %5209 = vmatpush.bf16.msra.mxu1 %v8447_v45  ;;  %v4991_v6 = vadd.f32 %v4990_v5, %v4978_v35  ;;  %v5003_v10 = vpop.f32.mrf.mxu1  ;;  %v8487_v35 = vld [vmem:[%s10779_s1 + $0x780] sm:$0xff]  ;;  %v249_v45 = vpack.c.bf16 %v95_v37, %v95_v37  ;;  %v252_v49 = vpack.c.bf16 %v98_v44, %v98_v44  ;;  %v8548_v44 = vld [vmem:[%s10779_s1 + $0x968] sm:$0xff] }
  0xe0   :  { %5222 = vmatpush.bf16.msra.mxu2 %v8455_v46  ;;  %v251_v46 = vpack.c.bf16 %v97_v38, %v97_v38 }
  0xe1   :  { %5235 = vmatpush.bf16.msra.mxu3 %v8463_v54  ;;  %5197 = vmatmul.bf16.vlgmr.msra.gmra.mxu0 %v245_v56  ;;  %v5004_v11 = vadd.f32 %v5003_v10, %v4991_v6  ;;  %v8508_v54 = vld [vmem:[%s10779_s1 + $0x828] sm:$0xff]  ;;  %v8505_v10 = vld [vmem:[%s10779_s1 + $0x810] sm:$0xff] }
  0xe2   :  { %5241 = vmatpush.bf16.msrb.mxu0 %v8478_v50  ;;  %5210 = vmatmul.bf16.vlgmr.msra.gmra.mxu1 %v246_v59  ;;  %v8509_v50 = vld [vmem:[%s10779_s1 + $0x830] sm:$0xff]  ;;  %v8524_v56 = vld [vmem:[%s10779_s1 + $0x8a8] sm:$0xff] }
  0xe3   :  { %5254 = vmatpush.bf16.msrb.mxu1 %v8486_v51  ;;  %5223 = vmatmul.bf16.vlgmr.msra.gmra.mxu2 %v247_v57  ;;  %v8517_v51 = vld [vmem:[%s10779_s1 + $0x870] sm:$0xff]  ;;  %v8532_v57 = vld [vmem:[%s10779_s1 + $0x8e8] sm:$0xff] }
  0xe4   :  { %5267 = vmatpush.bf16.msrb.mxu2 %v8494_v53  ;;  %5236 = vmatmul.bf16.vlgmr.msra.gmra.mxu3 %v248_v60  ;;  %v8533_v53 = vld [vmem:[%s10779_s1 + $0x8f0] sm:$0xff]  ;;  %v8507_v60 = vld [vmem:[%s10779_s1 + $0x820] sm:$0xff] }
  0xe5   :  { %5280 = vmatpush.bf16.msrb.mxu3 %v8502_v58 }
  0xe6   :  { %5242 = vmatpush.bf16.msrb.mxu0 %v8477_v61  ;;  %v5016_v16 = vpop.f32.mrf.mxu2  ;;  %v4992_v19 = vpop.f32.mrf.mxu0 }
  0xe7   :  { %5255 = vmatpush.bf16.msrb.mxu1 %v8485_v62  ;;  %v5017_v17 = vadd.f32 %v5016_v16, %v5004_v11  ;;  %v5029_v20 = vpop.f32.mrf.mxu3  ;;  %v5005_v25 = vpop.f32.mrf.mxu1  ;;  %v8515_v62 = vld [vmem:[%s10779_s1 + $0x860] sm:$0xff]  ;;  %v8504_v16 = vld [vmem:[%s10779_s1 + $0x808] sm:$0xff] }
  0xe8   :  { %5268 = vmatpush.bf16.msrb.mxu2 %v8493_v63  ;;  %v8523_v63 = vld [vmem:[%s10779_s1 + $0x8a0] sm:$0xff]  ;;  %v8520_v19 = vld [vmem:[%s10779_s1 + $0x888] sm:$0xff] }
  0xe9   :  { %5281 = vmatpush.bf16.msrb.mxu3 %v8501_v0  ;;  %v9704_v22 = vadd.f32 %v5029_v20, %v5017_v17  ;;  %v31_v17 = vld [vmem:[%s10778_s0 + $0x48] sm:$0xff]  ;;  %v8519_v25 = vld [vmem:[%s10779_s1 + $0x880] sm:$0xff] }
  0xea   :  { %5243 = vmatpush.bf16.msrb.mxu0 %v8476_v1  ;;  %v8531_v1 = vld [vmem:[%s10779_s1 + $0x8e0] sm:$0xff]  ;;  %100 = vst [vmem:[#allocation1 + $0x20] ss:$4 sm:$0xff] %v31_v17  ;;  %v8574_v17 = vld [vmem:[%s10779_s1 + $0xa38] sm:$0xff] }
  0xeb   :  { %5256 = vmatpush.bf16.msrb.mxu1 %v8484_v2  ;;  %v8506_v2 = vld [vmem:[%s10779_s1 + $0x818] sm:$0xff] }
  0xec   :  { %5269 = vmatpush.bf16.msrb.mxu2 %v8492_v3  ;;  %v8514_v3 = vld [vmem:[%s10779_s1 + $0x858] sm:$0xff] }
  0xed   :  { %5282 = vmatpush.bf16.msrb.mxu3 %v8500_v4  ;;  %v8522_v4 = vld [vmem:[%s10779_s1 + $0x898] sm:$0xff] }
  0xee   :  { %5244 = vmatpush.bf16.msrb.mxu0 %v8475_v7  ;;  %v5018_v31 = vpop.f32.mrf.mxu2  ;;  %v8530_v7 = vld [vmem:[%s10779_s1 + $0x8d8] sm:$0xff] }
  0xef   :  { %5257 = vmatpush.bf16.msrb.mxu1 %v8483_v8  ;;  %v5031_v36 = vpop.f32.mrf.mxu3  ;;  %v8558_v31 = vld [vmem:[%s10779_s1 + $0x9b8] sm:$0xff] }
  0xf0   :  { %5270 = vmatpush.bf16.msrb.mxu2 %v8491_v9  ;;  %v8566_v36 = vld [vmem:[%s10779_s1 + $0x9f8] sm:$0xff] }
  0xf1   :  { %5283 = vmatpush.bf16.msrb.mxu3 %v8499_v12 }
  0xf2   :  { %5245 = vmatpush.bf16.msrb.mxu0 %v8474_v13  ;;  %v8513_v13 = vld [vmem:[%s10779_s1 + $0x850] sm:$0xff] }
  0xf3   :  { %5258 = vmatpush.bf16.msrb.mxu1 %v8482_v14  ;;  %v8521_v14 = vld [vmem:[%s10779_s1 + $0x890] sm:$0xff] }
  0xf4   :  { %5271 = vmatpush.bf16.msrb.mxu2 %v8490_v15  ;;  %v8529_v15 = vld [vmem:[%s10779_s1 + $0x8d0] sm:$0xff] }
  0xf5   :  { %5284 = vmatpush.bf16.msrb.mxu3 %v8498_v18  ;;  %v8512_v18 = vld [vmem:[%s10779_s1 + $0x848] sm:$0xff] }
  0xf6   :  { %5246 = vmatpush.bf16.msrb.mxu0 %v8473_v21  ;;  %v8528_v21 = vld [vmem:[%s10779_s1 + $0x8c8] sm:$0xff] }
  0xf7   :  { %5259 = vmatpush.bf16.msrb.mxu1 %v8481_v23  ;;  %v8503_v23 = vld [vmem:[%s10779_s1 + $0x800] sm:$0xff] }
  0xf8   :  { %5272 = vmatpush.bf16.msrb.mxu2 %v8489_v24  ;;  %v8511_v24 = vld [vmem:[%s10779_s1 + $0x840] sm:$0xff] }
  0xf9   :  { %5285 = vmatpush.bf16.msrb.mxu3 %v8497_v26  ;;  %v101_v26 = vld.sshfl [vmem:[#allocation1] sm:$0xff pattern:$0x73625140] }
  0xfa   :  { %5247 = vmatpush.bf16.msrb.mxu0 %v8472_v27  ;;  %v103_v27 = vld.sshfl [vmem:[#allocation1 + $0x10] sm:$0xff pattern:$0x73625140] }
  0xfb   :  { %5260 = vmatpush.bf16.msrb.mxu1 %v8480_v29  ;;  %v8550_v29 = vld [vmem:[%s10779_s1 + $0x978] sm:$0xff] }
  0xfc   :  { %5273 = vmatpush.bf16.msrb.mxu2 %v8488_v30  ;;  %v102_v30 = vld.sshfl [vmem:[#allocation1 + $0x8] sm:$0xff pattern:$0x73625140] }
  0xfd   :  { %5286 = vmatpush.bf16.msrb.mxu3 %v8496_v32  ;;  %v8527_v32 = vld [vmem:[%s10779_s1 + $0x8c0] sm:$0xff]  ;;  %v254_v37 = vpack.c.bf16 %v102_v30, %v102_v30  ;;  %v8589_v30 = vld [vmem:[%s10779_s1 + $0xab0] sm:$0xff] }
  0xfe   :  { %5248 = vmatpush.bf16.msrb.mxu0 %v8471_v33  ;;  %v5042_v58 = vpop.f32.mrf.mxu0  ;;  %v104_v33 = vld.sshfl [vmem:[#allocation1 + $0x18] sm:$0xff pattern:$0x73625140] }
  0xff   :  { %5261 = vmatpush.bf16.msrb.mxu1 %v8479_v34  ;;  %v5043_v59 = vadd.f32 %v5042_v58, %v9704_v22  ;;  %v5055_v61 = vpop.f32.mrf.mxu1  ;;  %v253_v34 = vpack.c.bf16 %v101_v26, %v101_v26  ;;  %v256_v38 = vpack.c.bf16 %v104_v33, %v104_v33  ;;  %v8580_v33 = vld [vmem:[%s10779_s1 + $0xa68] sm:$0xff] }
 0x100   :  { %5274 = vmatpush.bf16.msrb.mxu2 %v8487_v35  ;;  %v255_v35 = vpack.c.bf16 %v103_v27, %v103_v27 }
 0x101   :  { %5287 = vmatpush.bf16.msrb.mxu3 %v8495_v43  ;;  %5249 = vmatmul.bf16.vlgmr.msrb.gmra.mxu0 %v249_v45  ;;  %v5056_v0 = vadd.f32 %v5055_v61, %v5043_v59  ;;  %v8540_v43 = vld [vmem:[%s10779_s1 + $0x928] sm:$0xff] }
 0x102   :  { %5293 = vmatpush.bf16.msra.mxu0 %v8510_v39  ;;  %5262 = vmatmul.bf16.vlgmr.msrb.gmra.mxu1 %v250_v48  ;;  %v8541_v39 = vld [vmem:[%s10779_s1 + $0x930] sm:$0xff]  ;;  %v8556_v45 = vld [vmem:[%s10779_s1 + $0x9a8] sm:$0xff] }
 0x103   :  { %5306 = vmatpush.bf16.msra.mxu1 %v8518_v40  ;;  %5275 = vmatmul.bf16.vlgmr.msrb.gmra.mxu2 %v251_v46  ;;  %v8549_v40 = vld [vmem:[%s10779_s1 + $0x970] sm:$0xff]  ;;  %v8564_v46 = vld [vmem:[%s10779_s1 + $0x9e8] sm:$0xff] }
 0x104   :  { %5319 = vmatpush.bf16.msra.mxu2 %v8526_v42  ;;  %5288 = vmatmul.bf16.vlgmr.msrb.gmra.mxu3 %v252_v49  ;;  %v8565_v42 = vld [vmem:[%s10779_s1 + $0x9f0] sm:$0xff]  ;;  %v8539_v49 = vld [vmem:[%s10779_s1 + $0x920] sm:$0xff] }
 0x105   :  { %5332 = vmatpush.bf16.msra.mxu3 %v8534_v47 }
 0x106   :  { %5294 = vmatpush.bf16.msra.mxu0 %v8509_v50  ;;  %v5068_v5 = vpop.f32.mrf.mxu2  ;;  %v5044_v9 = vpop.f32.mrf.mxu0 }
 0x107   :  { %5307 = vmatpush.bf16.msra.mxu1 %v8517_v51  ;;  %v5069_v6 = vadd.f32 %v5068_v5, %v5056_v0  ;;  %v5081_v8 = vpop.f32.mrf.mxu3  ;;  %v5057_v11 = vpop.f32.mrf.mxu1  ;;  %v8547_v51 = vld [vmem:[%s10779_s1 + $0x960] sm:$0xff]  ;;  %v8537_v0 = vld [vmem:[%s10779_s1 + $0x910] sm:$0xff]  ;;  %v8536_v5 = vld [vmem:[%s10779_s1 + $0x908] sm:$0xff] }
 0x108   :  { %5320 = vmatpush.bf16.msra.mxu2 %v8525_v52  ;;  %v8555_v52 = vld [vmem:[%s10779_s1 + $0x9a0] sm:$0xff] }
 0x109   :  { %5333 = vmatpush.bf16.msra.mxu3 %v8533_v53  ;;  %v9806_v12 = vadd.f32 %v5081_v8, %v5069_v6  ;;  %v32_v6 = vld [vmem:[%s10778_s0 + $0x50] sm:$0xff]  ;;  %v8552_v8 = vld [vmem:[%s10779_s1 + $0x988] sm:$0xff] }
 0x10a   :  { %5295 = vmatpush.bf16.msra.mxu0 %v8508_v54  ;;  %v8563_v54 = vld [vmem:[%s10779_s1 + $0x9e0] sm:$0xff]  ;;  %109 = vst [vmem:[#allocation1] ss:$4 sm:$0xff] %v32_v6  ;;  %v8606_v6 = vld [vmem:[%s10779_s1 + $0xb38] sm:$0xff] }
 0x10b   :  { %5308 = vmatpush.bf16.msra.mxu1 %v8516_v55  ;;  %v8538_v55 = vld [vmem:[%s10779_s1 + $0x918] sm:$0xff] }
 0x10c   :  { %5321 = vmatpush.bf16.msra.mxu2 %v8524_v56  ;;  %v8546_v56 = vld [vmem:[%s10779_s1 + $0x958] sm:$0xff] }
 0x10d   :  { %5334 = vmatpush.bf16.msra.mxu3 %v8532_v57  ;;  %v8554_v57 = vld [vmem:[%s10779_s1 + $0x998] sm:$0xff] }
 0x10e   :  { %5296 = vmatpush.bf16.msra.mxu0 %v8507_v60  ;;  %v5070_v20 = vpop.f32.mrf.mxu2  ;;  %v8562_v60 = vld [vmem:[%s10779_s1 + $0x9d8] sm:$0xff] }
 0x10f   :  { %5309 = vmatpush.bf16.msra.mxu1 %v8515_v62  ;;  %v5083_v22 = vpop.f32.mrf.mxu3  ;;  %v8590_v20 = vld [vmem:[%s10779_s1 + $0xab8] sm:$0xff] }
 0x110   :  { %5322 = vmatpush.bf16.msra.mxu2 %v8523_v63  ;;  %v108_v22 = vld.sshfl [vmem:[#allocation1 + $0x38] sm:$0xff pattern:$0x73625140] }
 0x111   :  { %5335 = vmatpush.bf16.msra.mxu3 %v8531_v1  ;;  %v260_v27 = vpack.c.bf16 %v108_v22, %v108_v22  ;;  %v8612_v22 = vld [vmem:[%s10779_s1 + $0xb68] sm:$0xff] }
 0x112   :  { %5297 = vmatpush.bf16.msra.mxu0 %v8506_v2  ;;  %v8545_v2 = vld [vmem:[%s10779_s1 + $0x950] sm:$0xff] }
 0x113   :  { %5310 = vmatpush.bf16.msra.mxu1 %v8514_v3  ;;  %v8553_v3 = vld [vmem:[%s10779_s1 + $0x990] sm:$0xff] }
 0x114   :  { %5323 = vmatpush.bf16.msra.mxu2 %v8522_v4  ;;  %v8561_v4 = vld [vmem:[%s10779_s1 + $0x9d0] sm:$0xff] }
 0x115   :  { %5336 = vmatpush.bf16.msra.mxu3 %v8530_v7  ;;  %v8544_v7 = vld [vmem:[%s10779_s1 + $0x948] sm:$0xff] }
 0x116   :  { %5298 = vmatpush.bf16.msra.mxu0 %v8505_v10  ;;  %v8560_v10 = vld [vmem:[%s10779_s1 + $0x9c8] sm:$0xff] }
 0x117   :  { %5311 = vmatpush.bf16.msra.mxu1 %v8513_v13  ;;  %v8543_v13 = vld [vmem:[%s10779_s1 + $0x940] sm:$0xff] }
 0x118   :  { %5324 = vmatpush.bf16.msra.mxu2 %v8521_v14  ;;  %v8551_v14 = vld [vmem:[%s10779_s1 + $0x980] sm:$0xff] }
 0x119   :  { %5337 = vmatpush.bf16.msra.mxu3 %v8529_v15  ;;  %v105_v15 = vld.sshfl [vmem:[#allocation1 + $0x20] sm:$0xff pattern:$0x73625140] }
 0x11a   :  { %5299 = vmatpush.bf16.msra.mxu0 %v8504_v16  ;;  %v107_v16 = vld.sshfl [vmem:[#allocation1 + $0x30] sm:$0xff pattern:$0x73625140] }
 0x11b   :  { %5312 = vmatpush.bf16.msra.mxu1 %v8512_v18  ;;  %v8582_v18 = vld [vmem:[%s10779_s1 + $0xa78] sm:$0xff] }
 0x11c   :  { %5325 = vmatpush.bf16.msra.mxu2 %v8520_v19  ;;  %v106_v19 = vld.sshfl [vmem:[#allocation1 + $0x28] sm:$0xff pattern:$0x73625140] }
 0x11d   :  { %5338 = vmatpush.bf16.msra.mxu3 %v8528_v21  ;;  %v8559_v21 = vld [vmem:[%s10779_s1 + $0x9c0] sm:$0xff]  ;;  %v258_v26 = vpack.c.bf16 %v106_v19, %v106_v19  ;;  %v8621_v19 = vld [vmem:[%s10779_s1 + $0xbb0] sm:$0xff] }
 0x11e   :  { %5300 = vmatpush.bf16.msra.mxu0 %v8503_v23  ;;  %v5094_v47 = vpop.f32.mrf.mxu0  ;;  %v257_v23 = vpack.c.bf16 %v105_v15, %v105_v15 }
 0x11f   :  { %5313 = vmatpush.bf16.msra.mxu1 %v8511_v24  ;;  %v5095_v48 = vadd.f32 %v5094_v47, %v9806_v12  ;;  %v5107_v50 = vpop.f32.mrf.mxu1  ;;  %v8535_v12 = vld [vmem:[%s10779_s1 + $0x900] sm:$0xff]  ;;  %v259_v24 = vpack.c.bf16 %v107_v16, %v107_v16 }
 0x120   :  { %5326 = vmatpush.bf16.msra.mxu2 %v8519_v25  ;;  %v8598_v25 = vld [vmem:[%s10779_s1 + $0xaf8] sm:$0xff] }
 0x121   :  { %5339 = vmatpush.bf16.msra.mxu3 %v8527_v32  ;;  %5301 = vmatmul.bf16.vlgmr.msra.gmra.mxu0 %v253_v34  ;;  %v5108_v53 = vadd.f32 %v5107_v50, %v5095_v48  ;;  %v8572_v32 = vld [vmem:[%s10779_s1 + $0xa28] sm:$0xff] }
 0x122   :  { %5345 = vmatpush.bf16.msrb.mxu0 %v8542_v28  ;;  %5314 = vmatmul.bf16.vlgmr.msra.gmra.mxu1 %v254_v37  ;;  %v8573_v28 = vld [vmem:[%s10779_s1 + $0xa30] sm:$0xff]  ;;  %v8588_v34 = vld [vmem:[%s10779_s1 + $0xaa8] sm:$0xff] }
 0x123   :  { %5358 = vmatpush.bf16.msrb.mxu1 %v8550_v29  ;;  %5327 = vmatmul.bf16.vlgmr.msra.gmra.mxu2 %v255_v35  ;;  %v8581_v29 = vld [vmem:[%s10779_s1 + $0xa70] sm:$0xff]  ;;  %v8596_v35 = vld [vmem:[%s10779_s1 + $0xae8] sm:$0xff] }
 0x124   :  { %5371 = vmatpush.bf16.msrb.mxu2 %v8558_v31  ;;  %5340 = vmatmul.bf16.vlgmr.msra.gmra.mxu3 %v256_v38  ;;  %v8597_v31 = vld [vmem:[%s10779_s1 + $0xaf0] sm:$0xff]  ;;  %v8571_v38 = vld [vmem:[%s10779_s1 + $0xa20] sm:$0xff] }
 0x125   :  { %5384 = vmatpush.bf16.msrb.mxu3 %v8566_v36 }
 0x126   :  { %5346 = vmatpush.bf16.msrb.mxu0 %v8541_v39  ;;  %v5120_v58 = vpop.f32.mrf.mxu2  ;;  %v5096_v62 = vpop.f32.mrf.mxu0 }
 0x127   :  { %5359 = vmatpush.bf16.msrb.mxu1 %v8549_v40  ;;  %v5121_v59 = vadd.f32 %v5120_v58, %v5108_v53  ;;  %v5133_v61 = vpop.f32.mrf.mxu3  ;;  %v5109_v1 = vpop.f32.mrf.mxu1  ;;  %v8579_v40 = vld [vmem:[%s10779_s1 + $0xa60] sm:$0xff]  ;;  %v8569_v53 = vld [vmem:[%s10779_s1 + $0xa10] sm:$0xff]  ;;  %v8568_v58 = vld [vmem:[%s10779_s1 + $0xa08] sm:$0xff] }
 0x128   :  { %5372 = vmatpush.bf16.msrb.mxu2 %v8557_v41  ;;  %v8587_v41 = vld [vmem:[%s10779_s1 + $0xaa0] sm:$0xff] }
 0x129   :  { %5385 = vmatpush.bf16.msrb.mxu3 %v8565_v42  ;;  %v9905_v63 = vadd.f32 %v5133_v61, %v5121_v59  ;;  %v33_v59 = vld [vmem:[%s10778_s0 + $0x58] sm:$0xff]  ;;  %v8584_v61 = vld [vmem:[%s10779_s1 + $0xa88] sm:$0xff]  ;;  %v8567_v1 = vld [vmem:[%s10779_s1 + $0xa00] sm:$0xff] }
 0x12a   :  { %5347 = vmatpush.bf16.msrb.mxu0 %v8540_v43  ;;  %v8595_v43 = vld [vmem:[%s10779_s1 + $0xae0] sm:$0xff]  ;;  %110 = vst [vmem:[#allocation1 + $0x20] ss:$4 sm:$0xff] %v33_v59  ;;  %v8638_v59 = vld [vmem:[%s10779_s1 + $0xc38] sm:$0xff] }
 0x12b   :  { %5360 = vmatpush.bf16.msrb.mxu1 %v8548_v44  ;;  %v8570_v44 = vld [vmem:[%s10779_s1 + $0xa18] sm:$0xff] }
 0x12c   :  { %5373 = vmatpush.bf16.msrb.mxu2 %v8556_v45  ;;  %v8578_v45 = vld [vmem:[%s10779_s1 + $0xa58] sm:$0xff] }
 0x12d   :  { %5386 = vmatpush.bf16.msrb.mxu3 %v8564_v46  ;;  %v8586_v46 = vld [vmem:[%s10779_s1 + $0xa98] sm:$0xff] }
 0x12e   :  { %5348 = vmatpush.bf16.msrb.mxu0 %v8539_v49  ;;  %v5122_v9 = vpop.f32.mrf.mxu2  ;;  %v8594_v49 = vld [vmem:[%s10779_s1 + $0xad8] sm:$0xff] }
 0x12f   :  { %5361 = vmatpush.bf16.msrb.mxu1 %v8547_v51  ;;  %v5135_v11 = vpop.f32.mrf.mxu3  ;;  %v8622_v9 = vld [vmem:[%s10779_s1 + $0xbb8] sm:$0xff] }
 0x130   :  { %5374 = vmatpush.bf16.msrb.mxu2 %v8555_v52  ;;  %v114_v11 = vld.sshfl [vmem:[#allocation1 + $0x18] sm:$0xff pattern:$0x73625140] }
 0x131   :  { %5387 = vmatpush.bf16.msrb.mxu3 %v8563_v54  ;;  %v264_v16 = vpack.c.bf16 %v114_v11, %v114_v11  ;;  %v8644_v11 = vld [vmem:[%s10779_s1 + $0xc68] sm:$0xff] }
 0x132   :  { %5349 = vmatpush.bf16.msrb.mxu0 %v8538_v55  ;;  %v8577_v55 = vld [vmem:[%s10779_s1 + $0xa50] sm:$0xff] }
 0x133   :  { %5362 = vmatpush.bf16.msrb.mxu1 %v8546_v56  ;;  %v8585_v56 = vld [vmem:[%s10779_s1 + $0xa90] sm:$0xff] }
 0x134   :  { %5375 = vmatpush.bf16.msrb.mxu2 %v8554_v57  ;;  %v8593_v57 = vld [vmem:[%s10779_s1 + $0xad0] sm:$0xff] }
 0x135   :  { %5388 = vmatpush.bf16.msrb.mxu3 %v8562_v60  ;;  %v8576_v60 = vld [vmem:[%s10779_s1 + $0xa48] sm:$0xff] }
 0x136   :  { %5350 = vmatpush.bf16.msrb.mxu0 %v8537_v0 }
 0x137   :  { %5363 = vmatpush.bf16.msrb.mxu1 %v8545_v2  ;;  %v8575_v2 = vld [vmem:[%s10779_s1 + $0xa40] sm:$0xff] }
 0x138   :  { %5376 = vmatpush.bf16.msrb.mxu2 %v8553_v3  ;;  %v8583_v3 = vld [vmem:[%s10779_s1 + $0xa80] sm:$0xff] }
 0x139   :  { %5389 = vmatpush.bf16.msrb.mxu3 %v8561_v4  ;;  %v111_v4 = vld.sshfl [vmem:[#allocation1] sm:$0xff pattern:$0x73625140] }
 0x13a   :  { %5351 = vmatpush.bf16.msrb.mxu0 %v8536_v5  ;;  %v113_v5 = vld.sshfl [vmem:[#allocation1 + $0x10] sm:$0xff pattern:$0x73625140] }
 0x13b   :  { %5364 = vmatpush.bf16.msrb.mxu1 %v8544_v7  ;;  %v8614_v7 = vld [vmem:[%s10779_s1 + $0xb78] sm:$0xff] }
 0x13c   :  { %5377 = vmatpush.bf16.msrb.mxu2 %v8552_v8  ;;  %v112_v8 = vld.sshfl [vmem:[#allocation1 + $0x8] sm:$0xff pattern:$0x73625140] }
 0x13d   :  { %5390 = vmatpush.bf16.msrb.mxu3 %v8560_v10  ;;  %v8591_v10 = vld [vmem:[%s10779_s1 + $0xac0] sm:$0xff]  ;;  %v262_v15 = vpack.c.bf16 %v112_v8, %v112_v8  ;;  %v8653_v8 = vld [vmem:[%s10779_s1 + $0xcb0] sm:$0xff] }
 0x13e   :  { %5352 = vmatpush.bf16.msrb.mxu0 %v8535_v12  ;;  %v5146_v36 = vpop.f32.mrf.mxu0  ;;  %v261_v12 = vpack.c.bf16 %v111_v4, %v111_v4 }
 0x13f   :  { %5365 = vmatpush.bf16.msrb.mxu1 %v8543_v13  ;;  %v5147_v37 = vadd.f32 %v5146_v36, %v9905_v63  ;;  %v5159_v39 = vpop.f32.mrf.mxu1  ;;  %v8592_v63 = vld [vmem:[%s10779_s1 + $0xac8] sm:$0xff]  ;;  %v263_v13 = vpack.c.bf16 %v113_v5, %v113_v5 }
 0x140   :  { %5378 = vmatpush.bf16.msrb.mxu2 %v8551_v14  ;;  %v8630_v14 = vld [vmem:[%s10779_s1 + $0xbf8] sm:$0xff] }
 0x141   :  { %5391 = vmatpush.bf16.msrb.mxu3 %v8559_v21  ;;  %5353 = vmatmul.bf16.vlgmr.msrb.gmra.mxu0 %v257_v23  ;;  %v5160_v42 = vadd.f32 %v5159_v39, %v5147_v37  ;;  %v8604_v21 = vld [vmem:[%s10779_s1 + $0xb28] sm:$0xff] }
 0x142   :  { %5397 = vmatpush.bf16.msra.mxu0 %v8574_v17  ;;  %5366 = vmatmul.bf16.vlgmr.msrb.gmra.mxu1 %v258_v26  ;;  %v8605_v17 = vld [vmem:[%s10779_s1 + $0xb30] sm:$0xff]  ;;  %v8620_v23 = vld [vmem:[%s10779_s1 + $0xba8] sm:$0xff] }
 0x143   :  { %5410 = vmatpush.bf16.msra.mxu1 %v8582_v18  ;;  %5379 = vmatmul.bf16.vlgmr.msrb.gmra.mxu2 %v259_v24  ;;  %v8613_v18 = vld [vmem:[%s10779_s1 + $0xb70] sm:$0xff]  ;;  %v8628_v24 = vld [vmem:[%s10779_s1 + $0xbe8] sm:$0xff] }
 0x144   :  { %5423 = vmatpush.bf16.msra.mxu2 %v8590_v20  ;;  %5392 = vmatmul.bf16.vlgmr.msrb.gmra.mxu3 %v260_v27  ;;  %v8629_v20 = vld [vmem:[%s10779_s1 + $0xbf0] sm:$0xff]  ;;  %v8603_v27 = vld [vmem:[%s10779_s1 + $0xb20] sm:$0xff] }
 0x145   :  { %5436 = vmatpush.bf16.msra.mxu3 %v8598_v25 }
 0x146   :  { %5398 = vmatpush.bf16.msra.mxu0 %v8573_v28  ;;  %v5172_v47 = vpop.f32.mrf.mxu2  ;;  %v5148_v51 = vpop.f32.mrf.mxu0 }
 0x147   :  { %5411 = vmatpush.bf16.msra.mxu1 %v8581_v29  ;;  %v5173_v48 = vadd.f32 %v5172_v47, %v5160_v42  ;;  %v5185_v50 = vpop.f32.mrf.mxu3  ;;  %v5161_v54 = vpop.f32.mrf.mxu1  ;;  %v8611_v29 = vld [vmem:[%s10779_s1 + $0xb60] sm:$0xff]  ;;  %v8601_v42 = vld [vmem:[%s10779_s1 + $0xb10] sm:$0xff]  ;;  %v8600_v47 = vld [vmem:[%s10779_s1 + $0xb08] sm:$0xff] }
 0x148   :  { %5424 = vmatpush.bf16.msra.mxu2 %v8589_v30  ;;  %v8619_v30 = vld [vmem:[%s10779_s1 + $0xba0] sm:$0xff] }
 0x149   :  { %5437 = vmatpush.bf16.msra.mxu3 %v8597_v31  ;;  %v10007_v52 = vadd.f32 %v5185_v50, %v5173_v48  ;;  %v34_v48 = vld [vmem:[%s10778_s0 + $0x60] sm:$0xff]  ;;  %v8616_v50 = vld [vmem:[%s10779_s1 + $0xb88] sm:$0xff] }
 0x14a   :  { %5399 = vmatpush.bf16.msra.mxu0 %v8572_v32  ;;  %v8627_v32 = vld [vmem:[%s10779_s1 + $0xbe0] sm:$0xff]  ;;  %119 = vst [vmem:[#allocation1] ss:$4 sm:$0xff] %v34_v48  ;;  %v8670_v48 = vld [vmem:[%s10779_s1 + $0xd38] sm:$0xff] }
 0x14b   :  { %5412 = vmatpush.bf16.msra.mxu1 %v8580_v33  ;;  %v8602_v33 = vld [vmem:[%s10779_s1 + $0xb18] sm:$0xff]  ;;  %v8599_v54 = vld [vmem:[%s10779_s1 + $0xb00] sm:$0xff] }
 0x14c   :  { %5425 = vmatpush.bf16.msra.mxu2 %v8588_v34  ;;  %v8610_v34 = vld [vmem:[%s10779_s1 + $0xb58] sm:$0xff] }
 0x14d   :  { %5438 = vmatpush.bf16.msra.mxu3 %v8596_v35  ;;  %v8618_v35 = vld [vmem:[%s10779_s1 + $0xb98] sm:$0xff] }
 0x14e   :  { %5400 = vmatpush.bf16.msra.mxu0 %v8571_v38  ;;  %v5174_v62 = vpop.f32.mrf.mxu2  ;;  %v8626_v38 = vld [vmem:[%s10779_s1 + $0xbd8] sm:$0xff] }
 0x14f   :  { %5413 = vmatpush.bf16.msra.mxu1 %v8579_v40  ;;  %v5187_v0 = vpop.f32.mrf.mxu3  ;;  %v8654_v62 = vld [vmem:[%s10779_s1 + $0xcb8] sm:$0xff] }
 0x150   :  { %5426 = vmatpush.bf16.msra.mxu2 %v8587_v41  ;;  %v118_v0 = vld.sshfl [vmem:[#allocation1 + $0x38] sm:$0xff pattern:$0x73625140] }
 0x151   :  { %5439 = vmatpush.bf16.msra.mxu3 %v8595_v43  ;;  %v268_v5 = vpack.c.bf16 %v118_v0, %v118_v0  ;;  %v8676_v0 = vld [vmem:[%s10779_s1 + $0xd68] sm:$0xff] }
 0x152   :  { %5401 = vmatpush.bf16.msra.mxu0 %v8570_v44  ;;  %v8609_v44 = vld [vmem:[%s10779_s1 + $0xb50] sm:$0xff] }
 0x153   :  { %5414 = vmatpush.bf16.msra.mxu1 %v8578_v45  ;;  %v8617_v45 = vld [vmem:[%s10779_s1 + $0xb90] sm:$0xff] }
 0x154   :  { %5427 = vmatpush.bf16.msra.mxu2 %v8586_v46  ;;  %v8625_v46 = vld [vmem:[%s10779_s1 + $0xbd0] sm:$0xff] }
 0x155   :  { %5440 = vmatpush.bf16.msra.mxu3 %v8594_v49  ;;  %v8608_v49 = vld [vmem:[%s10779_s1 + $0xb48] sm:$0xff] }
 0x156   :  { %5402 = vmatpush.bf16.msra.mxu0 %v8569_v53 }
 0x157   :  { %5415 = vmatpush.bf16.msra.mxu1 %v8577_v55  ;;  %v8607_v55 = vld [vmem:[%s10779_s1 + $0xb40] sm:$0xff] }
 0x158   :  { %5428 = vmatpush.bf16.msra.mxu2 %v8585_v56  ;;  %v8615_v56 = vld [vmem:[%s10779_s1 + $0xb80] sm:$0xff] }
 0x159   :  { %5441 = vmatpush.bf16.msra.mxu3 %v8593_v57  ;;  %v115_v57 = vld.sshfl [vmem:[#allocation1 + $0x20] sm:$0xff pattern:$0x73625140] }
 0x15a   :  { %5403 = vmatpush.bf16.msra.mxu0 %v8568_v58  ;;  %v117_v58 = vld.sshfl [vmem:[#allocation1 + $0x30] sm:$0xff pattern:$0x73625140] }
 0x15b   :  { %5416 = vmatpush.bf16.msra.mxu1 %v8576_v60  ;;  %v8646_v60 = vld [vmem:[%s10779_s1 + $0xc78] sm:$0xff] }
 0x15c   :  { %5429 = vmatpush.bf16.msra.mxu2 %v8584_v61  ;;  %v116_v61 = vld.sshfl [vmem:[#allocation1 + $0x28] sm:$0xff pattern:$0x73625140] }
 0x15d   :  { %5442 = vmatpush.bf16.msra.mxu3 %v8592_v63  ;;  %v8623_v63 = vld [vmem:[%s10779_s1 + $0xbc0] sm:$0xff]  ;;  %v266_v4 = vpack.c.bf16 %v116_v61, %v116_v61  ;;  %v8685_v61 = vld [vmem:[%s10779_s1 + $0xdb0] sm:$0xff] }
 0x15e   :  { %5404 = vmatpush.bf16.msra.mxu0 %v8567_v1  ;;  %v5198_v25 = vpop.f32.mrf.mxu0  ;;  %v265_v1 = vpack.c.bf16 %v115_v57, %v115_v57 }
 0x15f   :  { %5417 = vmatpush.bf16.msra.mxu1 %v8575_v2  ;;  %v5199_v26 = vadd.f32 %v5198_v25, %v10007_v52  ;;  %v5211_v28 = vpop.f32.mrf.mxu1  ;;  %v8624_v52 = vld [vmem:[%s10779_s1 + $0xbc8] sm:$0xff]  ;;  %v267_v2 = vpack.c.bf16 %v117_v58, %v117_v58 }
 0x160   :  { %5430 = vmatpush.bf16.msra.mxu2 %v8583_v3  ;;  %v8662_v3 = vld [vmem:[%s10779_s1 + $0xcf8] sm:$0xff] }
 0x161   :  { %5443 = vmatpush.bf16.msra.mxu3 %v8591_v10  ;;  %5405 = vmatmul.bf16.vlgmr.msra.gmra.mxu0 %v261_v12  ;;  %v5212_v31 = vadd.f32 %v5211_v28, %v5199_v26  ;;  %v8636_v10 = vld [vmem:[%s10779_s1 + $0xc28] sm:$0xff] }
 0x162   :  { %5449 = vmatpush.bf16.msrb.mxu0 %v8606_v6  ;;  %5418 = vmatmul.bf16.vlgmr.msra.gmra.mxu1 %v262_v15  ;;  %v8637_v6 = vld [vmem:[%s10779_s1 + $0xc30] sm:$0xff]  ;;  %v8652_v12 = vld [vmem:[%s10779_s1 + $0xca8] sm:$0xff] }
 0x163   :  { %5462 = vmatpush.bf16.msrb.mxu1 %v8614_v7  ;;  %5431 = vmatmul.bf16.vlgmr.msra.gmra.mxu2 %v263_v13  ;;  %v8645_v7 = vld [vmem:[%s10779_s1 + $0xc70] sm:$0xff]  ;;  %v8660_v13 = vld [vmem:[%s10779_s1 + $0xce8] sm:$0xff] }
 0x164   :  { %5475 = vmatpush.bf16.msrb.mxu2 %v8622_v9  ;;  %5444 = vmatmul.bf16.vlgmr.msra.gmra.mxu3 %v264_v16  ;;  %v8661_v9 = vld [vmem:[%s10779_s1 + $0xcf0] sm:$0xff]  ;;  %v8635_v16 = vld [vmem:[%s10779_s1 + $0xc20] sm:$0xff] }
 0x165   :  { %5488 = vmatpush.bf16.msrb.mxu3 %v8630_v14 }
 0x166   :  { %5450 = vmatpush.bf16.msrb.mxu0 %v8605_v17  ;;  %v5224_v36 = vpop.f32.mrf.mxu2  ;;  %v5200_v40 = vpop.f32.mrf.mxu0 }
 0x167   :  { %5463 = vmatpush.bf16.msrb.mxu1 %v8613_v18  ;;  %v5225_v37 = vadd.f32 %v5224_v36, %v5212_v31  ;;  %v5237_v39 = vpop.f32.mrf.mxu3  ;;  %v5213_v43 = vpop.f32.mrf.mxu1  ;;  %v8643_v18 = vld [vmem:[%s10779_s1 + $0xc60] sm:$0xff]  ;;  %v8633_v31 = vld [vmem:[%s10779_s1 + $0xc10] sm:$0xff]  ;;  %v8632_v36 = vld [vmem:[%s10779_s1 + $0xc08] sm:$0xff] }
 0x168   :  { %5476 = vmatpush.bf16.msrb.mxu2 %v8621_v19  ;;  %v8651_v19 = vld [vmem:[%s10779_s1 + $0xca0] sm:$0xff] }
 0x169   :  { %5489 = vmatpush.bf16.msrb.mxu3 %v8629_v20  ;;  %v10109_v41 = vadd.f32 %v5237_v39, %v5225_v37  ;;  %v35_v37 = vld [vmem:[%s10778_s0 + $0x68] sm:$0xff]  ;;  %v8631_v43 = vld [vmem:[%s10779_s1 + $0xc00] sm:$0xff] }
 0x16a   :  { %5451 = vmatpush.bf16.msrb.mxu0 %v8604_v21  ;;  %v8659_v21 = vld [vmem:[%s10779_s1 + $0xce0] sm:$0xff]  ;;  %v8648_v39 = vld [vmem:[%s10779_s1 + $0xc88] sm:$0xff]  ;;  %120 = vst [vmem:[#allocation1 + $0x20] ss:$4 sm:$0xff] %v35_v37  ;;  %v8702_v37 = vld [vmem:[%s10779_s1 + $0xe38] sm:$0xff] }
 0x16b   :  { %5464 = vmatpush.bf16.msrb.mxu1 %v8612_v22  ;;  %v8634_v22 = vld [vmem:[%s10779_s1 + $0xc18] sm:$0xff] }
 0x16c   :  { %5477 = vmatpush.bf16.msrb.mxu2 %v8620_v23  ;;  %v8642_v23 = vld [vmem:[%s10779_s1 + $0xc58] sm:$0xff] }
 0x16d   :  { %5490 = vmatpush.bf16.msrb.mxu3 %v8628_v24  ;;  %v8650_v24 = vld [vmem:[%s10779_s1 + $0xc98] sm:$0xff] }
 0x16e   :  { %5452 = vmatpush.bf16.msrb.mxu0 %v8603_v27  ;;  %v5226_v51 = vpop.f32.mrf.mxu2  ;;  %v8658_v27 = vld [vmem:[%s10779_s1 + $0xcd8] sm:$0xff] }
 0x16f   :  { %5465 = vmatpush.bf16.msrb.mxu1 %v8611_v29  ;;  %v5239_v53 = vpop.f32.mrf.mxu3  ;;  %v8686_v51 = vld [vmem:[%s10779_s1 + $0xdb8] sm:$0xff] }
 0x170   :  { %5478 = vmatpush.bf16.msrb.mxu2 %v8619_v30  ;;  %v124_v53 = vld.sshfl [vmem:[#allocation1 + $0x18] sm:$0xff pattern:$0x73625140] }
 0x171   :  { %5491 = vmatpush.bf16.msrb.mxu3 %v8627_v32  ;;  %v272_v58 = vpack.c.bf16 %v124_v53, %v124_v53  ;;  %v8708_v53 = vld [vmem:[%s10779_s1 + $0xe68] sm:$0xff] }
 0x172   :  { %5453 = vmatpush.bf16.msrb.mxu0 %v8602_v33  ;;  %v8641_v33 = vld [vmem:[%s10779_s1 + $0xc50] sm:$0xff] }
 0x173   :  { %5466 = vmatpush.bf16.msrb.mxu1 %v8610_v34  ;;  %v8649_v34 = vld [vmem:[%s10779_s1 + $0xc90] sm:$0xff] }
 0x174   :  { %5479 = vmatpush.bf16.msrb.mxu2 %v8618_v35  ;;  %v8657_v35 = vld [vmem:[%s10779_s1 + $0xcd0] sm:$0xff] }
 0x175   :  { %5492 = vmatpush.bf16.msrb.mxu3 %v8626_v38  ;;  %v8640_v38 = vld [vmem:[%s10779_s1 + $0xc48] sm:$0xff] }
 0x176   :  { %5454 = vmatpush.bf16.msrb.mxu0 %v8601_v42 }
 0x177   :  { %5467 = vmatpush.bf16.msrb.mxu1 %v8609_v44  ;;  %v8639_v44 = vld [vmem:[%s10779_s1 + $0xc40] sm:$0xff] }
 0x178   :  { %5480 = vmatpush.bf16.msrb.mxu2 %v8617_v45  ;;  %v8647_v45 = vld [vmem:[%s10779_s1 + $0xc80] sm:$0xff] }
 0x179   :  { %5493 = vmatpush.bf16.msrb.mxu3 %v8625_v46  ;;  %v121_v46 = vld.sshfl [vmem:[#allocation1] sm:$0xff pattern:$0x73625140] }
 0x17a   :  { %5455 = vmatpush.bf16.msrb.mxu0 %v8600_v47  ;;  %v123_v47 = vld.sshfl [vmem:[#allocation1 + $0x10] sm:$0xff pattern:$0x73625140] }
 0x17b   :  { %5468 = vmatpush.bf16.msrb.mxu1 %v8608_v49  ;;  %v8678_v49 = vld [vmem:[%s10779_s1 + $0xd78] sm:$0xff] }
 0x17c   :  { %5481 = vmatpush.bf16.msrb.mxu2 %v8616_v50  ;;  %v122_v50 = vld.sshfl [vmem:[#allocation1 + $0x8] sm:$0xff pattern:$0x73625140] }
 0x17d   :  { %5494 = vmatpush.bf16.msrb.mxu3 %v8624_v52  ;;  %v8655_v52 = vld [vmem:[%s10779_s1 + $0xcc0] sm:$0xff]  ;;  %v270_v57 = vpack.c.bf16 %v122_v50, %v122_v50  ;;  %v8717_v50 = vld [vmem:[%s10779_s1 + $0xeb0] sm:$0xff] }
 0x17e   :  { %5456 = vmatpush.bf16.msrb.mxu0 %v8599_v54  ;;  %v5250_v14 = vpop.f32.mrf.mxu0  ;;  %v269_v54 = vpack.c.bf16 %v121_v46, %v121_v46 }
 0x17f   :  { %5469 = vmatpush.bf16.msrb.mxu1 %v8607_v55  ;;  %v5251_v15 = vadd.f32 %v5250_v14, %v10109_v41  ;;  %v5263_v17 = vpop.f32.mrf.mxu1  ;;  %v8656_v41 = vld [vmem:[%s10779_s1 + $0xcc8] sm:$0xff]  ;;  %v271_v55 = vpack.c.bf16 %v123_v47, %v123_v47 }
 0x180   :  { %5482 = vmatpush.bf16.msrb.mxu2 %v8615_v56  ;;  %v8694_v56 = vld [vmem:[%s10779_s1 + $0xdf8] sm:$0xff] }
 0x181   :  { %5495 = vmatpush.bf16.msrb.mxu3 %v8623_v63  ;;  %5457 = vmatmul.bf16.vlgmr.msrb.gmra.mxu0 %v265_v1  ;;  %v5264_v20 = vadd.f32 %v5263_v17, %v5251_v15  ;;  %v8668_v63 = vld [vmem:[%s10779_s1 + $0xd28] sm:$0xff] }
 0x182   :  { %5501 = vmatpush.bf16.msra.mxu0 %v8638_v59  ;;  %5470 = vmatmul.bf16.vlgmr.msrb.gmra.mxu1 %v266_v4  ;;  %v8669_v59 = vld [vmem:[%s10779_s1 + $0xd30] sm:$0xff]  ;;  %v8684_v1 = vld [vmem:[%s10779_s1 + $0xda8] sm:$0xff] }
 0x183   :  { %5514 = vmatpush.bf16.msra.mxu1 %v8646_v60  ;;  %5483 = vmatmul.bf16.vlgmr.msrb.gmra.mxu2 %v267_v2  ;;  %v8677_v60 = vld [vmem:[%s10779_s1 + $0xd70] sm:$0xff]  ;;  %v8692_v2 = vld [vmem:[%s10779_s1 + $0xde8] sm:$0xff] }
 0x184   :  { %5527 = vmatpush.bf16.msra.mxu2 %v8654_v62  ;;  %5496 = vmatmul.bf16.vlgmr.msrb.gmra.mxu3 %v268_v5  ;;  %v8693_v62 = vld [vmem:[%s10779_s1 + $0xdf0] sm:$0xff]  ;;  %v8667_v5 = vld [vmem:[%s10779_s1 + $0xd20] sm:$0xff] }
 0x185   :  { %5540 = vmatpush.bf16.msra.mxu3 %v8662_v3 }
 0x186   :  { %5502 = vmatpush.bf16.msra.mxu0 %v8637_v6  ;;  %v5276_v25 = vpop.f32.mrf.mxu2  ;;  %v5252_v29 = vpop.f32.mrf.mxu0 }
 0x187   :  { %5515 = vmatpush.bf16.msra.mxu1 %v8645_v7  ;;  %v5277_v26 = vadd.f32 %v5276_v25, %v5264_v20  ;;  %v5289_v28 = vpop.f32.mrf.mxu3  ;;  %v5265_v32 = vpop.f32.mrf.mxu1  ;;  %v8675_v7 = vld [vmem:[%s10779_s1 + $0xd60] sm:$0xff]  ;;  %v8665_v20 = vld [vmem:[%s10779_s1 + $0xd10] sm:$0xff]  ;;  %v8664_v25 = vld [vmem:[%s10779_s1 + $0xd08] sm:$0xff] }
 0x188   :  { %5528 = vmatpush.bf16.msra.mxu2 %v8653_v8  ;;  %v8683_v8 = vld [vmem:[%s10779_s1 + $0xda0] sm:$0xff] }
 0x189   :  { %5541 = vmatpush.bf16.msra.mxu3 %v8661_v9  ;;  %v10211_v30 = vadd.f32 %v5289_v28, %v5277_v26  ;;  %v36_v26 = vld [vmem:[%s10778_s0 + $0x70] sm:$0xff]  ;;  %v8680_v28 = vld [vmem:[%s10779_s1 + $0xd88] sm:$0xff]  ;;  %v8663_v32 = vld [vmem:[%s10779_s1 + $0xd00] sm:$0xff] }
 0x18a   :  { %5503 = vmatpush.bf16.msra.mxu0 %v8636_v10  ;;  %v8691_v10 = vld [vmem:[%s10779_s1 + $0xde0] sm:$0xff]  ;;  %129 = vst [vmem:[#allocation1] ss:$4 sm:$0xff] %v36_v26  ;;  %v8734_v26 = vld [vmem:[%s10779_s1 + $0xf38] sm:$0xff] }
 0x18b   :  { %5516 = vmatpush.bf16.msra.mxu1 %v8644_v11  ;;  %v8666_v11 = vld [vmem:[%s10779_s1 + $0xd18] sm:$0xff] }
 0x18c   :  { %5529 = vmatpush.bf16.msra.mxu2 %v8652_v12  ;;  %v8674_v12 = vld [vmem:[%s10779_s1 + $0xd58] sm:$0xff] }
 0x18d   :  { %5542 = vmatpush.bf16.msra.mxu3 %v8660_v13  ;;  %v8682_v13 = vld [vmem:[%s10779_s1 + $0xd98] sm:$0xff] }
 0x18e   :  { %5504 = vmatpush.bf16.msra.mxu0 %v8635_v16  ;;  %v5278_v40 = vpop.f32.mrf.mxu2  ;;  %v8690_v16 = vld [vmem:[%s10779_s1 + $0xdd8] sm:$0xff] }
 0x18f   :  { %5517 = vmatpush.bf16.msra.mxu1 %v8643_v18  ;;  %v5291_v42 = vpop.f32.mrf.mxu3  ;;  %v8718_v40 = vld [vmem:[%s10779_s1 + $0xeb8] sm:$0xff] }
 0x190   :  { %5530 = vmatpush.bf16.msra.mxu2 %v8651_v19  ;;  %v128_v42 = vld.sshfl [vmem:[#allocation1 + $0x38] sm:$0xff pattern:$0x73625140] }
 0x191   :  { %5543 = vmatpush.bf16.msra.mxu3 %v8659_v21  ;;  %v276_v47 = vpack.c.bf16 %v128_v42, %v128_v42  ;;  %v8740_v42 = vld [vmem:[%s10779_s1 + $0xf68] sm:$0xff] }
 0x192   :  { %5505 = vmatpush.bf16.msra.mxu0 %v8634_v22  ;;  %v8673_v22 = vld [vmem:[%s10779_s1 + $0xd50] sm:$0xff] }
 0x193   :  { %5518 = vmatpush.bf16.msra.mxu1 %v8642_v23  ;;  %v8681_v23 = vld [vmem:[%s10779_s1 + $0xd90] sm:$0xff] }
 0x194   :  { %5531 = vmatpush.bf16.msra.mxu2 %v8650_v24  ;;  %v8689_v24 = vld [vmem:[%s10779_s1 + $0xdd0] sm:$0xff] }
 0x195   :  { %5544 = vmatpush.bf16.msra.mxu3 %v8658_v27  ;;  %v8672_v27 = vld [vmem:[%s10779_s1 + $0xd48] sm:$0xff] }
 0x196   :  { %5506 = vmatpush.bf16.msra.mxu0 %v8633_v31 }
 0x197   :  { %5519 = vmatpush.bf16.msra.mxu1 %v8641_v33  ;;  %v8671_v33 = vld [vmem:[%s10779_s1 + $0xd40] sm:$0xff] }
 0x198   :  { %5532 = vmatpush.bf16.msra.mxu2 %v8649_v34  ;;  %v8679_v34 = vld [vmem:[%s10779_s1 + $0xd80] sm:$0xff] }
 0x199   :  { %5545 = vmatpush.bf16.msra.mxu3 %v8657_v35  ;;  %v125_v35 = vld.sshfl [vmem:[#allocation1 + $0x20] sm:$0xff pattern:$0x73625140] }
 0x19a   :  { %5507 = vmatpush.bf16.msra.mxu0 %v8632_v36  ;;  %v127_v36 = vld.sshfl [vmem:[#allocation1 + $0x30] sm:$0xff pattern:$0x73625140] }
 0x19b   :  { %5520 = vmatpush.bf16.msra.mxu1 %v8640_v38  ;;  %v8710_v38 = vld [vmem:[%s10779_s1 + $0xe78] sm:$0xff] }
 0x19c   :  { %5533 = vmatpush.bf16.msra.mxu2 %v8648_v39  ;;  %v126_v39 = vld.sshfl [vmem:[#allocation1 + $0x28] sm:$0xff pattern:$0x73625140] }
 0x19d   :  { %5546 = vmatpush.bf16.msra.mxu3 %v8656_v41  ;;  %v8687_v41 = vld [vmem:[%s10779_s1 + $0xdc0] sm:$0xff]  ;;  %v274_v46 = vpack.c.bf16 %v126_v39, %v126_v39  ;;  %v8749_v39 = vld [vmem:[%s10779_s1 + $0xfb0] sm:$0xff] }
 0x19e   :  { %5508 = vmatpush.bf16.msra.mxu0 %v8631_v43  ;;  %v5302_v3 = vpop.f32.mrf.mxu0  ;;  %v273_v43 = vpack.c.bf16 %v125_v35, %v125_v35 }
 0x19f   :  { %5521 = vmatpush.bf16.msra.mxu1 %v8639_v44  ;;  %v5303_v4 = vadd.f32 %v5302_v3, %v10211_v30  ;;  %v5315_v6 = vpop.f32.mrf.mxu1  ;;  %v8688_v30 = vld [vmem:[%s10779_s1 + $0xdc8] sm:$0xff]  ;;  %v275_v44 = vpack.c.bf16 %v127_v36, %v127_v36 }
 0x1a0   :  { %5534 = vmatpush.bf16.msra.mxu2 %v8647_v45  ;;  %v8726_v45 = vld [vmem:[%s10779_s1 + $0xef8] sm:$0xff] }
 0x1a1   :  { %5547 = vmatpush.bf16.msra.mxu3 %v8655_v52  ;;  %5509 = vmatmul.bf16.vlgmr.msra.gmra.mxu0 %v269_v54  ;;  %v5316_v9 = vadd.f32 %v5315_v6, %v5303_v4  ;;  %v8700_v52 = vld [vmem:[%s10779_s1 + $0xe28] sm:$0xff] }
 0x1a2   :  { %5553 = vmatpush.bf16.msrb.mxu0 %v8670_v48  ;;  %5522 = vmatmul.bf16.vlgmr.msra.gmra.mxu1 %v270_v57  ;;  %v8701_v48 = vld [vmem:[%s10779_s1 + $0xe30] sm:$0xff]  ;;  %v8716_v54 = vld [vmem:[%s10779_s1 + $0xea8] sm:$0xff] }
 0x1a3   :  { %5566 = vmatpush.bf16.msrb.mxu1 %v8678_v49  ;;  %5535 = vmatmul.bf16.vlgmr.msra.gmra.mxu2 %v271_v55  ;;  %v8709_v49 = vld [vmem:[%s10779_s1 + $0xe70] sm:$0xff]  ;;  %v8724_v55 = vld [vmem:[%s10779_s1 + $0xee8] sm:$0xff] }
 0x1a4   :  { %5579 = vmatpush.bf16.msrb.mxu2 %v8686_v51  ;;  %5548 = vmatmul.bf16.vlgmr.msra.gmra.mxu3 %v272_v58  ;;  %v8725_v51 = vld [vmem:[%s10779_s1 + $0xef0] sm:$0xff]  ;;  %v8699_v58 = vld [vmem:[%s10779_s1 + $0xe20] sm:$0xff] }
 0x1a5   :  { %5592 = vmatpush.bf16.msrb.mxu3 %v8694_v56 }
 0x1a6   :  { %5554 = vmatpush.bf16.msrb.mxu0 %v8669_v59  ;;  %v5328_v14 = vpop.f32.mrf.mxu2  ;;  %v5304_v18 = vpop.f32.mrf.mxu0 }
 0x1a7   :  { %5567 = vmatpush.bf16.msrb.mxu1 %v8677_v60  ;;  %v5329_v15 = vadd.f32 %v5328_v14, %v5316_v9  ;;  %v5341_v17 = vpop.f32.mrf.mxu3  ;;  %v5317_v21 = vpop.f32.mrf.mxu1  ;;  %v8707_v60 = vld [vmem:[%s10779_s1 + $0xe60] sm:$0xff]  ;;  %v8697_v9 = vld [vmem:[%s10779_s1 + $0xe10] sm:$0xff]  ;;  %v8696_v14 = vld [vmem:[%s10779_s1 + $0xe08] sm:$0xff] }
 0x1a8   :  { %5580 = vmatpush.bf16.msrb.mxu2 %v8685_v61  ;;  %v8715_v61 = vld [vmem:[%s10779_s1 + $0xea0] sm:$0xff] }
 0x1a9   :  { %5593 = vmatpush.bf16.msrb.mxu3 %v8693_v62  ;;  %v10313_v19 = vadd.f32 %v5341_v17, %v5329_v15  ;;  %v37_v15 = vld [vmem:[%s10778_s0 + $0x78] sm:$0xff]  ;;  %v8712_v17 = vld [vmem:[%s10779_s1 + $0xe88] sm:$0xff]  ;;  %v8695_v21 = vld [vmem:[%s10779_s1 + $0xe00] sm:$0xff] }
 0x1aa   :  { %5555 = vmatpush.bf16.msrb.mxu0 %v8668_v63  ;;  %v8723_v63 = vld [vmem:[%s10779_s1 + $0xee0] sm:$0xff]  ;;  %130 = vst [vmem:[#allocation1 + $0x20] ss:$4 sm:$0xff] %v37_v15  ;;  %v8766_v15 = vld [vmem:[%s10779_s1 + $0x1038] sm:$0xff] }
 0x1ab   :  { %5568 = vmatpush.bf16.msrb.mxu1 %v8676_v0  ;;  %v8698_v0 = vld [vmem:[%s10779_s1 + $0xe18] sm:$0xff] }
 0x1ac   :  { %5581 = vmatpush.bf16.msrb.mxu2 %v8684_v1  ;;  %v8706_v1 = vld [vmem:[%s10779_s1 + $0xe58] sm:$0xff] }
 0x1ad   :  { %5594 = vmatpush.bf16.msrb.mxu3 %v8692_v2  ;;  %v8714_v2 = vld [vmem:[%s10779_s1 + $0xe98] sm:$0xff] }
 0x1ae   :  { %5556 = vmatpush.bf16.msrb.mxu0 %v8667_v5  ;;  %v5330_v29 = vpop.f32.mrf.mxu2  ;;  %v8722_v5 = vld [vmem:[%s10779_s1 + $0xed8] sm:$0xff] }
 0x1af   :  { %5569 = vmatpush.bf16.msrb.mxu1 %v8675_v7  ;;  %v5343_v31 = vpop.f32.mrf.mxu3  ;;  %v8750_v29 = vld [vmem:[%s10779_s1 + $0xfb8] sm:$0xff] }
 0x1b0   :  { %5582 = vmatpush.bf16.msrb.mxu2 %v8683_v8  ;;  %v134_v31 = vld.sshfl [vmem:[#allocation1 + $0x18] sm:$0xff pattern:$0x73625140] }
 0x1b1   :  { %5595 = vmatpush.bf16.msrb.mxu3 %v8691_v10  ;;  %v280_v36 = vpack.c.bf16 %v134_v31, %v134_v31  ;;  %v8772_v31 = vld [vmem:[%s10779_s1 + $0x1068] sm:$0xff] }
 0x1b2   :  { %5557 = vmatpush.bf16.msrb.mxu0 %v8666_v11  ;;  %v8705_v11 = vld [vmem:[%s10779_s1 + $0xe50] sm:$0xff] }
 0x1b3   :  { %5570 = vmatpush.bf16.msrb.mxu1 %v8674_v12  ;;  %v8713_v12 = vld [vmem:[%s10779_s1 + $0xe90] sm:$0xff] }
 0x1b4   :  { %5583 = vmatpush.bf16.msrb.mxu2 %v8682_v13  ;;  %v8721_v13 = vld [vmem:[%s10779_s1 + $0xed0] sm:$0xff] }
 0x1b5   :  { %5596 = vmatpush.bf16.msrb.mxu3 %v8690_v16  ;;  %v8704_v16 = vld [vmem:[%s10779_s1 + $0xe48] sm:$0xff] }
 0x1b6   :  { %5558 = vmatpush.bf16.msrb.mxu0 %v8665_v20 }
 0x1b7   :  { %5571 = vmatpush.bf16.msrb.mxu1 %v8673_v22  ;;  %v8703_v22 = vld [vmem:[%s10779_s1 + $0xe40] sm:$0xff] }
 0x1b8   :  { %5584 = vmatpush.bf16.msrb.mxu2 %v8681_v23  ;;  %v8711_v23 = vld [vmem:[%s10779_s1 + $0xe80] sm:$0xff] }
 0x1b9   :  { %5597 = vmatpush.bf16.msrb.mxu3 %v8689_v24  ;;  %v131_v24 = vld.sshfl [vmem:[#allocation1] sm:$0xff pattern:$0x73625140] }
 0x1ba   :  { %5559 = vmatpush.bf16.msrb.mxu0 %v8664_v25  ;;  %v133_v25 = vld.sshfl [vmem:[#allocation1 + $0x10] sm:$0xff pattern:$0x73625140] }
 0x1bb   :  { %5572 = vmatpush.bf16.msrb.mxu1 %v8672_v27  ;;  %v8742_v27 = vld [vmem:[%s10779_s1 + $0xf78] sm:$0xff] }
 0x1bc   :  { %5585 = vmatpush.bf16.msrb.mxu2 %v8680_v28  ;;  %v132_v28 = vld.sshfl [vmem:[#allocation1 + $0x8] sm:$0xff pattern:$0x73625140] }
 0x1bd   :  { %5598 = vmatpush.bf16.msrb.mxu3 %v8688_v30  ;;  %v8719_v30 = vld [vmem:[%s10779_s1 + $0xec0] sm:$0xff]  ;;  %v278_v35 = vpack.c.bf16 %v132_v28, %v132_v28  ;;  %v8781_v28 = vld [vmem:[%s10779_s1 + $0x10b0] sm:$0xff] }
 0x1be   :  { %5560 = vmatpush.bf16.msrb.mxu0 %v8663_v32  ;;  %v5354_v56 = vpop.f32.mrf.mxu0  ;;  %v277_v32 = vpack.c.bf16 %v131_v24, %v131_v24 }
 0x1bf   :  { %5573 = vmatpush.bf16.msrb.mxu1 %v8671_v33  ;;  %v5355_v57 = vadd.f32 %v5354_v56, %v10313_v19  ;;  %v5367_v59 = vpop.f32.mrf.mxu1  ;;  %v8720_v19 = vld [vmem:[%s10779_s1 + $0xec8] sm:$0xff]  ;;  %v279_v33 = vpack.c.bf16 %v133_v25, %v133_v25 }
 0x1c0   :  { %5586 = vmatpush.bf16.msrb.mxu2 %v8679_v34  ;;  %v8758_v34 = vld [vmem:[%s10779_s1 + $0xff8] sm:$0xff] }
 0x1c1   :  { %5599 = vmatpush.bf16.msrb.mxu3 %v8687_v41  ;;  %5561 = vmatmul.bf16.vlgmr.msrb.gmra.mxu0 %v273_v43  ;;  %v5368_v62 = vadd.f32 %v5367_v59, %v5355_v57  ;;  %v8732_v41 = vld [vmem:[%s10779_s1 + $0xf28] sm:$0xff] }
 0x1c2   :  { %5605 = vmatpush.bf16.msra.mxu0 %v8702_v37  ;;  %5574 = vmatmul.bf16.vlgmr.msrb.gmra.mxu1 %v274_v46  ;;  %v8733_v37 = vld [vmem:[%s10779_s1 + $0xf30] sm:$0xff]  ;;  %v8748_v43 = vld [vmem:[%s10779_s1 + $0xfa8] sm:$0xff] }
 0x1c3   :  { %5618 = vmatpush.bf16.msra.mxu1 %v8710_v38  ;;  %5587 = vmatmul.bf16.vlgmr.msrb.gmra.mxu2 %v275_v44  ;;  %v8741_v38 = vld [vmem:[%s10779_s1 + $0xf70] sm:$0xff]  ;;  %v8756_v44 = vld [vmem:[%s10779_s1 + $0xfe8] sm:$0xff] }
 0x1c4   :  { %5631 = vmatpush.bf16.msra.mxu2 %v8718_v40  ;;  %5600 = vmatmul.bf16.vlgmr.msrb.gmra.mxu3 %v276_v47  ;;  %v8757_v40 = vld [vmem:[%s10779_s1 + $0xff0] sm:$0xff]  ;;  %v8731_v47 = vld [vmem:[%s10779_s1 + $0xf20] sm:$0xff] }
 0x1c5   :  { %5644 = vmatpush.bf16.msra.mxu3 %v8726_v45 }
 0x1c6   :  { %5606 = vmatpush.bf16.msra.mxu0 %v8701_v48  ;;  %v5380_v3 = vpop.f32.mrf.mxu2  ;;  %v5356_v7 = vpop.f32.mrf.mxu0 }
 0x1c7   :  { %5619 = vmatpush.bf16.msra.mxu1 %v8709_v49  ;;  %v5381_v4 = vadd.f32 %v5380_v3, %v5368_v62  ;;  %v5393_v6 = vpop.f32.mrf.mxu3  ;;  %v5369_v10 = vpop.f32.mrf.mxu1  ;;  %v8739_v49 = vld [vmem:[%s10779_s1 + $0xf60] sm:$0xff]  ;;  %v8729_v62 = vld [vmem:[%s10779_s1 + $0xf10] sm:$0xff]  ;;  %v8728_v3 = vld [vmem:[%s10779_s1 + $0xf08] sm:$0xff] }
 0x1c8   :  { %5632 = vmatpush.bf16.msra.mxu2 %v8717_v50  ;;  %v8747_v50 = vld [vmem:[%s10779_s1 + $0xfa0] sm:$0xff] }
 0x1c9   :  { %5645 = vmatpush.bf16.msra.mxu3 %v8725_v51  ;;  %v10415_v8 = vadd.f32 %v5393_v6, %v5381_v4  ;;  %v38_v4 = vld [vmem:[%s10778_s0 + $0x80] sm:$0xff]  ;;  %v8744_v6 = vld [vmem:[%s10779_s1 + $0xf88] sm:$0xff] }
 0x1ca   :  { %5607 = vmatpush.bf16.msra.mxu0 %v8700_v52  ;;  %v8755_v52 = vld [vmem:[%s10779_s1 + $0xfe0] sm:$0xff]  ;;  %139 = vst [vmem:[#allocation1] ss:$4 sm:$0xff] %v38_v4  ;;  %v8798_v4 = vld [vmem:[%s10779_s1 + $0x1138] sm:$0xff] }
 0x1cb   :  { %5620 = vmatpush.bf16.msra.mxu1 %v8708_v53  ;;  %v8730_v53 = vld [vmem:[%s10779_s1 + $0xf18] sm:$0xff]  ;;  %v8727_v10 = vld [vmem:[%s10779_s1 + $0xf00] sm:$0xff] }
 0x1cc   :  { %5633 = vmatpush.bf16.msra.mxu2 %v8716_v54  ;;  %v8738_v54 = vld [vmem:[%s10779_s1 + $0xf58] sm:$0xff] }
 0x1cd   :  { %5646 = vmatpush.bf16.msra.mxu3 %v8724_v55  ;;  %v8746_v55 = vld [vmem:[%s10779_s1 + $0xf98] sm:$0xff] }
 0x1ce   :  { %5608 = vmatpush.bf16.msra.mxu0 %v8699_v58  ;;  %v5382_v18 = vpop.f32.mrf.mxu2  ;;  %v8754_v58 = vld [vmem:[%s10779_s1 + $0xfd8] sm:$0xff] }
 0x1cf   :  { %5621 = vmatpush.bf16.msra.mxu1 %v8707_v60  ;;  %v5395_v20 = vpop.f32.mrf.mxu3  ;;  %v8782_v18 = vld [vmem:[%s10779_s1 + $0x10b8] sm:$0xff] }
 0x1d0   :  { %5634 = vmatpush.bf16.msra.mxu2 %v8715_v61  ;;  %v138_v20 = vld.sshfl [vmem:[#allocation1 + $0x38] sm:$0xff pattern:$0x73625140] }
 0x1d1   :  { %5647 = vmatpush.bf16.msra.mxu3 %v8723_v63  ;;  %v284_v25 = vpack.c.bf16 %v138_v20, %v138_v20  ;;  %v8804_v20 = vld [vmem:[%s10779_s1 + $0x1168] sm:$0xff] }
 0x1d2   :  { %5609 = vmatpush.bf16.msra.mxu0 %v8698_v0  ;;  %v8737_v0 = vld [vmem:[%s10779_s1 + $0xf50] sm:$0xff] }
 0x1d3   :  { %5622 = vmatpush.bf16.msra.mxu1 %v8706_v1  ;;  %v8745_v1 = vld [vmem:[%s10779_s1 + $0xf90] sm:$0xff] }
 0x1d4   :  { %5635 = vmatpush.bf16.msra.mxu2 %v8714_v2  ;;  %v8753_v2 = vld [vmem:[%s10779_s1 + $0xfd0] sm:$0xff] }
 0x1d5   :  { %5648 = vmatpush.bf16.msra.mxu3 %v8722_v5  ;;  %v8736_v5 = vld [vmem:[%s10779_s1 + $0xf48] sm:$0xff] }
 0x1d6   :  { %5610 = vmatpush.bf16.msra.mxu0 %v8697_v9 }
 0x1d7   :  { %5623 = vmatpush.bf16.msra.mxu1 %v8705_v11  ;;  %v8735_v11 = vld [vmem:[%s10779_s1 + $0xf40] sm:$0xff] }
 0x1d8   :  { %5636 = vmatpush.bf16.msra.mxu2 %v8713_v12  ;;  %v8743_v12 = vld [vmem:[%s10779_s1 + $0xf80] sm:$0xff] }
 0x1d9   :  { %5649 = vmatpush.bf16.msra.mxu3 %v8721_v13  ;;  %v135_v13 = vld.sshfl [vmem:[#allocation1 + $0x20] sm:$0xff pattern:$0x73625140] }
 0x1da   :  { %5611 = vmatpush.bf16.msra.mxu0 %v8696_v14  ;;  %v137_v14 = vld.sshfl [vmem:[#allocation1 + $0x30] sm:$0xff pattern:$0x73625140] }
 0x1db   :  { %5624 = vmatpush.bf16.msra.mxu1 %v8704_v16  ;;  %v8774_v16 = vld [vmem:[%s10779_s1 + $0x1078] sm:$0xff] }
 0x1dc   :  { %5637 = vmatpush.bf16.msra.mxu2 %v8712_v17  ;;  %v136_v17 = vld.sshfl [vmem:[#allocation1 + $0x28] sm:$0xff pattern:$0x73625140] }
 0x1dd   :  { %5650 = vmatpush.bf16.msra.mxu3 %v8720_v19  ;;  %v8751_v19 = vld [vmem:[%s10779_s1 + $0xfc0] sm:$0xff]  ;;  %v282_v24 = vpack.c.bf16 %v136_v17, %v136_v17  ;;  %v8813_v17 = vld [vmem:[%s10779_s1 + $0x11b0] sm:$0xff] }
 0x1de   :  { %5612 = vmatpush.bf16.msra.mxu0 %v8695_v21  ;;  %v5406_v45 = vpop.f32.mrf.mxu0  ;;  %v281_v21 = vpack.c.bf16 %v135_v13, %v135_v13  ;;  %v8818_v13 = vld [vmem:[%s10779_s1 + $0x11d8] sm:$0xff] }
 0x1df   :  { %5625 = vmatpush.bf16.msra.mxu1 %v8703_v22  ;;  %v5407_v46 = vadd.f32 %v5406_v45, %v10415_v8  ;;  %v5419_v48 = vpop.f32.mrf.mxu1  ;;  %v8752_v8 = vld [vmem:[%s10779_s1 + $0xfc8] sm:$0xff]  ;;  %v283_v22 = vpack.c.bf16 %v137_v14, %v137_v14 }
 0x1e0   :  { %5638 = vmatpush.bf16.msra.mxu2 %v8711_v23  ;;  %v8790_v23 = vld [vmem:[%s10779_s1 + $0x10f8] sm:$0xff] }
 0x1e1   :  { %5651 = vmatpush.bf16.msra.mxu3 %v8719_v30  ;;  %5613 = vmatmul.bf16.vlgmr.msra.gmra.mxu0 %v277_v32  ;;  %v5420_v51 = vadd.f32 %v5419_v48, %v5407_v46  ;;  %v8764_v30 = vld [vmem:[%s10779_s1 + $0x1028] sm:$0xff]  ;;  %v8786_v48 = vld [vmem:[%s10779_s1 + $0x10d8] sm:$0xff] }
 0x1e2   :  { %5657 = vmatpush.bf16.msrb.mxu0 %v8734_v26  ;;  %5626 = vmatmul.bf16.vlgmr.msra.gmra.mxu1 %v278_v35  ;;  %v8765_v26 = vld [vmem:[%s10779_s1 + $0x1030] sm:$0xff]  ;;  %v8780_v32 = vld [vmem:[%s10779_s1 + $0x10a8] sm:$0xff] }
 0x1e3   :  { %5670 = vmatpush.bf16.msrb.mxu1 %v8742_v27  ;;  %5639 = vmatmul.bf16.vlgmr.msra.gmra.mxu2 %v279_v33  ;;  %v8773_v27 = vld [vmem:[%s10779_s1 + $0x1070] sm:$0xff]  ;;  %v8788_v33 = vld [vmem:[%s10779_s1 + $0x10e8] sm:$0xff] }
 0x1e4   :  { %5683 = vmatpush.bf16.msrb.mxu2 %v8750_v29  ;;  %5652 = vmatmul.bf16.vlgmr.msra.gmra.mxu3 %v280_v36  ;;  %v8789_v29 = vld [vmem:[%s10779_s1 + $0x10f0] sm:$0xff]  ;;  %v8763_v36 = vld [vmem:[%s10779_s1 + $0x1020] sm:$0xff]  ;;  %v39_v46 = vld [vmem:[%s10778_s0 + $0x88] sm:$0xff] }
 0x1e5   :  { %5696 = vmatpush.bf16.msrb.mxu3 %v8758_v34  ;;  %140 = vst [vmem:[#allocation1 + $0x20] ss:$4 sm:$0xff] %v39_v46  ;;  %v8800_v46 = vld [vmem:[%s10779_s1 + $0x1148] sm:$0xff] }
 0x1e6   :  { %5658 = vmatpush.bf16.msrb.mxu0 %v8733_v37  ;;  %v5432_v56 = vpop.f32.mrf.mxu2  ;;  %v5408_v60 = vpop.f32.mrf.mxu0 }
 0x1e7   :  { %5671 = vmatpush.bf16.msrb.mxu1 %v8741_v38  ;;  %v5433_v57 = vadd.f32 %v5432_v56, %v5420_v51  ;;  %v5445_v59 = vpop.f32.mrf.mxu3  ;;  %v5421_v63 = vpop.f32.mrf.mxu1  ;;  %v8771_v38 = vld [vmem:[%s10779_s1 + $0x1060] sm:$0xff]  ;;  %v8785_v56 = vld [vmem:[%s10779_s1 + $0x10d0] sm:$0xff] }
 0x1e8   :  { %5684 = vmatpush.bf16.msrb.mxu2 %v8749_v39  ;;  %v8779_v39 = vld [vmem:[%s10779_s1 + $0x10a0] sm:$0xff] }
 0x1e9   :  { %5697 = vmatpush.bf16.msrb.mxu3 %v8757_v40  ;;  %v10517_v61 = vadd.f32 %v5445_v59, %v5433_v57  ;;  %v8760_v57 = vld [vmem:[%s10779_s1 + $0x1008] sm:$0xff]  ;;  %v8759_v63 = vld [vmem:[%s10779_s1 + $0x1000] sm:$0xff] }
 0x1ea   :  { %5659 = vmatpush.bf16.msrb.mxu0 %v8732_v41  ;;  %v8787_v41 = vld [vmem:[%s10779_s1 + $0x10e0] sm:$0xff]  ;;  %v8776_v59 = vld [vmem:[%s10779_s1 + $0x1088] sm:$0xff] }
 0x1eb   :  { %5672 = vmatpush.bf16.msrb.mxu1 %v8740_v42  ;;  %v8762_v42 = vld [vmem:[%s10779_s1 + $0x1018] sm:$0xff] }
 0x1ec   :  { %5685 = vmatpush.bf16.msrb.mxu2 %v8748_v43  ;;  %v8770_v43 = vld [vmem:[%s10779_s1 + $0x1058] sm:$0xff] }
 0x1ed   :  { %5698 = vmatpush.bf16.msrb.mxu3 %v8756_v44  ;;  %v8778_v44 = vld [vmem:[%s10779_s1 + $0x1098] sm:$0xff] }
 0x1ee   :  { %5660 = vmatpush.bf16.msrb.mxu0 %v8731_v47  ;;  %v5434_v7 = vpop.f32.mrf.mxu2 }
 0x1ef   :  { %5673 = vmatpush.bf16.msrb.mxu1 %v8739_v49  ;;  %v5447_v9 = vpop.f32.mrf.mxu3  ;;  %v8814_v7 = vld [vmem:[%s10779_s1 + $0x11b8] sm:$0xff] }
 0x1f0   :  { %5686 = vmatpush.bf16.msrb.mxu2 %v8747_v50  ;;  %v144_v9 = vld.sshfl [vmem:[#allocation1 + $0x18] sm:$0xff pattern:$0x73625140] }
 0x1f1   :  { %5699 = vmatpush.bf16.msrb.mxu3 %v8755_v52  ;;  %v8761_v52 = vld [vmem:[%s10779_s1 + $0x1010] sm:$0xff]  ;;  %v288_v14 = vpack.c.bf16 %v144_v9, %v144_v9 }
 0x1f2   :  { %5661 = vmatpush.bf16.msrb.mxu0 %v8730_v53 }
 0x1f3   :  { %5674 = vmatpush.bf16.msrb.mxu1 %v8738_v54  ;;  %v8769_v54 = vld [vmem:[%s10779_s1 + $0x1050] sm:$0xff] }
 0x1f4   :  { %5687 = vmatpush.bf16.msrb.mxu2 %v8746_v55  ;;  %v8777_v55 = vld [vmem:[%s10779_s1 + $0x1090] sm:$0xff] }
 0x1f5   :  { %5700 = vmatpush.bf16.msrb.mxu3 %v8754_v58  ;;  %v8768_v58 = vld [vmem:[%s10779_s1 + $0x1048] sm:$0xff] }
 0x1f6   :  { %5662 = vmatpush.bf16.msrb.mxu0 %v8729_v62 }
 0x1f7   :  { %5675 = vmatpush.bf16.msrb.mxu1 %v8737_v0  ;;  %v8767_v0 = vld [vmem:[%s10779_s1 + $0x1040] sm:$0xff] }
 0x1f8   :  { %5688 = vmatpush.bf16.msrb.mxu2 %v8745_v1  ;;  %v8775_v1 = vld [vmem:[%s10779_s1 + $0x1080] sm:$0xff] }
 0x1f9   :  { %5701 = vmatpush.bf16.msrb.mxu3 %v8753_v2  ;;  %v141_v2 = vld.sshfl [vmem:[#allocation1] sm:$0xff pattern:$0x73625140] }
 0x1fa   :  { %5663 = vmatpush.bf16.msrb.mxu0 %v8728_v3  ;;  %v143_v3 = vld.sshfl [vmem:[#allocation1 + $0x10] sm:$0xff pattern:$0x73625140] }
 0x1fb   :  { %5676 = vmatpush.bf16.msrb.mxu1 %v8736_v5  ;;  %v8806_v5 = vld [vmem:[%s10779_s1 + $0x1178] sm:$0xff] }
 0x1fc   :  { %5689 = vmatpush.bf16.msrb.mxu2 %v8744_v6  ;;  %v142_v6 = vld.sshfl [vmem:[#allocation1 + $0x8] sm:$0xff pattern:$0x73625140] }
 0x1fd   :  { %5702 = vmatpush.bf16.msrb.mxu3 %v8752_v8  ;;  %v8783_v8 = vld [vmem:[%s10779_s1 + $0x10c0] sm:$0xff] }
 0x1fe   :  { %5664 = vmatpush.bf16.msrb.mxu0 %v8727_v10  ;;  %v5458_v34 = vpop.f32.mrf.mxu0  ;;  %v285_v10 = vpack.c.bf16 %v141_v2, %v141_v2 }
 0x1ff   :  { %5677 = vmatpush.bf16.msrb.mxu1 %v8735_v11  ;;  %v5459_v35 = vadd.f32 %v5458_v34, %v10517_v61  ;;  %v5471_v37 = vpop.f32.mrf.mxu1  ;;  %v8784_v61 = vld [vmem:[%s10779_s1 + $0x10c8] sm:$0xff]  ;;  %v287_v11 = vpack.c.bf16 %v143_v3, %v143_v3 }
 0x200   :  { %5690 = vmatpush.bf16.msrb.mxu2 %v8743_v12  ;;  %v286_v12 = vpack.c.bf16 %v142_v6, %v142_v6 }
 0x201   :  { %5703 = vmatpush.bf16.msrb.mxu3 %v8751_v19  ;;  %5665 = vmatmul.bf16.vlgmr.msrb.gmra.mxu0 %v281_v21  ;;  %v5472_v40 = vadd.f32 %v5471_v37, %v5459_v35  ;;  %v8796_v19 = vld [vmem:[%s10779_s1 + $0x1128] sm:$0xff]  ;;  %v148_v35 = vld.sshfl [vmem:[#allocation1 + $0x38] sm:$0xff pattern:$0x73625140] }
 0x202   :  { %5709 = vmatpush.bf16.msra.mxu0 %v8766_v15  ;;  %5678 = vmatmul.bf16.vlgmr.msrb.gmra.mxu1 %v282_v24  ;;  %v8797_v15 = vld [vmem:[%s10779_s1 + $0x1130] sm:$0xff]  ;;  %v8812_v21 = vld [vmem:[%s10779_s1 + $0x11a8] sm:$0xff] }
 0x203   :  { %5722 = vmatpush.bf16.msra.mxu1 %v8774_v16  ;;  %5691 = vmatmul.bf16.vlgmr.msrb.gmra.mxu2 %v283_v22  ;;  %v8805_v16 = vld [vmem:[%s10779_s1 + $0x1170] sm:$0xff] }
 0x204   :  { %5735 = vmatpush.bf16.msra.mxu2 %v8782_v18  ;;  %5704 = vmatmul.bf16.vlgmr.msrb.gmra.mxu3 %v284_v25  ;;  %v8817_v18 = vld [vmem:[%s10779_s1 + $0x11d0] sm:$0xff]  ;;  %v8795_v25 = vld [vmem:[%s10779_s1 + $0x1120] sm:$0xff] }
 0x205   :  { %5748 = vmatpush.bf16.msra.mxu3 %v8790_v23  ;;  %v8816_v23 = vld [vmem:[%s10779_s1 + $0x11c8] sm:$0xff] }
 0x206   :  { %5710 = vmatpush.bf16.msra.mxu0 %v8765_v26  ;;  %v5484_v45 = vpop.f32.mrf.mxu2  ;;  %v5460_v50 = vpop.f32.mrf.mxu0 }
 0x207   :  { %5723 = vmatpush.bf16.msra.mxu1 %v8773_v27  ;;  %v5485_v47 = vadd.f32 %v5484_v45, %v5472_v40  ;;  %v5497_v49 = vpop.f32.mrf.mxu3  ;;  %v5473_v53 = vpop.f32.mrf.mxu1  ;;  %v8803_v27 = vld [vmem:[%s10779_s1 + $0x1160] sm:$0xff]  ;;  %v8793_v40 = vld [vmem:[%s10779_s1 + $0x1110] sm:$0xff]  ;;  %v8792_v45 = vld [vmem:[%s10779_s1 + $0x1108] sm:$0xff] }
 0x208   :  { %5736 = vmatpush.bf16.msra.mxu2 %v8781_v28  ;;  %v8811_v28 = vld [vmem:[%s10779_s1 + $0x11a0] sm:$0xff] }
 0x209   :  { %5749 = vmatpush.bf16.msra.mxu3 %v8789_v29  ;;  %v10622_v51 = vadd.f32 %v5497_v49, %v5485_v47  ;;  %v8808_v47 = vld [vmem:[%s10779_s1 + $0x1188] sm:$0xff]  ;;  %v8791_v49 = vld [vmem:[%s10779_s1 + $0x1100] sm:$0xff] }
 0x20a   :  { %5711 = vmatpush.bf16.msra.mxu0 %v8764_v30  ;;  %v8815_v30 = vld [vmem:[%s10779_s1 + $0x11c0] sm:$0xff] }
 0x20b   :  { %5724 = vmatpush.bf16.msra.mxu1 %v8772_v31  ;;  %v8794_v31 = vld [vmem:[%s10779_s1 + $0x1118] sm:$0xff]  ;;  %v145_v53 = vld.sshfl [vmem:[#allocation1 + $0x20] sm:$0xff pattern:$0x73625140] }
 0x20c   :  { %5737 = vmatpush.bf16.msra.mxu2 %v8780_v32  ;;  %v8802_v32 = vld [vmem:[%s10779_s1 + $0x1158] sm:$0xff] }
 0x20d   :  { %5750 = vmatpush.bf16.msra.mxu3 %v8788_v33  ;;  %v8810_v33 = vld [vmem:[%s10779_s1 + $0x1198] sm:$0xff] }
 0x20e   :  { %5712 = vmatpush.bf16.msra.mxu0 %v8763_v36  ;;  %v5486_v60 = vpop.f32.mrf.mxu2 }
 0x20f   :  { %5725 = vmatpush.bf16.msra.mxu1 %v8771_v38  ;;  %v5499_v62 = vpop.f32.mrf.mxu3 }
 0x210   :  { %5738 = vmatpush.bf16.msra.mxu2 %v8779_v39 }
 0x211   :  { %5751 = vmatpush.bf16.msra.mxu3 %v8787_v41  ;;  %v292_v41 = vpack.c.bf16 %v148_v35, %v148_v35  ;;  %v8820_v35 = vld [vmem:[%s10781_s3 + $0x8] sm:$0xff] }
 0x212   :  { %5713 = vmatpush.bf16.msra.mxu0 %v8762_v42 }
 0x213   :  { %5726 = vmatpush.bf16.msra.mxu1 %v8770_v43  ;;  %v8801_v43 = vld [vmem:[%s10779_s1 + $0x1150] sm:$0xff] }
 0x214   :  { %5739 = vmatpush.bf16.msra.mxu2 %v8778_v44  ;;  %v8809_v44 = vld [vmem:[%s10779_s1 + $0x1190] sm:$0xff] }
 0x215   :  { %5752 = vmatpush.bf16.msra.mxu3 %v8786_v48 }
 0x216   :  { %5714 = vmatpush.bf16.msra.mxu0 %v8761_v52  ;;  %v8807_v52 = vld [vmem:[%s10779_s1 + $0x1180] sm:$0xff] }
 0x217   :  { %5727 = vmatpush.bf16.msra.mxu1 %v8769_v54  ;;  %v146_v54 = vld.sshfl [vmem:[#allocation1 + $0x28] sm:$0xff pattern:$0x73625140] }
 0x218   :  { %5740 = vmatpush.bf16.msra.mxu2 %v8777_v55  ;;  %v147_v55 = vld.sshfl [vmem:[#allocation1 + $0x30] sm:$0xff pattern:$0x73625140] }
 0x219   :  { %5753 = vmatpush.bf16.msra.mxu3 %v8785_v56  ;;  %v289_v56 = vpack.c.bf16 %v145_v53, %v145_v53 }
 0x21a   :  { %5715 = vmatpush.bf16.msra.mxu0 %v8760_v57  ;;  %v290_v57 = vpack.c.bf16 %v146_v54, %v146_v54 }
 0x21b   :  { %5728 = vmatpush.bf16.msra.mxu1 %v8768_v58  ;;  %v291_v58 = vpack.c.bf16 %v147_v55, %v147_v55 }
 0x21c   :  { %5741 = vmatpush.bf16.msra.mxu2 %v8776_v59 }
 0x21d   :  { %5754 = vmatpush.bf16.msra.mxu3 %v8784_v61 }
 0x21e   :  { %5716 = vmatpush.bf16.msra.mxu0 %v8759_v63  ;;  %v5510_v22 = vpop.f32.mrf.mxu0 }
 0x21f   :  { %5729 = vmatpush.bf16.msra.mxu1 %v8767_v0  ;;  %v5511_v24 = vadd.f32 %v5510_v22, %v10622_v51  ;;  %v5523_v26 = vpop.f32.mrf.mxu1  ;;  %v8799_v51 = vld [vmem:[%s10779_s1 + $0x1140] sm:$0xff]  ;;  %v8826_v22 = vld [vmem:[%s10781_s3 + $0x38] sm:$0xff] }
 0x220   :  { %5742 = vmatpush.bf16.msra.mxu2 %v8775_v1 }
 0x221   :  { %5755 = vmatpush.bf16.msra.mxu3 %v8783_v8  ;;  %5717 = vmatmul.bf16.vlgmr.msra.gmra.mxu0 %v285_v10  ;;  %v5524_v29 = vadd.f32 %v5523_v26, %v5511_v24  ;;  %v8825_v26 = vld [vmem:[%s10781_s3 + $0x30] sm:$0xff] }
 0x222   :  { %5761 = vmatpush.bf16.msrb.mxu0 %v8798_v4  ;;  %5730 = vmatmul.bf16.vlgmr.msra.gmra.mxu1 %v286_v12 }
 0x223   :  { %5774 = vmatpush.bf16.msrb.mxu1 %v8806_v5  ;;  %5743 = vmatmul.bf16.vlgmr.msra.gmra.mxu2 %v287_v11 }
 0x224   :  { %5787 = vmatpush.bf16.msrb.mxu2 %v8814_v7  ;;  %5756 = vmatmul.bf16.vlgmr.msra.gmra.mxu3 %v288_v14 }
 0x225   :  { %5804 = vmatpush.bf16.msrb.mxu3 %v8818_v13 }
 0x226   :  { %5762 = vmatpush.bf16.msrb.mxu0 %v8797_v15  ;;  %v5536_v34 = vpop.f32.mrf.mxu2  ;;  %v5512_v38 = vpop.f32.mrf.mxu0 }
 0x227   :  { %5775 = vmatpush.bf16.msrb.mxu1 %v8805_v16  ;;  %v5537_v36 = vadd.f32 %v5536_v34, %v5524_v29  ;;  %v5549_v37 = vpop.f32.mrf.mxu3  ;;  %v5525_v42 = vpop.f32.mrf.mxu1 }
 0x228   :  { %5788 = vmatpush.bf16.msrb.mxu2 %v8813_v17 }
 0x229   :  { %5805 = vmatpush.bf16.msrb.mxu3 %v8817_v18  ;;  %v5550_v39 = vadd.f32 %v5549_v37, %v5537_v36 }
 0x22a   :  { %5763 = vmatpush.bf16.msrb.mxu0 %v8796_v19 }
 0x22b   :  { %5776 = vmatpush.bf16.msrb.mxu1 %v8804_v20 }
 0x22c   :  { %5789 = vmatpush.bf16.msrb.mxu2 %v8812_v21 }
 0x22d   :  { %5806 = vmatpush.bf16.msrb.mxu3 %v8816_v23 }
 0x22e   :  { %5764 = vmatpush.bf16.msrb.mxu0 %v8795_v25  ;;  %v5538_v48 = vpop.f32.mrf.mxu2 }
 0x22f   :  { %5777 = vmatpush.bf16.msrb.mxu1 %v8803_v27  ;;  %v5551_v50 = vpop.f32.mrf.mxu3 }
 0x230   :  { %5790 = vmatpush.bf16.msrb.mxu2 %v8811_v28  ;;  %v8824_v28 = vld [vmem:[%s10781_s3 + $0x28] sm:$0xff] }
 0x231   :  { %5807 = vmatpush.bf16.msrb.mxu3 %v8815_v30  ;;  %v8823_v30 = vld [vmem:[%s10781_s3 + $0x20] sm:$0xff] }
 0x232   :  { %5765 = vmatpush.bf16.msrb.mxu0 %v8794_v31  ;;  %v8822_v31 = vld [vmem:[%s10781_s3 + $0x18] sm:$0xff] }
 0x233   :  { %5778 = vmatpush.bf16.msrb.mxu1 %v8802_v32 }
 0x234   :  { %5791 = vmatpush.bf16.msrb.mxu2 %v8810_v33  ;;  %8214 = vmatmul.msk.bf16.vlgmr.msrb.gmra.mxu3 %vm4873_vm0, %v292_v41  ;;  %v8821_v33 = vld [vmem:[%s10781_s3 + $0x10] sm:$0xff] }
 0x235   :  { %5883 = vmatpush.bf16.msra.mxu3 %v8826_v22 }
 0x236   :  { %5766 = vmatpush.bf16.msrb.mxu0 %v8793_v40  ;;  %v8819_v40 = vld [vmem:[%s10781_s3] sm:$0xff] }
 0x237   :  { %5779 = vmatpush.bf16.msrb.mxu1 %v8801_v43 }
 0x238   :  { %5792 = vmatpush.bf16.msrb.mxu2 %v8809_v44 }
 0x239   :  { %5884 = vmatpush.bf16.msra.mxu3 %v8825_v26 }
 0x23a   :  { %5767 = vmatpush.bf16.msrb.mxu0 %v8792_v45 }
 0x23b   :  { %5780 = vmatpush.bf16.msrb.mxu1 %v8800_v46 }
 0x23c   :  { %5793 = vmatpush.bf16.msrb.mxu2 %v8808_v47 }
 0x23d   :  { %5885 = vmatpush.bf16.msra.mxu3 %v8824_v28 }
 0x23e   :  { %5768 = vmatpush.bf16.msrb.mxu0 %v8791_v49  ;;  %v5562_v59 = vpop.f32.mrf.mxu0 }
 0x23f   :  { %5781 = vmatpush.bf16.msrb.mxu1 %v8799_v51  ;;  %v5563_v60 = vadd.f32 %v5562_v59, %v5550_v39  ;;  %v5575_v61 = vpop.f32.mrf.mxu1 }
 0x240   :  { %5794 = vmatpush.bf16.msrb.mxu2 %v8807_v52 }
 0x241   :  { %5769 = vmatmul.bf16.vlgmr.msrb.gmra.mxu0 %v289_v56  ;;  %v5576_v62 = vadd.f32 %v5575_v61, %v5563_v60  ;;  %5886 = vmatpush.bf16.msra.mxu3 %v8823_v30 }
 0x242   :  { %5782 = vmatmul.bf16.vlgmr.msrb.gmra.mxu1 %v290_v57 }
 0x243   :  { %5795 = vmatmul.bf16.vlgmr.msrb.gmra.mxu2 %v291_v58 }
 0x245   :  { %5887 = vmatpush.bf16.msra.mxu3 %v8822_v31 }
 0x246   :  { %v5588_v63 = vpop.f32.mrf.mxu2  ;;  %v5564_v2 = vpop.f32.mrf.mxu0 }
 0x247   :  { %v5589_v0 = vadd.f32 %v5588_v63, %v5576_v62  ;;  %v5601_v1 = vpop.f32.mrf.mxu3  ;;  %v5577_v4 = vpop.f32.mrf.mxu1 }
 0x249   :  { %v5602_v3 = vadd.f32 %v5601_v1, %v5589_v0  ;;  %5888 = vmatpush.bf16.msra.mxu3 %v8821_v33  ;;  %v8829_v1 = vld [vmem:[%s10782_s4] ss:$0 sm:$0xff]  ;;  %s5915_s4 = sshll.u32 %s8860_s30, 4  ;;  %s5916_s4 = int_to_ptr.vmem [resolvable:$true] %s5915_s4 }
 0x24d   :  { %5889 = vmatpush.bf16.msra.mxu3 %v8820_v35 }
 0x24e   :  { %v5590_v5 = vpop.f32.mrf.mxu2 }
 0x24f   :  { %v5603_v6 = vpop.f32.mrf.mxu3 }
 0x251   :  { %5890 = vmatpush.bf16.msra.mxu3 %v8819_v40 }
 0x25e   :  { %v5614_v7 = vpop.f32.mrf.mxu0 }
 0x25f   :  { %v5615_v8 = vadd.f32 %v5614_v7, %v5602_v3  ;;  %v5627_v9 = vpop.f32.mrf.mxu1 }
 0x261   :  { %v5628_v10 = vadd.f32 %v5627_v9, %v5615_v8 }
 0x266   :  { %v5640_v11 = vpop.f32.mrf.mxu2  ;;  %v5616_v14 = vpop.f32.mrf.mxu0 }
 0x267   :  { %v5641_v12 = vadd.f32 %v5640_v11, %v5628_v10  ;;  %v5653_v13 = vpop.f32.mrf.mxu3  ;;  %v5629_v16 = vpop.f32.mrf.mxu1 }
 0x269   :  { %v5654_v15 = vadd.f32 %v5653_v13, %v5641_v12 }
 0x26e   :  { %v5642_v17 = vpop.f32.mrf.mxu2 }
 0x26f   :  { %v5655_v18 = vpop.f32.mrf.mxu3 }
 0x27e   :  { %v5666_v19 = vpop.f32.mrf.mxu0 }
 0x27f   :  { %v5679_v20 = vpop.f32.mrf.mxu1  ;;  %v5667_v37 = vadd.f32 %v5666_v19, %v5654_v15 }
 0x281   :  { %v5680_v42 = vadd.f32 %v5679_v20, %v5667_v37 }
 0x286   :  { %v5692_v21 = vpop.f32.mrf.mxu2  ;;  %v5668_v24 = vpop.f32.mrf.mxu0 }
 0x287   :  { %v5705_v23 = vpop.f32.mrf.mxu3  ;;  %v5681_v25 = vpop.f32.mrf.mxu1  ;;  %v5693_v43 = vadd.f32 %v5692_v21, %v5680_v42 }
 0x289   :  { %v5706_v46 = vadd.f32 %v5705_v23, %v5693_v43 }
 0x28e   :  { %v5694_v27 = vpop.f32.mrf.mxu2 }
 0x28f   :  { %v5707_v29 = vpop.f32.mrf.mxu3 }
 0x29e   :  { %v5718_v32 = vpop.f32.mrf.mxu0 }
 0x29f   :  { %v5731_v34 = vpop.f32.mrf.mxu1  ;;  %v5719_v47 = vadd.f32 %v5718_v32, %v5706_v46 }
 0x2a1   :  { %v5732_v48 = vadd.f32 %v5731_v34, %v5719_v47 }
 0x2a6   :  { %v5744_v36 = vpop.f32.mrf.mxu2  ;;  %v5720_v39 = vpop.f32.mrf.mxu0 }
 0x2a7   :  { %v5757_v38 = vpop.f32.mrf.mxu3  ;;  %v5733_v41 = vpop.f32.mrf.mxu1  ;;  %v5745_v50 = vadd.f32 %v5744_v36, %v5732_v48 }
 0x2a9   :  { %v5758_v51 = vadd.f32 %v5757_v38, %v5745_v50 }
 0x2ae   :  { %v5746_v44 = vpop.f32.mrf.mxu2 }
 0x2af   :  { %v5759_v45 = vpop.f32.mrf.mxu3 }
 0x2b7   :  { %v5809_v49 = vpop.f32.mrf.mxu3 }
 0x2be   :  { %v5770_v52 = vpop.f32.mrf.mxu0 }
 0x2bf   :  { %v5783_v53 = vpop.f32.mrf.mxu1  ;;  %v5771_v54 = vadd.f32 %v5770_v52, %v5758_v51  ;;  %v5811_v55 = vpop.f32.mrf.mxu3 }
 0x2c1   :  { %v5784_v56 = vadd.f32 %v5783_v53, %v5771_v54 }
 0x2c6   :  { %v5796_v57 = vpop.f32.mrf.mxu2  ;;  %v5772_v59 = vpop.f32.mrf.mxu0 }
 0x2c7   :  { %v5797_v58 = vadd.f32 %v5796_v57, %v5784_v56  ;;  %v5785_v60 = vpop.f32.mrf.mxu1 }
 0x2c9   :  { %v5810_v61 = vadd.f32 %v5809_v49, %v5797_v58 }
 0x2cb   :  { %v5813_v62 = vmax.f32 %v5810_v61, 0.0 }
 0x2cd   :  { %v5814_v63 = vpack.c.bf16 %v5813_v62, %v5813_v62 }
 0x2ce   :  { %v5798_v0 = vpop.f32.mrf.mxu2 }
 0x2cf   :  { %5891 = vmatmul.bf16.vlgmr.msra.gmra.mxu3 %v5814_v63 }
 0x352   :  { %v5892_v2 = vpop.f32.mrf.mxu3 }
 0x353   :  { %v5893_v3 = vadd.f32 %v8829_v1, %v5892_v2 }
 0x355   :  { %v5897_v4 = vsel %vm5896_vm1, %v5893_v3, -inf }
 0x356   :  { %5898 = vmax.xlane.f32.xlu0 %v5897_v4 }
 0x35a   :  { %v5894_v5 = vpop.f32.mrf.mxu3 }
 0x3c9   :  { %v5899_v6 = vpop.xlane.xlu0 %5898 }
 0x3ca   :  { %v5900_v7 = vsub.f32 %v5893_v3, %v5899_v6 }
 0x3cc   :  { %v5901_v8 = vmul.f32 1.442695, %v5900_v7 }
 0x3ce   :  { %8830 = vpow2.f32 %v5901_v8 }
 0x3d4   :  { %v8831_v9 = vpop.eup %8830 }
 0x3d5   :  { %v5903_v10 = vsel %vm5896_vm1, %v8831_v9, 0.0 }
 0x3d6   :  { %5904 = vadd.xlane.f32.xlu0 %v5903_v10 }
 0x449   :  { %v5905_v11 = vpop.xlane.xlu0 %5904 }
 0x44a   :  { %8832 = vlog2.f32 %v5905_v11 }
 0x450   :  { %v8833_v12 = vpop.eup %8832 }
 0x451   :  { %v5907_v13 = vmul.f32 0.6931472, %v8833_v12 }
 0x453   :  { %v5908_v14 = vsub.f32 %v5900_v7, %v5907_v13 }
 0x455   :  { %5909 = vst.msk [vmem:[#allocation2] sm:$0x3] %vm5896_vm1, %v5908_v14 }
 0x456   :  { %5920 = dma.vmem_to_hbm [thread:$0]  %s5916_s4, 32, %s5918_s7, [#allocation3]  }
 0x457   :  { %8858 = dma.done.wait [#allocation3], 32  }
 0x458   :  { %8859 = vsyncadd [#allocation3], 4294967264 }
 0x459   :  { %5925 = vsyncpa [#allocation3], 1 }

</bundles_post_ra>
